<compile_context>
chip_gen: v5e
topology: v5e:2x2
jax: 0.10.0
libtpu: 0.0.40
codegen_flags: <defaults>
</compile_context>

<pallas_src>
import functools

import jax
import jax.numpy as jnp
from jax import lax
from jax.experimental import pallas as pl
from jax.experimental.pallas import tpu as pltpu

_LANE = 128      # lane granularity
_SUB = 16        # sublane granularity used for bf16-friendly padding
_TM = 512        # lane tile of the spatial dim M
_TK = 512        # max contraction tile
_VMEM_LIMIT = 32 * 1024 * 1024


def _round_up(x, m):
    return ((x + m - 1) // m) * m


# --------------------------------------------------------------------------
# Pallas kernels
# --------------------------------------------------------------------------
def _convmm_kernel(w_ref, a_ref, s_ref, b_ref, o_ref, acc_ref, *, relu):
    # out[Cout, M_tile] = W[Cout, K_tile] @ patches[K_tile, M_tile]
    @pl.when(pl.program_id(1) == 0)
    def _init():
        acc_ref[...] = jnp.zeros_like(acc_ref)

    acc_ref[...] += jnp.dot(w_ref[...], a_ref[...],
                            preferred_element_type=jnp.float32)

    @pl.when(pl.program_id(1) == pl.num_programs(1) - 1)
    def _finalize():
        out = acc_ref[...] * s_ref[...] + b_ref[...]          # f32 epilogue
        if relu:
            out = jnp.maximum(out, 0.0)
        o_ref[...] = out.astype(o_ref.dtype)


def _convmm_res_kernel(w_ref, a_ref, s_ref, b_ref, r_ref, o_ref, acc_ref, *, relu):
    @pl.when(pl.program_id(1) == 0)
    def _init():
        acc_ref[...] = jnp.zeros_like(acc_ref)

    acc_ref[...] += jnp.dot(w_ref[...], a_ref[...],
                            preferred_element_type=jnp.float32)

    @pl.when(pl.program_id(1) == pl.num_programs(1) - 1)
    def _finalize():
        out = acc_ref[...] * s_ref[...] + b_ref[...] + r_ref[...].astype(jnp.float32)
        if relu:
            out = jnp.maximum(out, 0.0)
        o_ref[...] = out.astype(o_ref.dtype)


def _max3_kernel(a_ref, b_ref, c_ref, o_ref):
    a = a_ref[...].astype(jnp.float32)
    b = b_ref[...].astype(jnp.float32)
    c = c_ref[...].astype(jnp.float32)
    o_ref[...] = jnp.maximum(jnp.maximum(a, b), c).astype(o_ref.dtype)


# --------------------------------------------------------------------------
# Pallas wrappers
# --------------------------------------------------------------------------
def fused_convmm(wT, aT, scale, bias, residual=None, relu=False,
                 out_dtype=jnp.bfloat16):
    """out[N, M] = relu(scale * (wT @ aT) + bias (+ residual)).

    wT: (N, K) weights, aT: (K, M) im2col patches, residual: (N, M) or None.
    """
    N, K = wT.shape
    K2, M = aT.shape
    assert K == K2

    Np = _round_up(N, _SUB)
    Kp = _round_up(K, _SUB)
    if Kp > _TK:
        Kp = _round_up(Kp, _TK)
        tk = _TK
    else:
        tk = Kp
    tm = min(_TM, _round_up(M, _LANE))
    Mp = _round_up(M, tm)

    wT_p = jnp.pad(wT.astype(jnp.bfloat16), ((0, Np - N), (0, Kp - K)))
    aT_p = jnp.pad(aT.astype(jnp.bfloat16), ((0, Kp - K), (0, Mp - M)))
    s_p = jnp.pad(scale.astype(jnp.float32).reshape(N, 1), ((0, Np - N), (0, 0)))
    b_p = jnp.pad(bias.astype(jnp.float32).reshape(N, 1), ((0, Np - N), (0, 0)))

    in_specs = [
        pl.BlockSpec((Np, tk), lambda i, k: (0, k)),   # weights
        pl.BlockSpec((tk, tm), lambda i, k: (k, i)),   # patches
        pl.BlockSpec((Np, 1), lambda i, k: (0, 0)),    # bn scale
        pl.BlockSpec((Np, 1), lambda i, k: (0, 0)),    # bn bias
    ]
    args = [wT_p, aT_p, s_p, b_p]
    if residual is not None:
        r_p = jnp.pad(residual.astype(jnp.bfloat16), ((0, Np - N), (0, Mp - M)))
        in_specs.append(pl.BlockSpec((Np, tm), lambda i, k: (0, i)))
        args.append(r_p)
        kern = functools.partial(_convmm_res_kernel, relu=relu)
    else:
        kern = functools.partial(_convmm_kernel, relu=relu)

    out = pl.pallas_call(
        kern,
        out_shape=jax.ShapeDtypeStruct((Np, Mp), out_dtype),
        grid_spec=pltpu.PrefetchScalarGridSpec(
            num_scalar_prefetch=0,
            grid=(Mp // tm, Kp // tk),
            in_specs=in_specs,
            out_specs=pl.BlockSpec((Np, tm), lambda i, k: (0, i)),
            scratch_shapes=[pltpu.VMEM((Np, tm), jnp.float32)],
        ),
        compiler_params=pltpu.CompilerParams(
            dimension_semantics=("parallel", "arbitrary"),
            vmem_limit_bytes=_VMEM_LIMIT,
        ),
    )(*args)
    return out[:N, :M]


_MAX3_COLS = 512
_MAX3_ROWS = 64


def _max3(a, b, c):
    """Elementwise max of three same-shaped arrays via a gridded Pallas kernel."""
    shape, dtype = a.shape, a.dtype
    n = a.size
    rows = pl.cdiv(n, _MAX3_COLS)
    rows_p = _round_up(max(rows, 1), _MAX3_ROWS)
    total = rows_p * _MAX3_COLS

    def prep(x):
        x = x.reshape(-1)
        x = jnp.pad(x, (0, total - n))
        return x.reshape(rows_p, _MAX3_COLS)

    spec = pl.BlockSpec((_MAX3_ROWS, _MAX3_COLS), lambda i: (i, 0))
    out = pl.pallas_call(
        _max3_kernel,
        out_shape=jax.ShapeDtypeStruct((rows_p, _MAX3_COLS), dtype),
        grid_spec=pltpu.PrefetchScalarGridSpec(
            num_scalar_prefetch=0,
            grid=(rows_p // _MAX3_ROWS,),
            in_specs=[spec, spec, spec],
            out_specs=spec,
        ),
        compiler_params=pltpu.CompilerParams(
            dimension_semantics=("parallel",),
            vmem_limit_bytes=_VMEM_LIMIT,
        ),
    )(prep(a), prep(b), prep(c))
    return out.reshape(-1)[:n].reshape(shape)


def _pool1d_max(x, axis):
    # 1-D max pool, window 3, stride 2, no padding, along `axis`.
    n = x.shape[axis]
    no = (n - 3) // 2 + 1
    s0 = lax.slice_in_dim(x, 0, 2 * no - 1, stride=2, axis=axis)
    s1 = lax.slice_in_dim(x, 1, 2 * no, stride=2, axis=axis)
    s2 = lax.slice_in_dim(x, 2, 2 * no + 1, stride=2, axis=axis)
    return _max3(s0, s1, s2)


def maxpool3d(x):
    # x: (C, B, D, H, W); MaxPool3d(3, stride=2), separable over W, H, D.
    x = _pool1d_max(x, axis=4)
    x = _pool1d_max(x, axis=3)
    x = _pool1d_max(x, axis=2)
    return x


# --------------------------------------------------------------------------
# JAX glue: im2col (channel-major), conv+bn helper, BN folding, pools, FiLM
# --------------------------------------------------------------------------
def im2col_cm(x, ksize, stride, padding):
    # x: (Cin, B, D, H, W) -> patches (k^3*Cin, M) bf16, M = B*Do*Ho*Wo
    # ksize / stride / padding MUST be static Python ints.
    x = x.astype(jnp.bfloat16)
    C, B, D, H, W = x.shape
    if padding:
        x = jnp.pad(x, ((0, 0), (0, 0), (padding,) * 2, (padding,) * 2,
                        (padding,) * 2))
    Dp, Hp, Wp = D + 2 * padding, H + 2 * padding, W + 2 * padding
    Do = (Dp - ksize) // stride + 1
    Ho = (Hp - ksize) // stride + 1
    Wo = (Wp - ksize) // stride + 1
    taps = []
    for kd in range(ksize):
        for kh in range(ksize):
            for kw in range(ksize):
                taps.append(x[:, :, kd:kd + Do * stride:stride,
                              kh:kh + Ho * stride:stride,
                              kw:kw + Wo * stride:stride])
    p = jnp.stack(taps, axis=0)                 # (k^3, Cin, B, Do, Ho, Wo)
    M = B * Do * Ho * Wo
    return p.reshape(ksize ** 3 * C, M), (B, Do, Ho, Wo)


def conv_bn(x, w_torch, bn_scale, bn_bias, *, stride, relu, residual=None):
    # x: (Cin, B, D, H, W); w_torch: PyTorch Conv3d layout (Cout, Cin, k, k, k)
    # `stride` is a static Python int.
    Cout, Cin, k = w_torch.shape[0], w_torch.shape[1], w_torch.shape[2]
    padding = 1 if k == 3 else 0
    aT, (B, Do, Ho, Wo) = im2col_cm(x, k, stride, padding)
    wT = jnp.transpose(w_torch, (0, 2, 3, 4, 1)).reshape(Cout, k ** 3 * Cin)
    res = None
    if residual is not None:
        res = residual.reshape(Cout, B * Do * Ho * Wo)
    out = fused_convmm(wT, aT, bn_scale, bn_bias, residual=res, relu=relu)
    return out.reshape(Cout, B, Do, Ho, Wo)


def fold_bn(gamma, beta, mean, var, eps=1e-5):
    s = gamma / jnp.sqrt(var + eps)
    b = beta - mean * s
    return s.astype(jnp.float32), b.astype(jnp.float32)


def global_avgpool(x):
    # x: (C, B, D, H, W) -> (B, C), f32.  Tiny reduction: plain XLA.
    return jnp.transpose(jnp.mean(x.astype(jnp.float32), axis=(2, 3, 4)))


# --------------------------------------------------------------------------
# Parameter init (deterministic, synthetic).  NOTE: no Python ints in the
# pytree -- all structural config (strides, downsample presence) is static.
# --------------------------------------------------------------------------
def init_params(key, in_channels, in_tabular, n_outputs, n_missing, nb):
    keys = iter(jax.random.split(key, 128))

    def nrm(shape, scale=0.2):
        return jax.random.normal(next(keys), shape, jnp.float32) * scale

    def bn(c, affine=True):
        if affine:
            gamma = jax.random.uniform(next(keys), (c,), jnp.float32, 0.5, 1.5)
            beta = nrm((c,), 0.1)
        else:
            gamma = jnp.ones((c,), jnp.float32)
            beta = jnp.zeros((c,), jnp.float32)
        mean = nrm((c,), 0.1)
        var = jax.random.uniform(next(keys), (c,), jnp.float32, 0.5, 1.5)
        return fold_bn(gamma, beta, mean, var)

    def resblock_params(cin, cout, downsample):
        p = {"w1": nrm((cout, cin, 3, 3, 3)), "bn1": bn(cout),
             "w2": nrm((cout, cout, 3, 3, 3)), "bn2": bn(cout)}
        if downsample:
            p["wd"] = nrm((cout, cin, 1, 1, 1))
            p["bnd"] = bn(cout)
        return p

    params = {}
    params["emb"] = nrm((1, n_missing), 0.5)          # tab_missing_embeddings
    params["conv1_w"] = nrm((nb, in_channels, 3, 3, 3))
    params["conv1_bn"] = bn(nb)
    params["block1"] = resblock_params(nb, nb, downsample=False)
    params["block2"] = resblock_params(nb, 2 * nb, downsample=True)
    params["block3"] = resblock_params(2 * nb, 4 * nb, downsample=True)

    cin, cout, bottleneck = 4 * nb, 8 * nb, 7
    params["blockX"] = {
        "aux_w1": nrm((cin + in_tabular, bottleneck)),   # Linear (no bias)
        "aux_w2": nrm((bottleneck, 2 * cin)),            # Linear (no bias)
        "w1": nrm((cout, cin, 3, 3, 3)), "bn1": bn(cout),
        "w2": nrm((cout, cout, 3, 3, 3)), "bn2": bn(cout, affine=False),
        "wd": nrm((cout, cin, 1, 1, 1)), "bnd": bn(cout),
    }
    params["fc_w"] = nrm((8 * nb, n_outputs))
    params["fc_b"] = nrm((n_outputs,), 0.1)
    return params


# --------------------------------------------------------------------------
# Forward pass
# --------------------------------------------------------------------------
def build_features(tabular, emb, idx_missing, idx_without):
    values = tabular[:, 0, :]
    is_missing = tabular[:, 1, :]
    vals_wo = values[:, idx_without]
    vals_w = values[:, idx_missing]
    miss = is_missing[:, idx_missing]
    masked = jnp.where(miss == 1.0, emb, vals_w)       # broadcast (1, n_missing)
    return jnp.concatenate([vals_wo, masked], axis=1)


def resblock(x, p, *, stride):
    # `stride` is a static Python int; downsample presence is structural.
    s1, b1 = p["bn1"]
    s2, b2 = p["bn2"]
    out1 = conv_bn(x, p["w1"], s1, b1, stride=stride, relu=True)
    if "wd" in p:
        sd, bd = p["bnd"]
        res = conv_bn(x, p["wd"], sd, bd, stride=stride, relu=False)
    else:
        res = x
    # relu(bn2(conv2(out1)) + residual) fused into a single Pallas call
    return conv_bn(out1, p["w2"], s2, b2, stride=1, relu=True, residual=res)


def daft_block(x, feats, p):
    cin = x.shape[0]                                              # static
    # --- DAFT rescale (location=0, scale & shift, linear activation) ---
    pooled = global_avgpool(x)                                    # (B, Cin)
    squeeze = jnp.concatenate([pooled, feats], axis=1)            # (B, Cin+ndim)
    # tiny aux MLP: plain JAX (a Pallas launch would cost more than the math)
    h = jax.nn.relu(squeeze @ p["aux_w1"])
    attn = h @ p["aux_w2"]
    v_scale, v_shift = attn[:, :cin], attn[:, cin:]
    # FiLM as a jnp broadcast; XLA fuses it into the im2col of the convs below.
    fm = (x.astype(jnp.float32)
          * jnp.transpose(v_scale)[:, :, None, None, None]
          + jnp.transpose(v_shift)[:, :, None, None, None]).astype(jnp.bfloat16)
    # --- residual block with stride 2 ---
    s1, b1 = p["bn1"]
    s2, b2 = p["bn2"]
    sd, bd = p["bnd"]
    out1 = conv_bn(fm, p["w1"], s1, b1, stride=2, relu=True)
    res = conv_bn(fm, p["wd"], sd, bd, stride=2, relu=False)
    return conv_bn(out1, p["w2"], s2, b2, stride=1, relu=True, residual=res)


def daft_forward(image, tabular, params, idx_missing, idx_without):
    # image is NCDHW (PyTorch) -> channel-major (C, B, D, H, W), bf16 activations
    x = jnp.transpose(image, (1, 0, 2, 3, 4)).astype(jnp.bfloat16)
    feats = build_features(tabular, params["emb"], idx_missing, idx_without)

    s, b = params["conv1_bn"]
    x = conv_bn(x, params["conv1_w"], s, b, stride=1, relu=True)   # ConvBnReLU
    x = maxpool3d(x)                                               # pool1
    x = resblock(x, params["block1"], stride=1)
    x = resblock(x, params["block2"], stride=2)
    x = resblock(x, params["block3"], stride=2)
    x = daft_block(x, feats, params["blockX"])
    pooled = global_avgpool(x)                                     # (B, 8*nb)
    logits = pooled @ params["fc_w"] + params["fc_b"]              # tiny fc: XLA
    terms = jnp.zeros((logits.shape[0], 1, logits.shape[1]), jnp.float32)
    return logits, terms


# --------------------------------------------------------------------------
if __name__ == "__main__":
    B, Cin, S = 2, 1, 16
    in_tabular, n_outputs, nb = 8, 3, 4
    idx_missing = (1, 3, 5)
    idx_without = tuple(sorted(set(range(in_tabular)) - set(idx_missing)))

    key = jax.random.PRNGKey(0)
    k_img, k_tab, k_miss, k_par = jax.random.split(key, 4)
    image = jax.random.normal(k_img, (B, Cin, S, S, S), jnp.float32)
    values = jax.random.normal(k_tab, (B, in_tabular), jnp.float32)
    is_missing = (jax.random.uniform(k_miss, (B, in_tabular)) < 0.3
                  ).astype(jnp.float32)
    tabular = jnp.stack([values, is_missing], axis=1)   # (B, 2, in_tabular)

    params = init_params(k_par, Cin, in_tabular, n_outputs,
                         len(idx_missing), nb)

    fwd = jax.jit(daft_forward)
    logits, terms = fwd(image, tabular, params,
                        jnp.array(idx_missing, jnp.int32),
                        jnp.array(idx_without, jnp.int32))
    jax.block_until_ready((logits, terms))
    assert logits.shape == (B, n_outputs)
    assert terms.shape == (B, 1, n_outputs)
    assert bool(jnp.all(jnp.isfinite(logits.astype(jnp.float32))))
    print("KERNEL_OK")
</pallas_src>

<mosaic_0001>
module attributes {stable_mosaic.version = 11 : i64} {
  func.func @_convmm_kernel(%arg0: i32, %arg1: i32, %arg2: memref<16x32xbf16, #tpu.memory_space<vmem>>, %arg3: memref<32x512xbf16, #tpu.memory_space<vmem>>, %arg4: memref<16x1xf32, #tpu.memory_space<vmem>>, %arg5: memref<16x1xf32, #tpu.memory_space<vmem>>, %arg6: memref<16x512xbf16, #tpu.memory_space<vmem>>, %arg7: memref<16x512xf32, #tpu.memory_space<vmem>>) attributes {dimension_semantics = [#tpu.dimension_semantics<parallel>, #tpu.dimension_semantics<arbitrary>], iteration_bounds = array<i64: 16, 1>, scalar_prefetch = 0 : i64, scratch_operands = 1 : i64, tpu.core_type = #tpu.core_type<tc>, window_params = [{transform_indices = @transform_0, window_bounds = array<i64: 16, 32>}, {transform_indices = @transform_1, window_bounds = array<i64: 32, 512>}, {pipeline_mode = #tpu.pipeline_mode<synchronous>, transform_indices = @transform_2, window_bounds = array<i64: 16, 1>}, {pipeline_mode = #tpu.pipeline_mode<synchronous>, transform_indices = @transform_3, window_bounds = array<i64: 16, 1>}, {transform_indices = @transform_4, window_bounds = array<i64: 16, 512>}]} {
    %c0_i32 = arith.constant 0 : i32
    %0 = arith.cmpi eq, %arg1, %c0_i32 : i32
    %1 = arith.extui %0 : i1 to i32
    %c0_i32_0 = arith.constant 0 : i32
    %2 = arith.cmpi ne, %1, %c0_i32_0 : i32
    scf.if %2 {
      %cst_10 = arith.constant 0.000000e+00 : f32
      %12 = vector.broadcast %cst_10 : f32 to vector<16x512xf32>
      %c0_11 = arith.constant 0 : index
      %c0_12 = arith.constant 0 : index
      %13 = vector.load %arg7[%c0_11, %c0_12] : memref<16x512xf32, #tpu.memory_space<vmem>>, vector<16x512xf32>
      tpu.vector_store %arg7[%c0_11, %c0_12], %12 {strides = array<i32>} : memref<16x512xf32, #tpu.memory_space<vmem>>, vector<16x512xf32>,
    } else {
    }
    %c0 = arith.constant 0 : index
    %c0_1 = arith.constant 0 : index
    %3 = vector.load %arg7[%c0, %c0_1] : memref<16x512xf32, #tpu.memory_space<vmem>>, vector<16x512xf32>
    %c0_2 = arith.constant 0 : index
    %c0_3 = arith.constant 0 : index
    %4 = vector.load %arg2[%c0_2, %c0_3] : memref<16x32xbf16, #tpu.memory_space<vmem>>, vector<16x32xbf16>
    %c0_4 = arith.constant 0 : index
    %c0_5 = arith.constant 0 : index
    %5 = vector.load %arg3[%c0_4, %c0_5] : memref<32x512xbf16, #tpu.memory_space<vmem>>, vector<32x512xbf16>
    %cst = arith.constant dense<0.000000e+00> : vector<16x512xf32>
    %6 = tpu.matmul %4, %5, %cst {dimension_numbers = #tpu.dot_dimension_numbers<[1], [0], [0], [1], [0, 0, 1, 1], [], []>} : vector<16x32xbf16>, vector<32x512xbf16>, vector<16x512xf32> -> vector<16x512xf32>
    %7 = arith.addf %3, %6 : vector<16x512xf32>
    %c0_6 = arith.constant 0 : index
    %c0_7 = arith.constant 0 : index
    %8 = vector.load %arg7[%c0_6, %c0_7] : memref<16x512xf32, #tpu.memory_space<vmem>>, vector<16x512xf32>
    tpu.vector_store %arg7[%c0_6, %c0_7], %7 {strides = array<i32>} : memref<16x512xf32, #tpu.memory_space<vmem>>, vector<16x512xf32>,
    %c0_i32_8 = arith.constant 0 : i32
    %9 = arith.cmpi eq, %arg1, %c0_i32_8 : i32
    %10 = arith.extui %9 : i1 to i32
    %c0_i32_9 = arith.constant 0 : i32
    %11 = arith.cmpi ne, %10, %c0_i32_9 : i32
    scf.if %11 {
      %c0_10 = arith.constant 0 : index
      %c0_11 = arith.constant 0 : index
      %12 = vector.load %arg7[%c0_10, %c0_11] : memref<16x512xf32, #tpu.memory_space<vmem>>, vector<16x512xf32>
      %c0_12 = arith.constant 0 : index
      %c0_13 = arith.constant 0 : index
      %13 = vector.load %arg4[%c0_12, %c0_13] : memref<16x1xf32, #tpu.memory_space<vmem>>, vector<16x1xf32>
      %14 = vector.broadcast %13 : vector<16x1xf32> to vector<16x512xf32>
      %15 = arith.mulf %12, %14 : vector<16x512xf32>
      %c0_14 = arith.constant 0 : index
      %c0_15 = arith.constant 0 : index
      %16 = vector.load %arg5[%c0_14, %c0_15] : memref<16x1xf32, #tpu.memory_space<vmem>>, vector<16x1xf32>
      %17 = vector.broadcast %16 : vector<16x1xf32> to vector<16x512xf32>
      %18 = arith.addf %15, %17 : vector<16x512xf32>
      %cst_16 = arith.constant 0.000000e+00 : f32
      %19 = vector.broadcast %cst_16 : f32 to vector<16x512xf32>
      %20 = arith.maximumf %18, %19 : vector<16x512xf32>
      %21 = arith.truncf %20 : vector<16x512xf32> to vector<16x512xbf16>
      %c0_17 = arith.constant 0 : index
      %c0_18 = arith.constant 0 : index
      %22 = vector.load %arg6[%c0_17, %c0_18] : memref<16x512xbf16, #tpu.memory_space<vmem>>, vector<16x512xbf16>
      tpu.vector_store %arg6[%c0_17, %c0_18], %21 {strides = array<i32>} : memref<16x512xbf16, #tpu.memory_space<vmem>>, vector<16x512xbf16>,
    } else {
    }
    return
  }
  func.func @transform_0(%arg0: i32, %arg1: i32) -> (i32, i32) {
    %c0_i32 = arith.constant 0 : i32
    %c0_i32_0 = arith.constant 0 : i32
    return %c0_i32, %arg1 : i32, i32
  }
  func.func @transform_1(%arg0: i32, %arg1: i32) -> (i32, i32) {
    %c0_i32 = arith.constant 0 : i32
    return %arg1, %arg0 : i32, i32
  }
  func.func @transform_2(%arg0: i32, %arg1: i32) -> (i32, i32) {
    %c0_i32 = arith.constant 0 : i32
    %c0_i32_0 = arith.constant 0 : i32
    %c0_i32_1 = arith.constant 0 : i32
    return %c0_i32, %c0_i32_0 : i32, i32
  }
  func.func @transform_3(%arg0: i32, %arg1: i32) -> (i32, i32) {
    %c0_i32 = arith.constant 0 : i32
    %c0_i32_0 = arith.constant 0 : i32
    %c0_i32_1 = arith.constant 0 : i32
    return %c0_i32, %c0_i32_0 : i32, i32
  }
  func.func @transform_4(%arg0: i32, %arg1: i32) -> (i32, i32) {
    %c0_i32 = arith.constant 0 : i32
    %c0_i32_0 = arith.constant 0 : i32
    return %c0_i32, %arg0 : i32, i32
  }
}

module attributes {stable_mosaic.version = 11 : i64} {
  func.func @_max3_kernel(%arg0: i32, %arg1: memref<64x512xbf16, #tpu.memory_space<vmem>>, %arg2: memref<64x512xbf16, #tpu.memory_space<vmem>>, %arg3: memref<64x512xbf16, #tpu.memory_space<vmem>>, %arg4: memref<64x512xbf16, #tpu.memory_space<vmem>>) attributes {dimension_semantics = [#tpu.dimension_semantics<parallel>], iteration_bounds = array<i64: 1>, scalar_prefetch = 0 : i64, scratch_operands = 0 : i64, tpu.core_type = #tpu.core_type<tc>, window_params = [{transform_indices = @transform_0, window_bounds = array<i64: 64, 512>}, {transform_indices = @transform_1, window_bounds = array<i64: 64, 512>}, {transform_indices = @transform_2, window_bounds = array<i64: 64, 512>}, {transform_indices = @transform_3, window_bounds = array<i64: 64, 512>}]} {
    %c0 = arith.constant 0 : index
    %c0_0 = arith.constant 0 : index
    %0 = vector.load %arg1[%c0, %c0_0] : memref<64x512xbf16, #tpu.memory_space<vmem>>, vector<64x512xbf16>
    %1 = arith.extf %0 : vector<64x512xbf16> to vector<64x512xf32>
    %c0_1 = arith.constant 0 : index
    %c0_2 = arith.constant 0 : index
    %2 = vector.load %arg2[%c0_1, %c0_2] : memref<64x512xbf16, #tpu.memory_space<vmem>>, vector<64x512xbf16>
    %3 = arith.extf %2 : vector<64x512xbf16> to vector<64x512xf32>
    %c0_3 = arith.constant 0 : index
    %c0_4 = arith.constant 0 : index
    %4 = vector.load %arg3[%c0_3, %c0_4] : memref<64x512xbf16, #tpu.memory_space<vmem>>, vector<64x512xbf16>
    %5 = arith.extf %4 : vector<64x512xbf16> to vector<64x512xf32>
    %6 = arith.maximumf %1, %3 : vector<64x512xf32>
    %7 = arith.maximumf %6, %5 : vector<64x512xf32>
    %8 = arith.truncf %7 : vector<64x512xf32> to vector<64x512xbf16>
    %c0_5 = arith.constant 0 : index
    %c0_6 = arith.constant 0 : index
    %9 = vector.load %arg4[%c0_5, %c0_6] : memref<64x512xbf16, #tpu.memory_space<vmem>>, vector<64x512xbf16>
    tpu.vector_store %arg4[%c0_5, %c0_6], %8 {strides = array<i32>} : memref<64x512xbf16, #tpu.memory_space<vmem>>, vector<64x512xbf16>,
    return
  }
  func.func @transform_0(%arg0: i32) -> (i32, i32) {
    %c0_i32 = arith.constant 0 : i32
    %c0_i32_0 = arith.constant 0 : i32
    return %arg0, %c0_i32 : i32, i32
  }
  func.func @transform_1(%arg0: i32) -> (i32, i32) {
    %c0_i32 = arith.constant 0 : i32
    %c0_i32_0 = arith.constant 0 : i32
    return %arg0, %c0_i32 : i32, i32
  }
  func.func @transform_2(%arg0: i32) -> (i32, i32) {
    %c0_i32 = arith.constant 0 : i32
    %c0_i32_0 = arith.constant 0 : i32
    return %arg0, %c0_i32 : i32, i32
  }
  func.func @transform_3(%arg0: i32) -> (i32, i32) {
    %c0_i32 = arith.constant 0 : i32
    %c0_i32_0 = arith.constant 0 : i32
    return %arg0, %c0_i32 : i32, i32
  }
}

module attributes {stable_mosaic.version = 11 : i64} {
  func.func @_convmm_kernel(%arg0: i32, %arg1: i32, %arg2: memref<16x112xbf16, #tpu.memory_space<vmem>>, %arg3: memref<112x512xbf16, #tpu.memory_space<vmem>>, %arg4: memref<16x1xf32, #tpu.memory_space<vmem>>, %arg5: memref<16x1xf32, #tpu.memory_space<vmem>>, %arg6: memref<16x512xbf16, #tpu.memory_space<vmem>>, %arg7: memref<16x512xf32, #tpu.memory_space<vmem>>) attributes {dimension_semantics = [#tpu.dimension_semantics<parallel>, #tpu.dimension_semantics<arbitrary>], iteration_bounds = array<i64: 2, 1>, scalar_prefetch = 0 : i64, scratch_operands = 1 : i64, tpu.core_type = #tpu.core_type<tc>, window_params = [{transform_indices = @transform_0, window_bounds = array<i64: 16, 112>}, {transform_indices = @transform_1, window_bounds = array<i64: 112, 512>}, {pipeline_mode = #tpu.pipeline_mode<synchronous>, transform_indices = @transform_2, window_bounds = array<i64: 16, 1>}, {pipeline_mode = #tpu.pipeline_mode<synchronous>, transform_indices = @transform_3, window_bounds = array<i64: 16, 1>}, {transform_indices = @transform_4, window_bounds = array<i64: 16, 512>}]} {
    %c0_i32 = arith.constant 0 : i32
    %0 = arith.cmpi eq, %arg1, %c0_i32 : i32
    %1 = arith.extui %0 : i1 to i32
    %c0_i32_0 = arith.constant 0 : i32
    %2 = arith.cmpi ne, %1, %c0_i32_0 : i32
    scf.if %2 {
      %cst_10 = arith.constant 0.000000e+00 : f32
      %12 = vector.broadcast %cst_10 : f32 to vector<16x512xf32>
      %c0_11 = arith.constant 0 : index
      %c0_12 = arith.constant 0 : index
      %13 = vector.load %arg7[%c0_11, %c0_12] : memref<16x512xf32, #tpu.memory_space<vmem>>, vector<16x512xf32>
      tpu.vector_store %arg7[%c0_11, %c0_12], %12 {strides = array<i32>} : memref<16x512xf32, #tpu.memory_space<vmem>>, vector<16x512xf32>,
    } else {
    }
    %c0 = arith.constant 0 : index
    %c0_1 = arith.constant 0 : index
    %3 = vector.load %arg7[%c0, %c0_1] : memref<16x512xf32, #tpu.memory_space<vmem>>, vector<16x512xf32>
    %c0_2 = arith.constant 0 : index
    %c0_3 = arith.constant 0 : index
    %4 = vector.load %arg2[%c0_2, %c0_3] : memref<16x112xbf16, #tpu.memory_space<vmem>>, vector<16x112xbf16>
    %c0_4 = arith.constant 0 : index
    %c0_5 = arith.constant 0 : index
    %5 = vector.load %arg3[%c0_4, %c0_5] : memref<112x512xbf16, #tpu.memory_space<vmem>>, vector<112x512xbf16>
    %cst = arith.constant dense<0.000000e+00> : vector<16x512xf32>
    %6 = tpu.matmul %4, %5, %cst {dimension_numbers = #tpu.dot_dimension_numbers<[1], [0], [0], [1], [0, 0, 1, 1], [], []>} : vector<16x112xbf16>, vector<112x512xbf16>, vector<16x512xf32> -> vector<16x512xf32>
    %7 = arith.addf %3, %6 : vector<16x512xf32>
    %c0_6 = arith.constant 0 : index
    %c0_7 = arith.constant 0 : index
    %8 = vector.load %arg7[%c0_6, %c0_7] : memref<16x512xf32, #tpu.memory_space<vmem>>, vector<16x512xf32>
    tpu.vector_store %arg7[%c0_6, %c0_7], %7 {strides = array<i32>} : memref<16x512xf32, #tpu.memory_space<vmem>>, vector<16x512xf32>,
    %c0_i32_8 = arith.constant 0 : i32
    %9 = arith.cmpi eq, %arg1, %c0_i32_8 : i32
    %10 = arith.extui %9 : i1 to i32
    %c0_i32_9 = arith.constant 0 : i32
    %11 = arith.cmpi ne, %10, %c0_i32_9 : i32
    scf.if %11 {
      %c0_10 = arith.constant 0 : index
      %c0_11 = arith.constant 0 : index
      %12 = vector.load %arg7[%c0_10, %c0_11] : memref<16x512xf32, #tpu.memory_space<vmem>>, vector<16x512xf32>
      %c0_12 = arith.constant 0 : index
      %c0_13 = arith.constant 0 : index
      %13 = vector.load %arg4[%c0_12, %c0_13] : memref<16x1xf32, #tpu.memory_space<vmem>>, vector<16x1xf32>
      %14 = vector.broadcast %13 : vector<16x1xf32> to vector<16x512xf32>
      %15 = arith.mulf %12, %14 : vector<16x512xf32>
      %c0_14 = arith.constant 0 : index
      %c0_15 = arith.constant 0 : index
      %16 = vector.load %arg5[%c0_14, %c0_15] : memref<16x1xf32, #tpu.memory_space<vmem>>, vector<16x1xf32>
      %17 = vector.broadcast %16 : vector<16x1xf32> to vector<16x512xf32>
      %18 = arith.addf %15, %17 : vector<16x512xf32>
      %cst_16 = arith.constant 0.000000e+00 : f32
      %19 = vector.broadcast %cst_16 : f32 to vector<16x512xf32>
      %20 = arith.maximumf %18, %19 : vector<16x512xf32>
      %21 = arith.truncf %20 : vector<16x512xf32> to vector<16x512xbf16>
      %c0_17 = arith.constant 0 : index
      %c0_18 = arith.constant 0 : index
      %22 = vector.load %arg6[%c0_17, %c0_18] : memref<16x512xbf16, #tpu.memory_space<vmem>>, vector<16x512xbf16>
      tpu.vector_store %arg6[%c0_17, %c0_18], %21 {strides = array<i32>} : memref<16x512xbf16, #tpu.memory_space<vmem>>, vector<16x512xbf16>,
    } else {
    }
    return
  }
  func.func @transform_0(%arg0: i32, %arg1: i32) -> (i32, i32) {
    %c0_i32 = arith.constant 0 : i32
    %c0_i32_0 = arith.constant 0 : i32
    return %c0_i32, %arg1 : i32, i32
  }
  func.func @transform_1(%arg0: i32, %arg1: i32) -> (i32, i32) {
    %c0_i32 = arith.constant 0 : i32
    return %arg1, %arg0 : i32, i32
  }
  func.func @transform_2(%arg0: i32, %arg1: i32) -> (i32, i32) {
    %c0_i32 = arith.constant 0 : i32
    %c0_i32_0 = arith.constant 0 : i32
    %c0_i32_1 = arith.constant 0 : i32
    return %c0_i32, %c0_i32_0 : i32, i32
  }
  func.func @transform_3(%arg0: i32, %arg1: i32) -> (i32, i32) {
    %c0_i32 = arith.constant 0 : i32
    %c0_i32_0 = arith.constant 0 : i32
    %c0_i32_1 = arith.constant 0 : i32
    return %c0_i32, %c0_i32_0 : i32, i32
  }
  func.func @transform_4(%arg0: i32, %arg1: i32) -> (i32, i32) {
    %c0_i32 = arith.constant 0 : i32
    %c0_i32_0 = arith.constant 0 : i32
    return %c0_i32, %arg0 : i32, i32
  }
}

module attributes {stable_mosaic.version = 11 : i64} {
  func.func @_convmm_res_kernel(%arg0: i32, %arg1: i32, %arg2: memref<16x112xbf16, #tpu.memory_space<vmem>>, %arg3: memref<112x512xbf16, #tpu.memory_space<vmem>>, %arg4: memref<16x1xf32, #tpu.memory_space<vmem>>, %arg5: memref<16x1xf32, #tpu.memory_space<vmem>>, %arg6: memref<16x512xbf16, #tpu.memory_space<vmem>>, %arg7: memref<16x512xbf16, #tpu.memory_space<vmem>>, %arg8: memref<16x512xf32, #tpu.memory_space<vmem>>) attributes {dimension_semantics = [#tpu.dimension_semantics<parallel>, #tpu.dimension_semantics<arbitrary>], iteration_bounds = array<i64: 2, 1>, scalar_prefetch = 0 : i64, scratch_operands = 1 : i64, tpu.core_type = #tpu.core_type<tc>, window_params = [{transform_indices = @transform_0, window_bounds = array<i64: 16, 112>}, {transform_indices = @transform_1, window_bounds = array<i64: 112, 512>}, {pipeline_mode = #tpu.pipeline_mode<synchronous>, transform_indices = @transform_2, window_bounds = array<i64: 16, 1>}, {pipeline_mode = #tpu.pipeline_mode<synchronous>, transform_indices = @transform_3, window_bounds = array<i64: 16, 1>}, {transform_indices = @transform_4, window_bounds = array<i64: 16, 512>}, {transform_indices = @transform_5, window_bounds = array<i64: 16, 512>}]} {
    %c0_i32 = arith.constant 0 : i32
    %0 = arith.cmpi eq, %arg1, %c0_i32 : i32
    %1 = arith.extui %0 : i1 to i32
    %c0_i32_0 = arith.constant 0 : i32
    %2 = arith.cmpi ne, %1, %c0_i32_0 : i32
    scf.if %2 {
      %cst_10 = arith.constant 0.000000e+00 : f32
      %12 = vector.broadcast %cst_10 : f32 to vector<16x512xf32>
      %c0_11 = arith.constant 0 : index
      %c0_12 = arith.constant 0 : index
      %13 = vector.load %arg8[%c0_11, %c0_12] : memref<16x512xf32, #tpu.memory_space<vmem>>, vector<16x512xf32>
      tpu.vector_store %arg8[%c0_11, %c0_12], %12 {strides = array<i32>} : memref<16x512xf32, #tpu.memory_space<vmem>>, vector<16x512xf32>,
    } else {
    }
    %c0 = arith.constant 0 : index
    %c0_1 = arith.constant 0 : index
    %3 = vector.load %arg8[%c0, %c0_1] : memref<16x512xf32, #tpu.memory_space<vmem>>, vector<16x512xf32>
    %c0_2 = arith.constant 0 : index
    %c0_3 = arith.constant 0 : index
    %4 = vector.load %arg2[%c0_2, %c0_3] : memref<16x112xbf16, #tpu.memory_space<vmem>>, vector<16x112xbf16>
    %c0_4 = arith.constant 0 : index
    %c0_5 = arith.constant 0 : index
    %5 = vector.load %arg3[%c0_4, %c0_5] : memref<112x512xbf16, #tpu.memory_space<vmem>>, vector<112x512xbf16>
    %cst = arith.constant dense<0.000000e+00> : vector<16x512xf32>
    %6 = tpu.matmul %4, %5, %cst {dimension_numbers = #tpu.dot_dimension_numbers<[1], [0], [0], [1], [0, 0, 1, 1], [], []>} : vector<16x112xbf16>, vector<112x512xbf16>, vector<16x512xf32> -> vector<16x512xf32>
    %7 = arith.addf %3, %6 : vector<16x512xf32>
    %c0_6 = arith.constant 0 : index
    %c0_7 = arith.constant 0 : index
    %8 = vector.load %arg8[%c0_6, %c0_7] : memref<16x512xf32, #tpu.memory_space<vmem>>, vector<16x512xf32>
    tpu.vector_store %arg8[%c0_6, %c0_7], %7 {strides = array<i32>} : memref<16x512xf32, #tpu.memory_space<vmem>>, vector<16x512xf32>,
    %c0_i32_8 = arith.constant 0 : i32
    %9 = arith.cmpi eq, %arg1, %c0_i32_8 : i32
    %10 = arith.extui %9 : i1 to i32
    %c0_i32_9 = arith.constant 0 : i32
    %11 = arith.cmpi ne, %10, %c0_i32_9 : i32
    scf.if %11 {
      %c0_10 = arith.constant 0 : index
      %c0_11 = arith.constant 0 : index
      %12 = vector.load %arg8[%c0_10, %c0_11] : memref<16x512xf32, #tpu.memory_space<vmem>>, vector<16x512xf32>
      %c0_12 = arith.constant 0 : index
      %c0_13 = arith.constant 0 : index
      %13 = vector.load %arg4[%c0_12, %c0_13] : memref<16x1xf32, #tpu.memory_space<vmem>>, vector<16x1xf32>
      %14 = vector.broadcast %13 : vector<16x1xf32> to vector<16x512xf32>
      %15 = arith.mulf %12, %14 : vector<16x512xf32>
      %c0_14 = arith.constant 0 : index
      %c0_15 = arith.constant 0 : index
      %16 = vector.load %arg5[%c0_14, %c0_15] : memref<16x1xf32, #tpu.memory_space<vmem>>, vector<16x1xf32>
      %17 = vector.broadcast %16 : vector<16x1xf32> to vector<16x512xf32>
      %18 = arith.addf %15, %17 : vector<16x512xf32>
      %c0_16 = arith.constant 0 : index
      %c0_17 = arith.constant 0 : index
      %19 = vector.load %arg6[%c0_16, %c0_17] : memref<16x512xbf16, #tpu.memory_space<vmem>>, vector<16x512xbf16>
      %20 = arith.extf %19 : vector<16x512xbf16> to vector<16x512xf32>
      %21 = arith.addf %18, %20 : vector<16x512xf32>
      %cst_18 = arith.constant 0.000000e+00 : f32
      %22 = vector.broadcast %cst_18 : f32 to vector<16x512xf32>
      %23 = arith.maximumf %21, %22 : vector<16x512xf32>
      %24 = arith.truncf %23 : vector<16x512xf32> to vector<16x512xbf16>
      %c0_19 = arith.constant 0 : index
      %c0_20 = arith.constant 0 : index
      %25 = vector.load %arg7[%c0_19, %c0_20] : memref<16x512xbf16, #tpu.memory_space<vmem>>, vector<16x512xbf16>
      tpu.vector_store %arg7[%c0_19, %c0_20], %24 {strides = array<i32>} : memref<16x512xbf16, #tpu.memory_space<vmem>>, vector<16x512xbf16>,
    } else {
    }
    return
  }
  func.func @transform_0(%arg0: i32, %arg1: i32) -> (i32, i32) {
    %c0_i32 = arith.constant 0 : i32
    %c0_i32_0 = arith.constant 0 : i32
    return %c0_i32, %arg1 : i32, i32
  }
  func.func @transform_1(%arg0: i32, %arg1: i32) -> (i32, i32) {
    %c0_i32 = arith.constant 0 : i32
    return %arg1, %arg0 : i32, i32
  }
  func.func @transform_2(%arg0: i32, %arg1: i32) -> (i32, i32) {
    %c0_i32 = arith.constant 0 : i32
    %c0_i32_0 = arith.constant 0 : i32
    %c0_i32_1 = arith.constant 0 : i32
    return %c0_i32, %c0_i32_0 : i32, i32
  }
  func.func @transform_3(%arg0: i32, %arg1: i32) -> (i32, i32) {
    %c0_i32 = arith.constant 0 : i32
    %c0_i32_0 = arith.constant 0 : i32
    %c0_i32_1 = arith.constant 0 : i32
    return %c0_i32, %c0_i32_0 : i32, i32
  }
  func.func @transform_4(%arg0: i32, %arg1: i32) -> (i32, i32) {
    %c0_i32 = arith.constant 0 : i32
    %c0_i32_0 = arith.constant 0 : i32
    return %c0_i32, %arg0 : i32, i32
  }
  func.func @transform_5(%arg0: i32, %arg1: i32) -> (i32, i32) {
    %c0_i32 = arith.constant 0 : i32
    %c0_i32_0 = arith.constant 0 : i32
    return %c0_i32, %arg0 : i32, i32
  }
}

module attributes {stable_mosaic.version = 11 : i64} {
  func.func @_convmm_kernel(%arg0: i32, %arg1: i32, %arg2: memref<16x112xbf16, #tpu.memory_space<vmem>>, %arg3: memref<112x128xbf16, #tpu.memory_space<vmem>>, %arg4: memref<16x1xf32, #tpu.memory_space<vmem>>, %arg5: memref<16x1xf32, #tpu.memory_space<vmem>>, %arg6: memref<16x128xbf16, #tpu.memory_space<vmem>>, %arg7: memref<16x128xf32, #tpu.memory_space<vmem>>) attributes {dimension_semantics = [#tpu.dimension_semantics<parallel>, #tpu.dimension_semantics<arbitrary>], iteration_bounds = array<i64: 1, 1>, scalar_prefetch = 0 : i64, scratch_operands = 1 : i64, tpu.core_type = #tpu.core_type<tc>, window_params = [{transform_indices = @transform_0, window_bounds = array<i64: 16, 112>}, {transform_indices = @transform_1, window_bounds = array<i64: 112, 128>}, {pipeline_mode = #tpu.pipeline_mode<synchronous>, transform_indices = @transform_2, window_bounds = array<i64: 16, 1>}, {pipeline_mode = #tpu.pipeline_mode<synchronous>, transform_indices = @transform_3, window_bounds = array<i64: 16, 1>}, {transform_indices = @transform_4, window_bounds = array<i64: 16, 128>}]} {
    %c0_i32 = arith.constant 0 : i32
    %0 = arith.cmpi eq, %arg1, %c0_i32 : i32
    %1 = arith.extui %0 : i1 to i32
    %c0_i32_0 = arith.constant 0 : i32
    %2 = arith.cmpi ne, %1, %c0_i32_0 : i32
    scf.if %2 {
      %cst_10 = arith.constant 0.000000e+00 : f32
      %12 = vector.broadcast %cst_10 : f32 to vector<16x128xf32>
      %c0_11 = arith.constant 0 : index
      %c0_12 = arith.constant 0 : index
      %13 = vector.load %arg7[%c0_11, %c0_12] : memref<16x128xf32, #tpu.memory_space<vmem>>, vector<16x128xf32>
      tpu.vector_store %arg7[%c0_11, %c0_12], %12 {strides = array<i32>} : memref<16x128xf32, #tpu.memory_space<vmem>>, vector<16x128xf32>,
    } else {
    }
    %c0 = arith.constant 0 : index
    %c0_1 = arith.constant 0 : index
    %3 = vector.load %arg7[%c0, %c0_1] : memref<16x128xf32, #tpu.memory_space<vmem>>, vector<16x128xf32>
    %c0_2 = arith.constant 0 : index
    %c0_3 = arith.constant 0 : index
    %4 = vector.load %arg2[%c0_2, %c0_3] : memref<16x112xbf16, #tpu.memory_space<vmem>>, vector<16x112xbf16>
    %c0_4 = arith.constant 0 : index
    %c0_5 = arith.constant 0 : index
    %5 = vector.load %arg3[%c0_4, %c0_5] : memref<112x128xbf16, #tpu.memory_space<vmem>>, vector<112x128xbf16>
    %cst = arith.constant dense<0.000000e+00> : vector<16x128xf32>
    %6 = tpu.matmul %4, %5, %cst {dimension_numbers = #tpu.dot_dimension_numbers<[1], [0], [0], [1], [0, 0, 1, 1], [], []>} : vector<16x112xbf16>, vector<112x128xbf16>, vector<16x128xf32> -> vector<16x128xf32>
    %7 = arith.addf %3, %6 : vector<16x128xf32>
    %c0_6 = arith.constant 0 : index
    %c0_7 = arith.constant 0 : index
    %8 = vector.load %arg7[%c0_6, %c0_7] : memref<16x128xf32, #tpu.memory_space<vmem>>, vector<16x128xf32>
    tpu.vector_store %arg7[%c0_6, %c0_7], %7 {strides = array<i32>} : memref<16x128xf32, #tpu.memory_space<vmem>>, vector<16x128xf32>,
    %c0_i32_8 = arith.constant 0 : i32
    %9 = arith.cmpi eq, %arg1, %c0_i32_8 : i32
    %10 = arith.extui %9 : i1 to i32
    %c0_i32_9 = arith.constant 0 : i32
    %11 = arith.cmpi ne, %10, %c0_i32_9 : i32
    scf.if %11 {
      %c0_10 = arith.constant 0 : index
      %c0_11 = arith.constant 0 : index
      %12 = vector.load %arg7[%c0_10, %c0_11] : memref<16x128xf32, #tpu.memory_space<vmem>>, vector<16x128xf32>
      %c0_12 = arith.constant 0 : index
      %c0_13 = arith.constant 0 : index
      %13 = vector.load %arg4[%c0_12, %c0_13] : memref<16x1xf32, #tpu.memory_space<vmem>>, vector<16x1xf32>
      %14 = vector.broadcast %13 : vector<16x1xf32> to vector<16x128xf32>
      %15 = arith.mulf %12, %14 : vector<16x128xf32>
      %c0_14 = arith.constant 0 : index
      %c0_15 = arith.constant 0 : index
      %16 = vector.load %arg5[%c0_14, %c0_15] : memref<16x1xf32, #tpu.memory_space<vmem>>, vector<16x1xf32>
      %17 = vector.broadcast %16 : vector<16x1xf32> to vector<16x128xf32>
      %18 = arith.addf %15, %17 : vector<16x128xf32>
      %cst_16 = arith.constant 0.000000e+00 : f32
      %19 = vector.broadcast %cst_16 : f32 to vector<16x128xf32>
      %20 = arith.maximumf %18, %19 : vector<16x128xf32>
      %21 = arith.truncf %20 : vector<16x128xf32> to vector<16x128xbf16>
      %c0_17 = arith.constant 0 : index
      %c0_18 = arith.constant 0 : index
      %22 = vector.load %arg6[%c0_17, %c0_18] : memref<16x128xbf16, #tpu.memory_space<vmem>>, vector<16x128xbf16>
      tpu.vector_store %arg6[%c0_17, %c0_18], %21 {strides = array<i32>} : memref<16x128xbf16, #tpu.memory_space<vmem>>, vector<16x128xbf16>,
    } else {
    }
    return
  }
  func.func @transform_0(%arg0: i32, %arg1: i32) -> (i32, i32) {
    %c0_i32 = arith.constant 0 : i32
    %c0_i32_0 = arith.constant 0 : i32
    return %c0_i32, %arg1 : i32, i32
  }
  func.func @transform_1(%arg0: i32, %arg1: i32) -> (i32, i32) {
    %c0_i32 = arith.constant 0 : i32
    return %arg1, %arg0 : i32, i32
  }
  func.func @transform_2(%arg0: i32, %arg1: i32) -> (i32, i32) {
    %c0_i32 = arith.constant 0 : i32
    %c0_i32_0 = arith.constant 0 : i32
    %c0_i32_1 = arith.constant 0 : i32
    return %c0_i32, %c0_i32_0 : i32, i32
  }
  func.func @transform_3(%arg0: i32, %arg1: i32) -> (i32, i32) {
    %c0_i32 = arith.constant 0 : i32
    %c0_i32_0 = arith.constant 0 : i32
    %c0_i32_1 = arith.constant 0 : i32
    return %c0_i32, %c0_i32_0 : i32, i32
  }
  func.func @transform_4(%arg0: i32, %arg1: i32) -> (i32, i32) {
    %c0_i32 = arith.constant 0 : i32
    %c0_i32_0 = arith.constant 0 : i32
    return %c0_i32, %arg0 : i32, i32
  }
}

module attributes {stable_mosaic.version = 11 : i64} {
  func.func @_convmm_kernel(%arg0: i32, %arg1: i32, %arg2: memref<16x16xbf16, #tpu.memory_space<vmem>>, %arg3: memref<16x128xbf16, #tpu.memory_space<vmem>>, %arg4: memref<16x1xf32, #tpu.memory_space<vmem>>, %arg5: memref<16x1xf32, #tpu.memory_space<vmem>>, %arg6: memref<16x128xbf16, #tpu.memory_space<vmem>>, %arg7: memref<16x128xf32, #tpu.memory_space<vmem>>) attributes {dimension_semantics = [#tpu.dimension_semantics<parallel>, #tpu.dimension_semantics<arbitrary>], iteration_bounds = array<i64: 1, 1>, scalar_prefetch = 0 : i64, scratch_operands = 1 : i64, tpu.core_type = #tpu.core_type<tc>, window_params = [{transform_indices = @transform_0, window_bounds = array<i64: 16, 16>}, {transform_indices = @transform_1, window_bounds = array<i64: 16, 128>}, {pipeline_mode = #tpu.pipeline_mode<synchronous>, transform_indices = @transform_2, window_bounds = array<i64: 16, 1>}, {pipeline_mode = #tpu.pipeline_mode<synchronous>, transform_indices = @transform_3, window_bounds = array<i64: 16, 1>}, {transform_indices = @transform_4, window_bounds = array<i64: 16, 128>}]} {
    %c0_i32 = arith.constant 0 : i32
    %0 = arith.cmpi eq, %arg1, %c0_i32 : i32
    %1 = arith.extui %0 : i1 to i32
    %c0_i32_0 = arith.constant 0 : i32
    %2 = arith.cmpi ne, %1, %c0_i32_0 : i32
    scf.if %2 {
      %cst_10 = arith.constant 0.000000e+00 : f32
      %12 = vector.broadcast %cst_10 : f32 to vector<16x128xf32>
      %c0_11 = arith.constant 0 : index
      %c0_12 = arith.constant 0 : index
      %13 = vector.load %arg7[%c0_11, %c0_12] : memref<16x128xf32, #tpu.memory_space<vmem>>, vector<16x128xf32>
      tpu.vector_store %arg7[%c0_11, %c0_12], %12 {strides = array<i32>} : memref<16x128xf32, #tpu.memory_space<vmem>>, vector<16x128xf32>,
    } else {
    }
    %c0 = arith.constant 0 : index
    %c0_1 = arith.constant 0 : index
    %3 = vector.load %arg7[%c0, %c0_1] : memref<16x128xf32, #tpu.memory_space<vmem>>, vector<16x128xf32>
    %c0_2 = arith.constant 0 : index
    %c0_3 = arith.constant 0 : index
    %4 = vector.load %arg2[%c0_2, %c0_3] : memref<16x16xbf16, #tpu.memory_space<vmem>>, vector<16x16xbf16>
    %c0_4 = arith.constant 0 : index
    %c0_5 = arith.constant 0 : index
    %5 = vector.load %arg3[%c0_4, %c0_5] : memref<16x128xbf16, #tpu.memory_space<vmem>>, vector<16x128xbf16>
    %cst = arith.constant dense<0.000000e+00> : vector<16x128xf32>
    %6 = tpu.matmul %4, %5, %cst {dimension_numbers = #tpu.dot_dimension_numbers<[1], [0], [0], [1], [0, 0, 1, 1], [], []>} : vector<16x16xbf16>, vector<16x128xbf16>, vector<16x128xf32> -> vector<16x128xf32>
    %7 = arith.addf %3, %6 : vector<16x128xf32>
    %c0_6 = arith.constant 0 : index
    %c0_7 = arith.constant 0 : index
    %8 = vector.load %arg7[%c0_6, %c0_7] : memref<16x128xf32, #tpu.memory_space<vmem>>, vector<16x128xf32>
    tpu.vector_store %arg7[%c0_6, %c0_7], %7 {strides = array<i32>} : memref<16x128xf32, #tpu.memory_space<vmem>>, vector<16x128xf32>,
    %c0_i32_8 = arith.constant 0 : i32
    %9 = arith.cmpi eq, %arg1, %c0_i32_8 : i32
    %10 = arith.extui %9 : i1 to i32
    %c0_i32_9 = arith.constant 0 : i32
    %11 = arith.cmpi ne, %10, %c0_i32_9 : i32
    scf.if %11 {
      %c0_10 = arith.constant 0 : index
      %c0_11 = arith.constant 0 : index
      %12 = vector.load %arg7[%c0_10, %c0_11] : memref<16x128xf32, #tpu.memory_space<vmem>>, vector<16x128xf32>
      %c0_12 = arith.constant 0 : index
      %c0_13 = arith.constant 0 : index
      %13 = vector.load %arg4[%c0_12, %c0_13] : memref<16x1xf32, #tpu.memory_space<vmem>>, vector<16x1xf32>
      %14 = vector.broadcast %13 : vector<16x1xf32> to vector<16x128xf32>
      %15 = arith.mulf %12, %14 : vector<16x128xf32>
      %c0_14 = arith.constant 0 : index
      %c0_15 = arith.constant 0 : index
      %16 = vector.load %arg5[%c0_14, %c0_15] : memref<16x1xf32, #tpu.memory_space<vmem>>, vector<16x1xf32>
      %17 = vector.broadcast %16 : vector<16x1xf32> to vector<16x128xf32>
      %18 = arith.addf %15, %17 : vector<16x128xf32>
      %19 = arith.truncf %18 : vector<16x128xf32> to vector<16x128xbf16>
      %c0_16 = arith.constant 0 : index
      %c0_17 = arith.constant 0 : index
      %20 = vector.load %arg6[%c0_16, %c0_17] : memref<16x128xbf16, #tpu.memory_space<vmem>>, vector<16x128xbf16>
      tpu.vector_store %arg6[%c0_16, %c0_17], %19 {strides = array<i32>} : memref<16x128xbf16, #tpu.memory_space<vmem>>, vector<16x128xbf16>,
    } else {
    }
    return
  }
  func.func @transform_0(%arg0: i32, %arg1: i32) -> (i32, i32) {
    %c0_i32 = arith.constant 0 : i32
    %c0_i32_0 = arith.constant 0 : i32
    return %c0_i32, %arg1 : i32, i32
  }
  func.func @transform_1(%arg0: i32, %arg1: i32) -> (i32, i32) {
    %c0_i32 = arith.constant 0 : i32
    return %arg1, %arg0 : i32, i32
  }
  func.func @transform_2(%arg0: i32, %arg1: i32) -> (i32, i32) {
    %c0_i32 = arith.constant 0 : i32
    %c0_i32_0 = arith.constant 0 : i32
    %c0_i32_1 = arith.constant 0 : i32
    return %c0_i32, %c0_i32_0 : i32, i32
  }
  func.func @transform_3(%arg0: i32, %arg1: i32) -> (i32, i32) {
    %c0_i32 = arith.constant 0 : i32
    %c0_i32_0 = arith.constant 0 : i32
    %c0_i32_1 = arith.constant 0 : i32
    return %c0_i32, %c0_i32_0 : i32, i32
  }
  func.func @transform_4(%arg0: i32, %arg1: i32) -> (i32, i32) {
    %c0_i32 = arith.constant 0 : i32
    %c0_i32_0 = arith.constant 0 : i32
    return %c0_i32, %arg0 : i32, i32
  }
}

module attributes {stable_mosaic.version = 11 : i64} {
  func.func @_convmm_res_kernel(%arg0: i32, %arg1: i32, %arg2: memref<16x224xbf16, #tpu.memory_space<vmem>>, %arg3: memref<224x128xbf16, #tpu.memory_space<vmem>>, %arg4: memref<16x1xf32, #tpu.memory_space<vmem>>, %arg5: memref<16x1xf32, #tpu.memory_space<vmem>>, %arg6: memref<16x128xbf16, #tpu.memory_space<vmem>>, %arg7: memref<16x128xbf16, #tpu.memory_space<vmem>>, %arg8: memref<16x128xf32, #tpu.memory_space<vmem>>) attributes {dimension_semantics = [#tpu.dimension_semantics<parallel>, #tpu.dimension_semantics<arbitrary>], iteration_bounds = array<i64: 1, 1>, scalar_prefetch = 0 : i64, scratch_operands = 1 : i64, tpu.core_type = #tpu.core_type<tc>, window_params = [{transform_indices = @transform_0, window_bounds = array<i64: 16, 224>}, {transform_indices = @transform_1, window_bounds = array<i64: 224, 128>}, {pipeline_mode = #tpu.pipeline_mode<synchronous>, transform_indices = @transform_2, window_bounds = array<i64: 16, 1>}, {pipeline_mode = #tpu.pipeline_mode<synchronous>, transform_indices = @transform_3, window_bounds = array<i64: 16, 1>}, {transform_indices = @transform_4, window_bounds = array<i64: 16, 128>}, {transform_indices = @transform_5, window_bounds = array<i64: 16, 128>}]} {
    %c0_i32 = arith.constant 0 : i32
    %0 = arith.cmpi eq, %arg1, %c0_i32 : i32
    %1 = arith.extui %0 : i1 to i32
    %c0_i32_0 = arith.constant 0 : i32
    %2 = arith.cmpi ne, %1, %c0_i32_0 : i32
    scf.if %2 {
      %cst_10 = arith.constant 0.000000e+00 : f32
      %12 = vector.broadcast %cst_10 : f32 to vector<16x128xf32>
      %c0_11 = arith.constant 0 : index
      %c0_12 = arith.constant 0 : index
      %13 = vector.load %arg8[%c0_11, %c0_12] : memref<16x128xf32, #tpu.memory_space<vmem>>, vector<16x128xf32>
      tpu.vector_store %arg8[%c0_11, %c0_12], %12 {strides = array<i32>} : memref<16x128xf32, #tpu.memory_space<vmem>>, vector<16x128xf32>,
    } else {
    }
    %c0 = arith.constant 0 : index
    %c0_1 = arith.constant 0 : index
    %3 = vector.load %arg8[%c0, %c0_1] : memref<16x128xf32, #tpu.memory_space<vmem>>, vector<16x128xf32>
    %c0_2 = arith.constant 0 : index
    %c0_3 = arith.constant 0 : index
    %4 = vector.load %arg2[%c0_2, %c0_3] : memref<16x224xbf16, #tpu.memory_space<vmem>>, vector<16x224xbf16>
    %c0_4 = arith.constant 0 : index
    %c0_5 = arith.constant 0 : index
    %5 = vector.load %arg3[%c0_4, %c0_5] : memref<224x128xbf16, #tpu.memory_space<vmem>>, vector<224x128xbf16>
    %cst = arith.constant dense<0.000000e+00> : vector<16x128xf32>
    %6 = tpu.matmul %4, %5, %cst {dimension_numbers = #tpu.dot_dimension_numbers<[1], [0], [0], [1], [0, 0, 1, 1], [], []>} : vector<16x224xbf16>, vector<224x128xbf16>, vector<16x128xf32> -> vector<16x128xf32>
    %7 = arith.addf %3, %6 : vector<16x128xf32>
    %c0_6 = arith.constant 0 : index
    %c0_7 = arith.constant 0 : index
    %8 = vector.load %arg8[%c0_6, %c0_7] : memref<16x128xf32, #tpu.memory_space<vmem>>, vector<16x128xf32>
    tpu.vector_store %arg8[%c0_6, %c0_7], %7 {strides = array<i32>} : memref<16x128xf32, #tpu.memory_space<vmem>>, vector<16x128xf32>,
    %c0_i32_8 = arith.constant 0 : i32
    %9 = arith.cmpi eq, %arg1, %c0_i32_8 : i32
    %10 = arith.extui %9 : i1 to i32
    %c0_i32_9 = arith.constant 0 : i32
    %11 = arith.cmpi ne, %10, %c0_i32_9 : i32
    scf.if %11 {
      %c0_10 = arith.constant 0 : index
      %c0_11 = arith.constant 0 : index
      %12 = vector.load %arg8[%c0_10, %c0_11] : memref<16x128xf32, #tpu.memory_space<vmem>>, vector<16x128xf32>
      %c0_12 = arith.constant 0 : index
      %c0_13 = arith.constant 0 : index
      %13 = vector.load %arg4[%c0_12, %c0_13] : memref<16x1xf32, #tpu.memory_space<vmem>>, vector<16x1xf32>
      %14 = vector.broadcast %13 : vector<16x1xf32> to vector<16x128xf32>
      %15 = arith.mulf %12, %14 : vector<16x128xf32>
      %c0_14 = arith.constant 0 : index
      %c0_15 = arith.constant 0 : index
      %16 = vector.load %arg5[%c0_14, %c0_15] : memref<16x1xf32, #tpu.memory_space<vmem>>, vector<16x1xf32>
      %17 = vector.broadcast %16 : vector<16x1xf32> to vector<16x128xf32>
      %18 = arith.addf %15, %17 : vector<16x128xf32>
      %c0_16 = arith.constant 0 : index
      %c0_17 = arith.constant 0 : index
      %19 = vector.load %arg6[%c0_16, %c0_17] : memref<16x128xbf16, #tpu.memory_space<vmem>>, vector<16x128xbf16>
      %20 = arith.extf %19 : vector<16x128xbf16> to vector<16x128xf32>
      %21 = arith.addf %18, %20 : vector<16x128xf32>
      %cst_18 = arith.constant 0.000000e+00 : f32
      %22 = vector.broadcast %cst_18 : f32 to vector<16x128xf32>
      %23 = arith.maximumf %21, %22 : vector<16x128xf32>
      %24 = arith.truncf %23 : vector<16x128xf32> to vector<16x128xbf16>
      %c0_19 = arith.constant 0 : index
      %c0_20 = arith.constant 0 : index
      %25 = vector.load %arg7[%c0_19, %c0_20] : memref<16x128xbf16, #tpu.memory_space<vmem>>, vector<16x128xbf16>
      tpu.vector_store %arg7[%c0_19, %c0_20], %24 {strides = array<i32>} : memref<16x128xbf16, #tpu.memory_space<vmem>>, vector<16x128xbf16>,
    } else {
    }
    return
  }
  func.func @transform_0(%arg0: i32, %arg1: i32) -> (i32, i32) {
    %c0_i32 = arith.constant 0 : i32
    %c0_i32_0 = arith.constant 0 : i32
    return %c0_i32, %arg1 : i32, i32
  }
  func.func @transform_1(%arg0: i32, %arg1: i32) -> (i32, i32) {
    %c0_i32 = arith.constant 0 : i32
    return %arg1, %arg0 : i32, i32
  }
  func.func @transform_2(%arg0: i32, %arg1: i32) -> (i32, i32) {
    %c0_i32 = arith.constant 0 : i32
    %c0_i32_0 = arith.constant 0 : i32
    %c0_i32_1 = arith.constant 0 : i32
    return %c0_i32, %c0_i32_0 : i32, i32
  }
  func.func @transform_3(%arg0: i32, %arg1: i32) -> (i32, i32) {
    %c0_i32 = arith.constant 0 : i32
    %c0_i32_0 = arith.constant 0 : i32
    %c0_i32_1 = arith.constant 0 : i32
    return %c0_i32, %c0_i32_0 : i32, i32
  }
  func.func @transform_4(%arg0: i32, %arg1: i32) -> (i32, i32) {
    %c0_i32 = arith.constant 0 : i32
    %c0_i32_0 = arith.constant 0 : i32
    return %c0_i32, %arg0 : i32, i32
  }
  func.func @transform_5(%arg0: i32, %arg1: i32) -> (i32, i32) {
    %c0_i32 = arith.constant 0 : i32
    %c0_i32_0 = arith.constant 0 : i32
    return %c0_i32, %arg0 : i32, i32
  }
}

module attributes {stable_mosaic.version = 11 : i64} {
  func.func @_convmm_kernel(%arg0: i32, %arg1: i32, %arg2: memref<16x224xbf16, #tpu.memory_space<vmem>>, %arg3: memref<224x128xbf16, #tpu.memory_space<vmem>>, %arg4: memref<16x1xf32, #tpu.memory_space<vmem>>, %arg5: memref<16x1xf32, #tpu.memory_space<vmem>>, %arg6: memref<16x128xbf16, #tpu.memory_space<vmem>>, %arg7: memref<16x128xf32, #tpu.memory_space<vmem>>) attributes {dimension_semantics = [#tpu.dimension_semantics<parallel>, #tpu.dimension_semantics<arbitrary>], iteration_bounds = array<i64: 1, 1>, scalar_prefetch = 0 : i64, scratch_operands = 1 : i64, tpu.core_type = #tpu.core_type<tc>, window_params = [{transform_indices = @transform_0, window_bounds = array<i64: 16, 224>}, {transform_indices = @transform_1, window_bounds = array<i64: 224, 128>}, {pipeline_mode = #tpu.pipeline_mode<synchronous>, transform_indices = @transform_2, window_bounds = array<i64: 16, 1>}, {pipeline_mode = #tpu.pipeline_mode<synchronous>, transform_indices = @transform_3, window_bounds = array<i64: 16, 1>}, {transform_indices = @transform_4, window_bounds = array<i64: 16, 128>}]} {
    %c0_i32 = arith.constant 0 : i32
    %0 = arith.cmpi eq, %arg1, %c0_i32 : i32
    %1 = arith.extui %0 : i1 to i32
    %c0_i32_0 = arith.constant 0 : i32
    %2 = arith.cmpi ne, %1, %c0_i32_0 : i32
    scf.if %2 {
      %cst_10 = arith.constant 0.000000e+00 : f32
      %12 = vector.broadcast %cst_10 : f32 to vector<16x128xf32>
      %c0_11 = arith.constant 0 : index
      %c0_12 = arith.constant 0 : index
      %13 = vector.load %arg7[%c0_11, %c0_12] : memref<16x128xf32, #tpu.memory_space<vmem>>, vector<16x128xf32>
      tpu.vector_store %arg7[%c0_11, %c0_12], %12 {strides = array<i32>} : memref<16x128xf32, #tpu.memory_space<vmem>>, vector<16x128xf32>,
    } else {
    }
    %c0 = arith.constant 0 : index
    %c0_1 = arith.constant 0 : index
    %3 = vector.load %arg7[%c0, %c0_1] : memref<16x128xf32, #tpu.memory_space<vmem>>, vector<16x128xf32>
    %c0_2 = arith.constant 0 : index
    %c0_3 = arith.constant 0 : index
    %4 = vector.load %arg2[%c0_2, %c0_3] : memref<16x224xbf16, #tpu.memory_space<vmem>>, vector<16x224xbf16>
    %c0_4 = arith.constant 0 : index
    %c0_5 = arith.constant 0 : index
    %5 = vector.load %arg3[%c0_4, %c0_5] : memref<224x128xbf16, #tpu.memory_space<vmem>>, vector<224x128xbf16>
    %cst = arith.constant dense<0.000000e+00> : vector<16x128xf32>
    %6 = tpu.matmul %4, %5, %cst {dimension_numbers = #tpu.dot_dimension_numbers<[1], [0], [0], [1], [0, 0, 1, 1], [], []>} : vector<16x224xbf16>, vector<224x128xbf16>, vector<16x128xf32> -> vector<16x128xf32>
    %7 = arith.addf %3, %6 : vector<16x128xf32>
    %c0_6 = arith.constant 0 : index
    %c0_7 = arith.constant 0 : index
    %8 = vector.load %arg7[%c0_6, %c0_7] : memref<16x128xf32, #tpu.memory_space<vmem>>, vector<16x128xf32>
    tpu.vector_store %arg7[%c0_6, %c0_7], %7 {strides = array<i32>} : memref<16x128xf32, #tpu.memory_space<vmem>>, vector<16x128xf32>,
    %c0_i32_8 = arith.constant 0 : i32
    %9 = arith.cmpi eq, %arg1, %c0_i32_8 : i32
    %10 = arith.extui %9 : i1 to i32
    %c0_i32_9 = arith.constant 0 : i32
    %11 = arith.cmpi ne, %10, %c0_i32_9 : i32
    scf.if %11 {
      %c0_10 = arith.constant 0 : index
      %c0_11 = arith.constant 0 : index
      %12 = vector.load %arg7[%c0_10, %c0_11] : memref<16x128xf32, #tpu.memory_space<vmem>>, vector<16x128xf32>
      %c0_12 = arith.constant 0 : index
      %c0_13 = arith.constant 0 : index
      %13 = vector.load %arg4[%c0_12, %c0_13] : memref<16x1xf32, #tpu.memory_space<vmem>>, vector<16x1xf32>
      %14 = vector.broadcast %13 : vector<16x1xf32> to vector<16x128xf32>
      %15 = arith.mulf %12, %14 : vector<16x128xf32>
      %c0_14 = arith.constant 0 : index
      %c0_15 = arith.constant 0 : index
      %16 = vector.load %arg5[%c0_14, %c0_15] : memref<16x1xf32, #tpu.memory_space<vmem>>, vector<16x1xf32>
      %17 = vector.broadcast %16 : vector<16x1xf32> to vector<16x128xf32>
      %18 = arith.addf %15, %17 : vector<16x128xf32>
      %cst_16 = arith.constant 0.000000e+00 : f32
      %19 = vector.broadcast %cst_16 : f32 to vector<16x128xf32>
      %20 = arith.maximumf %18, %19 : vector<16x128xf32>
      %21 = arith.truncf %20 : vector<16x128xf32> to vector<16x128xbf16>
      %c0_17 = arith.constant 0 : index
      %c0_18 = arith.constant 0 : index
      %22 = vector.load %arg6[%c0_17, %c0_18] : memref<16x128xbf16, #tpu.memory_space<vmem>>, vector<16x128xbf16>
      tpu.vector_store %arg6[%c0_17, %c0_18], %21 {strides = array<i32>} : memref<16x128xbf16, #tpu.memory_space<vmem>>, vector<16x128xbf16>,
    } else {
    }
    return
  }
  func.func @transform_0(%arg0: i32, %arg1: i32) -> (i32, i32) {
    %c0_i32 = arith.constant 0 : i32
    %c0_i32_0 = arith.constant 0 : i32
    return %c0_i32, %arg1 : i32, i32
  }
  func.func @transform_1(%arg0: i32, %arg1: i32) -> (i32, i32) {
    %c0_i32 = arith.constant 0 : i32
    return %arg1, %arg0 : i32, i32
  }
  func.func @transform_2(%arg0: i32, %arg1: i32) -> (i32, i32) {
    %c0_i32 = arith.constant 0 : i32
    %c0_i32_0 = arith.constant 0 : i32
    %c0_i32_1 = arith.constant 0 : i32
    return %c0_i32, %c0_i32_0 : i32, i32
  }
  func.func @transform_3(%arg0: i32, %arg1: i32) -> (i32, i32) {
    %c0_i32 = arith.constant 0 : i32
    %c0_i32_0 = arith.constant 0 : i32
    %c0_i32_1 = arith.constant 0 : i32
    return %c0_i32, %c0_i32_0 : i32, i32
  }
  func.func @transform_4(%arg0: i32, %arg1: i32) -> (i32, i32) {
    %c0_i32 = arith.constant 0 : i32
    %c0_i32_0 = arith.constant 0 : i32
    return %c0_i32, %arg0 : i32, i32
  }
}

module attributes {stable_mosaic.version = 11 : i64} {
  func.func @_convmm_res_kernel(%arg0: i32, %arg1: i32, %arg2: memref<16x432xbf16, #tpu.memory_space<vmem>>, %arg3: memref<432x128xbf16, #tpu.memory_space<vmem>>, %arg4: memref<16x1xf32, #tpu.memory_space<vmem>>, %arg5: memref<16x1xf32, #tpu.memory_space<vmem>>, %arg6: memref<16x128xbf16, #tpu.memory_space<vmem>>, %arg7: memref<16x128xbf16, #tpu.memory_space<vmem>>, %arg8: memref<16x128xf32, #tpu.memory_space<vmem>>) attributes {dimension_semantics = [#tpu.dimension_semantics<parallel>, #tpu.dimension_semantics<arbitrary>], iteration_bounds = array<i64: 1, 1>, scalar_prefetch = 0 : i64, scratch_operands = 1 : i64, tpu.core_type = #tpu.core_type<tc>, window_params = [{transform_indices = @transform_0, window_bounds = array<i64: 16, 432>}, {transform_indices = @transform_1, window_bounds = array<i64: 432, 128>}, {pipeline_mode = #tpu.pipeline_mode<synchronous>, transform_indices = @transform_2, window_bounds = array<i64: 16, 1>}, {pipeline_mode = #tpu.pipeline_mode<synchronous>, transform_indices = @transform_3, window_bounds = array<i64: 16, 1>}, {transform_indices = @transform_4, window_bounds = array<i64: 16, 128>}, {transform_indices = @transform_5, window_bounds = array<i64: 16, 128>}]} {
    %c0_i32 = arith.constant 0 : i32
    %0 = arith.cmpi eq, %arg1, %c0_i32 : i32
    %1 = arith.extui %0 : i1 to i32
    %c0_i32_0 = arith.constant 0 : i32
    %2 = arith.cmpi ne, %1, %c0_i32_0 : i32
    scf.if %2 {
      %cst_10 = arith.constant 0.000000e+00 : f32
      %12 = vector.broadcast %cst_10 : f32 to vector<16x128xf32>
      %c0_11 = arith.constant 0 : index
      %c0_12 = arith.constant 0 : index
      %13 = vector.load %arg8[%c0_11, %c0_12] : memref<16x128xf32, #tpu.memory_space<vmem>>, vector<16x128xf32>
      tpu.vector_store %arg8[%c0_11, %c0_12], %12 {strides = array<i32>} : memref<16x128xf32, #tpu.memory_space<vmem>>, vector<16x128xf32>,
    } else {
    }
    %c0 = arith.constant 0 : index
    %c0_1 = arith.constant 0 : index
    %3 = vector.load %arg8[%c0, %c0_1] : memref<16x128xf32, #tpu.memory_space<vmem>>, vector<16x128xf32>
    %c0_2 = arith.constant 0 : index
    %c0_3 = arith.constant 0 : index
    %4 = vector.load %arg2[%c0_2, %c0_3] : memref<16x432xbf16, #tpu.memory_space<vmem>>, vector<16x432xbf16>
    %c0_4 = arith.constant 0 : index
    %c0_5 = arith.constant 0 : index
    %5 = vector.load %arg3[%c0_4, %c0_5] : memref<432x128xbf16, #tpu.memory_space<vmem>>, vector<432x128xbf16>
    %cst = arith.constant dense<0.000000e+00> : vector<16x128xf32>
    %6 = tpu.matmul %4, %5, %cst {dimension_numbers = #tpu.dot_dimension_numbers<[1], [0], [0], [1], [0, 0, 1, 1], [], []>} : vector<16x432xbf16>, vector<432x128xbf16>, vector<16x128xf32> -> vector<16x128xf32>
    %7 = arith.addf %3, %6 : vector<16x128xf32>
    %c0_6 = arith.constant 0 : index
    %c0_7 = arith.constant 0 : index
    %8 = vector.load %arg8[%c0_6, %c0_7] : memref<16x128xf32, #tpu.memory_space<vmem>>, vector<16x128xf32>
    tpu.vector_store %arg8[%c0_6, %c0_7], %7 {strides = array<i32>} : memref<16x128xf32, #tpu.memory_space<vmem>>, vector<16x128xf32>,
    %c0_i32_8 = arith.constant 0 : i32
    %9 = arith.cmpi eq, %arg1, %c0_i32_8 : i32
    %10 = arith.extui %9 : i1 to i32
    %c0_i32_9 = arith.constant 0 : i32
    %11 = arith.cmpi ne, %10, %c0_i32_9 : i32
    scf.if %11 {
      %c0_10 = arith.constant 0 : index
      %c0_11 = arith.constant 0 : index
      %12 = vector.load %arg8[%c0_10, %c0_11] : memref<16x128xf32, #tpu.memory_space<vmem>>, vector<16x128xf32>
      %c0_12 = arith.constant 0 : index
      %c0_13 = arith.constant 0 : index
      %13 = vector.load %arg4[%c0_12, %c0_13] : memref<16x1xf32, #tpu.memory_space<vmem>>, vector<16x1xf32>
      %14 = vector.broadcast %13 : vector<16x1xf32> to vector<16x128xf32>
      %15 = arith.mulf %12, %14 : vector<16x128xf32>
      %c0_14 = arith.constant 0 : index
      %c0_15 = arith.constant 0 : index
      %16 = vector.load %arg5[%c0_14, %c0_15] : memref<16x1xf32, #tpu.memory_space<vmem>>, vector<16x1xf32>
      %17 = vector.broadcast %16 : vector<16x1xf32> to vector<16x128xf32>
      %18 = arith.addf %15, %17 : vector<16x128xf32>
      %c0_16 = arith.constant 0 : index
      %c0_17 = arith.constant 0 : index
      %19 = vector.load %arg6[%c0_16, %c0_17] : memref<16x128xbf16, #tpu.memory_space<vmem>>, vector<16x128xbf16>
      %20 = arith.extf %19 : vector<16x128xbf16> to vector<16x128xf32>
      %21 = arith.addf %18, %20 : vector<16x128xf32>
      %cst_18 = arith.constant 0.000000e+00 : f32
      %22 = vector.broadcast %cst_18 : f32 to vector<16x128xf32>
      %23 = arith.maximumf %21, %22 : vector<16x128xf32>
      %24 = arith.truncf %23 : vector<16x128xf32> to vector<16x128xbf16>
      %c0_19 = arith.constant 0 : index
      %c0_20 = arith.constant 0 : index
      %25 = vector.load %arg7[%c0_19, %c0_20] : memref<16x128xbf16, #tpu.memory_space<vmem>>, vector<16x128xbf16>
      tpu.vector_store %arg7[%c0_19, %c0_20], %24 {strides = array<i32>} : memref<16x128xbf16, #tpu.memory_space<vmem>>, vector<16x128xbf16>,
    } else {
    }
    return
  }
  func.func @transform_0(%arg0: i32, %arg1: i32) -> (i32, i32) {
    %c0_i32 = arith.constant 0 : i32
    %c0_i32_0 = arith.constant 0 : i32
    return %c0_i32, %arg1 : i32, i32
  }
  func.func @transform_1(%arg0: i32, %arg1: i32) -> (i32, i32) {
    %c0_i32 = arith.constant 0 : i32
    return %arg1, %arg0 : i32, i32
  }
  func.func @transform_2(%arg0: i32, %arg1: i32) -> (i32, i32) {
    %c0_i32 = arith.constant 0 : i32
    %c0_i32_0 = arith.constant 0 : i32
    %c0_i32_1 = arith.constant 0 : i32
    return %c0_i32, %c0_i32_0 : i32, i32
  }
  func.func @transform_3(%arg0: i32, %arg1: i32) -> (i32, i32) {
    %c0_i32 = arith.constant 0 : i32
    %c0_i32_0 = arith.constant 0 : i32
    %c0_i32_1 = arith.constant 0 : i32
    return %c0_i32, %c0_i32_0 : i32, i32
  }
  func.func @transform_4(%arg0: i32, %arg1: i32) -> (i32, i32) {
    %c0_i32 = arith.constant 0 : i32
    %c0_i32_0 = arith.constant 0 : i32
    return %c0_i32, %arg0 : i32, i32
  }
  func.func @transform_5(%arg0: i32, %arg1: i32) -> (i32, i32) {
    %c0_i32 = arith.constant 0 : i32
    %c0_i32_0 = arith.constant 0 : i32
    return %c0_i32, %arg0 : i32, i32
  }
}

module attributes {stable_mosaic.version = 11 : i64} {
  func.func @_convmm_kernel(%arg0: i32, %arg1: i32, %arg2: memref<32x432xbf16, #tpu.memory_space<vmem>>, %arg3: memref<432x128xbf16, #tpu.memory_space<vmem>>, %arg4: memref<32x1xf32, #tpu.memory_space<vmem>>, %arg5: memref<32x1xf32, #tpu.memory_space<vmem>>, %arg6: memref<32x128xbf16, #tpu.memory_space<vmem>>, %arg7: memref<32x128xf32, #tpu.memory_space<vmem>>) attributes {dimension_semantics = [#tpu.dimension_semantics<parallel>, #tpu.dimension_semantics<arbitrary>], iteration_bounds = array<i64: 1, 1>, scalar_prefetch = 0 : i64, scratch_operands = 1 : i64, tpu.core_type = #tpu.core_type<tc>, window_params = [{transform_indices = @transform_0, window_bounds = array<i64: 32, 432>}, {transform_indices = @transform_1, window_bounds = array<i64: 432, 128>}, {pipeline_mode = #tpu.pipeline_mode<synchronous>, transform_indices = @transform_2, window_bounds = array<i64: 32, 1>}, {pipeline_mode = #tpu.pipeline_mode<synchronous>, transform_indices = @transform_3, window_bounds = array<i64: 32, 1>}, {transform_indices = @transform_4, window_bounds = array<i64: 32, 128>}]} {
    %c0_i32 = arith.constant 0 : i32
    %0 = arith.cmpi eq, %arg1, %c0_i32 : i32
    %1 = arith.extui %0 : i1 to i32
    %c0_i32_0 = arith.constant 0 : i32
    %2 = arith.cmpi ne, %1, %c0_i32_0 : i32
    scf.if %2 {
      %cst_10 = arith.constant 0.000000e+00 : f32
      %12 = vector.broadcast %cst_10 : f32 to vector<32x128xf32>
      %c0_11 = arith.constant 0 : index
      %c0_12 = arith.constant 0 : index
      %13 = vector.load %arg7[%c0_11, %c0_12] : memref<32x128xf32, #tpu.memory_space<vmem>>, vector<32x128xf32>
      tpu.vector_store %arg7[%c0_11, %c0_12], %12 {strides = array<i32>} : memref<32x128xf32, #tpu.memory_space<vmem>>, vector<32x128xf32>,
    } else {
    }
    %c0 = arith.constant 0 : index
    %c0_1 = arith.constant 0 : index
    %3 = vector.load %arg7[%c0, %c0_1] : memref<32x128xf32, #tpu.memory_space<vmem>>, vector<32x128xf32>
    %c0_2 = arith.constant 0 : index
    %c0_3 = arith.constant 0 : index
    %4 = vector.load %arg2[%c0_2, %c0_3] : memref<32x432xbf16, #tpu.memory_space<vmem>>, vector<32x432xbf16>
    %c0_4 = arith.constant 0 : index
    %c0_5 = arith.constant 0 : index
    %5 = vector.load %arg3[%c0_4, %c0_5] : memref<432x128xbf16, #tpu.memory_space<vmem>>, vector<432x128xbf16>
    %cst = arith.constant dense<0.000000e+00> : vector<32x128xf32>
    %6 = tpu.matmul %4, %5, %cst {dimension_numbers = #tpu.dot_dimension_numbers<[1], [0], [0], [1], [0, 0, 1, 1], [], []>} : vector<32x432xbf16>, vector<432x128xbf16>, vector<32x128xf32> -> vector<32x128xf32>
    %7 = arith.addf %3, %6 : vector<32x128xf32>
    %c0_6 = arith.constant 0 : index
    %c0_7 = arith.constant 0 : index
    %8 = vector.load %arg7[%c0_6, %c0_7] : memref<32x128xf32, #tpu.memory_space<vmem>>, vector<32x128xf32>
    tpu.vector_store %arg7[%c0_6, %c0_7], %7 {strides = array<i32>} : memref<32x128xf32, #tpu.memory_space<vmem>>, vector<32x128xf32>,
    %c0_i32_8 = arith.constant 0 : i32
    %9 = arith.cmpi eq, %arg1, %c0_i32_8 : i32
    %10 = arith.extui %9 : i1 to i32
    %c0_i32_9 = arith.constant 0 : i32
    %11 = arith.cmpi ne, %10, %c0_i32_9 : i32
    scf.if %11 {
      %c0_10 = arith.constant 0 : index
      %c0_11 = arith.constant 0 : index
      %12 = vector.load %arg7[%c0_10, %c0_11] : memref<32x128xf32, #tpu.memory_space<vmem>>, vector<32x128xf32>
      %c0_12 = arith.constant 0 : index
      %c0_13 = arith.constant 0 : index
      %13 = vector.load %arg4[%c0_12, %c0_13] : memref<32x1xf32, #tpu.memory_space<vmem>>, vector<32x1xf32>
      %14 = vector.broadcast %13 : vector<32x1xf32> to vector<32x128xf32>
      %15 = arith.mulf %12, %14 : vector<32x128xf32>
      %c0_14 = arith.constant 0 : index
      %c0_15 = arith.constant 0 : index
      %16 = vector.load %arg5[%c0_14, %c0_15] : memref<32x1xf32, #tpu.memory_space<vmem>>, vector<32x1xf32>
      %17 = vector.broadcast %16 : vector<32x1xf32> to vector<32x128xf32>
      %18 = arith.addf %15, %17 : vector<32x128xf32>
      %cst_16 = arith.constant 0.000000e+00 : f32
      %19 = vector.broadcast %cst_16 : f32 to vector<32x128xf32>
      %20 = arith.maximumf %18, %19 : vector<32x128xf32>
      %21 = arith.truncf %20 : vector<32x128xf32> to vector<32x128xbf16>
      %c0_17 = arith.constant 0 : index
      %c0_18 = arith.constant 0 : index
      %22 = vector.load %arg6[%c0_17, %c0_18] : memref<32x128xbf16, #tpu.memory_space<vmem>>, vector<32x128xbf16>
      tpu.vector_store %arg6[%c0_17, %c0_18], %21 {strides = array<i32>} : memref<32x128xbf16, #tpu.memory_space<vmem>>, vector<32x128xbf16>,
    } else {
    }
    return
  }
  func.func @transform_0(%arg0: i32, %arg1: i32) -> (i32, i32) {
    %c0_i32 = arith.constant 0 : i32
    %c0_i32_0 = arith.constant 0 : i32
    return %c0_i32, %arg1 : i32, i32
  }
  func.func @transform_1(%arg0: i32, %arg1: i32) -> (i32, i32) {
    %c0_i32 = arith.constant 0 : i32
    return %arg1, %arg0 : i32, i32
  }
  func.func @transform_2(%arg0: i32, %arg1: i32) -> (i32, i32) {
    %c0_i32 = arith.constant 0 : i32
    %c0_i32_0 = arith.constant 0 : i32
    %c0_i32_1 = arith.constant 0 : i32
    return %c0_i32, %c0_i32_0 : i32, i32
  }
  func.func @transform_3(%arg0: i32, %arg1: i32) -> (i32, i32) {
    %c0_i32 = arith.constant 0 : i32
    %c0_i32_0 = arith.constant 0 : i32
    %c0_i32_1 = arith.constant 0 : i32
    return %c0_i32, %c0_i32_0 : i32, i32
  }
  func.func @transform_4(%arg0: i32, %arg1: i32) -> (i32, i32) {
    %c0_i32 = arith.constant 0 : i32
    %c0_i32_0 = arith.constant 0 : i32
    return %c0_i32, %arg0 : i32, i32
  }
}

module attributes {stable_mosaic.version = 11 : i64} {
  func.func @_convmm_kernel(%arg0: i32, %arg1: i32, %arg2: memref<32x16xbf16, #tpu.memory_space<vmem>>, %arg3: memref<16x128xbf16, #tpu.memory_space<vmem>>, %arg4: memref<32x1xf32, #tpu.memory_space<vmem>>, %arg5: memref<32x1xf32, #tpu.memory_space<vmem>>, %arg6: memref<32x128xbf16, #tpu.memory_space<vmem>>, %arg7: memref<32x128xf32, #tpu.memory_space<vmem>>) attributes {dimension_semantics = [#tpu.dimension_semantics<parallel>, #tpu.dimension_semantics<arbitrary>], iteration_bounds = array<i64: 1, 1>, scalar_prefetch = 0 : i64, scratch_operands = 1 : i64, tpu.core_type = #tpu.core_type<tc>, window_params = [{transform_indices = @transform_0, window_bounds = array<i64: 32, 16>}, {transform_indices = @transform_1, window_bounds = array<i64: 16, 128>}, {pipeline_mode = #tpu.pipeline_mode<synchronous>, transform_indices = @transform_2, window_bounds = array<i64: 32, 1>}, {pipeline_mode = #tpu.pipeline_mode<synchronous>, transform_indices = @transform_3, window_bounds = array<i64: 32, 1>}, {transform_indices = @transform_4, window_bounds = array<i64: 32, 128>}]} {
    %c0_i32 = arith.constant 0 : i32
    %0 = arith.cmpi eq, %arg1, %c0_i32 : i32
    %1 = arith.extui %0 : i1 to i32
    %c0_i32_0 = arith.constant 0 : i32
    %2 = arith.cmpi ne, %1, %c0_i32_0 : i32
    scf.if %2 {
      %cst_10 = arith.constant 0.000000e+00 : f32
      %12 = vector.broadcast %cst_10 : f32 to vector<32x128xf32>
      %c0_11 = arith.constant 0 : index
      %c0_12 = arith.constant 0 : index
      %13 = vector.load %arg7[%c0_11, %c0_12] : memref<32x128xf32, #tpu.memory_space<vmem>>, vector<32x128xf32>
      tpu.vector_store %arg7[%c0_11, %c0_12], %12 {strides = array<i32>} : memref<32x128xf32, #tpu.memory_space<vmem>>, vector<32x128xf32>,
    } else {
    }
    %c0 = arith.constant 0 : index
    %c0_1 = arith.constant 0 : index
    %3 = vector.load %arg7[%c0, %c0_1] : memref<32x128xf32, #tpu.memory_space<vmem>>, vector<32x128xf32>
    %c0_2 = arith.constant 0 : index
    %c0_3 = arith.constant 0 : index
    %4 = vector.load %arg2[%c0_2, %c0_3] : memref<32x16xbf16, #tpu.memory_space<vmem>>, vector<32x16xbf16>
    %c0_4 = arith.constant 0 : index
    %c0_5 = arith.constant 0 : index
    %5 = vector.load %arg3[%c0_4, %c0_5] : memref<16x128xbf16, #tpu.memory_space<vmem>>, vector<16x128xbf16>
    %cst = arith.constant dense<0.000000e+00> : vector<32x128xf32>
    %6 = tpu.matmul %4, %5, %cst {dimension_numbers = #tpu.dot_dimension_numbers<[1], [0], [0], [1], [0, 0, 1, 1], [], []>} : vector<32x16xbf16>, vector<16x128xbf16>, vector<32x128xf32> -> vector<32x128xf32>
    %7 = arith.addf %3, %6 : vector<32x128xf32>
    %c0_6 = arith.constant 0 : index
    %c0_7 = arith.constant 0 : index
    %8 = vector.load %arg7[%c0_6, %c0_7] : memref<32x128xf32, #tpu.memory_space<vmem>>, vector<32x128xf32>
    tpu.vector_store %arg7[%c0_6, %c0_7], %7 {strides = array<i32>} : memref<32x128xf32, #tpu.memory_space<vmem>>, vector<32x128xf32>,
    %c0_i32_8 = arith.constant 0 : i32
    %9 = arith.cmpi eq, %arg1, %c0_i32_8 : i32
    %10 = arith.extui %9 : i1 to i32
    %c0_i32_9 = arith.constant 0 : i32
    %11 = arith.cmpi ne, %10, %c0_i32_9 : i32
    scf.if %11 {
      %c0_10 = arith.constant 0 : index
      %c0_11 = arith.constant 0 : index
      %12 = vector.load %arg7[%c0_10, %c0_11] : memref<32x128xf32, #tpu.memory_space<vmem>>, vector<32x128xf32>
      %c0_12 = arith.constant 0 : index
      %c0_13 = arith.constant 0 : index
      %13 = vector.load %arg4[%c0_12, %c0_13] : memref<32x1xf32, #tpu.memory_space<vmem>>, vector<32x1xf32>
      %14 = vector.broadcast %13 : vector<32x1xf32> to vector<32x128xf32>
      %15 = arith.mulf %12, %14 : vector<32x128xf32>
      %c0_14 = arith.constant 0 : index
      %c0_15 = arith.constant 0 : index
      %16 = vector.load %arg5[%c0_14, %c0_15] : memref<32x1xf32, #tpu.memory_space<vmem>>, vector<32x1xf32>
      %17 = vector.broadcast %16 : vector<32x1xf32> to vector<32x128xf32>
      %18 = arith.addf %15, %17 : vector<32x128xf32>
      %19 = arith.truncf %18 : vector<32x128xf32> to vector<32x128xbf16>
      %c0_16 = arith.constant 0 : index
      %c0_17 = arith.constant 0 : index
      %20 = vector.load %arg6[%c0_16, %c0_17] : memref<32x128xbf16, #tpu.memory_space<vmem>>, vector<32x128xbf16>
      tpu.vector_store %arg6[%c0_16, %c0_17], %19 {strides = array<i32>} : memref<32x128xbf16, #tpu.memory_space<vmem>>, vector<32x128xbf16>,
    } else {
    }
    return
  }
  func.func @transform_0(%arg0: i32, %arg1: i32) -> (i32, i32) {
    %c0_i32 = arith.constant 0 : i32
    %c0_i32_0 = arith.constant 0 : i32
    return %c0_i32, %arg1 : i32, i32
  }
  func.func @transform_1(%arg0: i32, %arg1: i32) -> (i32, i32) {
    %c0_i32 = arith.constant 0 : i32
    return %arg1, %arg0 : i32, i32
  }
  func.func @transform_2(%arg0: i32, %arg1: i32) -> (i32, i32) {
    %c0_i32 = arith.constant 0 : i32
    %c0_i32_0 = arith.constant 0 : i32
    %c0_i32_1 = arith.constant 0 : i32
    return %c0_i32, %c0_i32_0 : i32, i32
  }
  func.func @transform_3(%arg0: i32, %arg1: i32) -> (i32, i32) {
    %c0_i32 = arith.constant 0 : i32
    %c0_i32_0 = arith.constant 0 : i32
    %c0_i32_1 = arith.constant 0 : i32
    return %c0_i32, %c0_i32_0 : i32, i32
  }
  func.func @transform_4(%arg0: i32, %arg1: i32) -> (i32, i32) {
    %c0_i32 = arith.constant 0 : i32
    %c0_i32_0 = arith.constant 0 : i32
    return %c0_i32, %arg0 : i32, i32
  }
}

module attributes {stable_mosaic.version = 11 : i64} {
  func.func @_convmm_res_kernel(%arg0: i32, %arg1: i32, %arg2: memref<32x512xbf16, #tpu.memory_space<vmem>>, %arg3: memref<512x128xbf16, #tpu.memory_space<vmem>>, %arg4: memref<32x1xf32, #tpu.memory_space<vmem>>, %arg5: memref<32x1xf32, #tpu.memory_space<vmem>>, %arg6: memref<32x128xbf16, #tpu.memory_space<vmem>>, %arg7: memref<32x128xbf16, #tpu.memory_space<vmem>>, %arg8: memref<32x128xf32, #tpu.memory_space<vmem>>) attributes {dimension_semantics = [#tpu.dimension_semantics<parallel>, #tpu.dimension_semantics<arbitrary>], iteration_bounds = array<i64: 1, 2>, scalar_prefetch = 0 : i64, scratch_operands = 1 : i64, tpu.core_type = #tpu.core_type<tc>, window_params = [{transform_indices = @transform_0, window_bounds = array<i64: 32, 512>}, {transform_indices = @transform_1, window_bounds = array<i64: 512, 128>}, {pipeline_mode = #tpu.pipeline_mode<synchronous>, transform_indices = @transform_2, window_bounds = array<i64: 32, 1>}, {pipeline_mode = #tpu.pipeline_mode<synchronous>, transform_indices = @transform_3, window_bounds = array<i64: 32, 1>}, {transform_indices = @transform_4, window_bounds = array<i64: 32, 128>}, {transform_indices = @transform_5, window_bounds = array<i64: 32, 128>}]} {
    %c0_i32 = arith.constant 0 : i32
    %0 = arith.cmpi eq, %arg1, %c0_i32 : i32
    %1 = arith.extui %0 : i1 to i32
    %c0_i32_0 = arith.constant 0 : i32
    %2 = arith.cmpi ne, %1, %c0_i32_0 : i32
    scf.if %2 {
      %cst_9 = arith.constant 0.000000e+00 : f32
      %12 = vector.broadcast %cst_9 : f32 to vector<32x128xf32>
      %c0_10 = arith.constant 0 : index
      %c0_11 = arith.constant 0 : index
      %13 = vector.load %arg8[%c0_10, %c0_11] : memref<32x128xf32, #tpu.memory_space<vmem>>, vector<32x128xf32>
      tpu.vector_store %arg8[%c0_10, %c0_11], %12 {strides = array<i32>} : memref<32x128xf32, #tpu.memory_space<vmem>>, vector<32x128xf32>,
    } else {
    }
    %c0 = arith.constant 0 : index
    %c0_1 = arith.constant 0 : index
    %3 = vector.load %arg8[%c0, %c0_1] : memref<32x128xf32, #tpu.memory_space<vmem>>, vector<32x128xf32>
    %c0_2 = arith.constant 0 : index
    %c0_3 = arith.constant 0 : index
    %4 = vector.load %arg2[%c0_2, %c0_3] : memref<32x512xbf16, #tpu.memory_space<vmem>>, vector<32x512xbf16>
    %c0_4 = arith.constant 0 : index
    %c0_5 = arith.constant 0 : index
    %5 = vector.load %arg3[%c0_4, %c0_5] : memref<512x128xbf16, #tpu.memory_space<vmem>>, vector<512x128xbf16>
    %cst = arith.constant dense<0.000000e+00> : vector<32x128xf32>
    %6 = tpu.matmul %4, %5, %cst {dimension_numbers = #tpu.dot_dimension_numbers<[1], [0], [0], [1], [0, 0, 1, 1], [], []>} : vector<32x512xbf16>, vector<512x128xbf16>, vector<32x128xf32> -> vector<32x128xf32>
    %7 = arith.addf %3, %6 : vector<32x128xf32>
    %c0_6 = arith.constant 0 : index
    %c0_7 = arith.constant 0 : index
    %8 = vector.load %arg8[%c0_6, %c0_7] : memref<32x128xf32, #tpu.memory_space<vmem>>, vector<32x128xf32>
    tpu.vector_store %arg8[%c0_6, %c0_7], %7 {strides = array<i32>} : memref<32x128xf32, #tpu.memory_space<vmem>>, vector<32x128xf32>,
    %c1_i32 = arith.constant 1 : i32
    %9 = arith.cmpi eq, %arg1, %c1_i32 : i32
    %10 = arith.extui %9 : i1 to i32
    %c0_i32_8 = arith.constant 0 : i32
    %11 = arith.cmpi ne, %10, %c0_i32_8 : i32
    scf.if %11 {
      %c0_9 = arith.constant 0 : index
      %c0_10 = arith.constant 0 : index
      %12 = vector.load %arg8[%c0_9, %c0_10] : memref<32x128xf32, #tpu.memory_space<vmem>>, vector<32x128xf32>
      %c0_11 = arith.constant 0 : index
      %c0_12 = arith.constant 0 : index
      %13 = vector.load %arg4[%c0_11, %c0_12] : memref<32x1xf32, #tpu.memory_space<vmem>>, vector<32x1xf32>
      %14 = vector.broadcast %13 : vector<32x1xf32> to vector<32x128xf32>
      %15 = arith.mulf %12, %14 : vector<32x128xf32>
      %c0_13 = arith.constant 0 : index
      %c0_14 = arith.constant 0 : index
      %16 = vector.load %arg5[%c0_13, %c0_14] : memref<32x1xf32, #tpu.memory_space<vmem>>, vector<32x1xf32>
      %17 = vector.broadcast %16 : vector<32x1xf32> to vector<32x128xf32>
      %18 = arith.addf %15, %17 : vector<32x128xf32>
      %c0_15 = arith.constant 0 : index
      %c0_16 = arith.constant 0 : index
      %19 = vector.load %arg6[%c0_15, %c0_16] : memref<32x128xbf16, #tpu.memory_space<vmem>>, vector<32x128xbf16>
      %20 = arith.extf %19 : vector<32x128xbf16> to vector<32x128xf32>
      %21 = arith.addf %18, %20 : vector<32x128xf32>
      %cst_17 = arith.constant 0.000000e+00 : f32
      %22 = vector.broadcast %cst_17 : f32 to vector<32x128xf32>
      %23 = arith.maximumf %21, %22 : vector<32x128xf32>
      %24 = arith.truncf %23 : vector<32x128xf32> to vector<32x128xbf16>
      %c0_18 = arith.constant 0 : index
      %c0_19 = arith.constant 0 : index
      %25 = vector.load %arg7[%c0_18, %c0_19] : memref<32x128xbf16, #tpu.memory_space<vmem>>, vector<32x128xbf16>
      tpu.vector_store %arg7[%c0_18, %c0_19], %24 {strides = array<i32>} : memref<32x128xbf16, #tpu.memory_space<vmem>>, vector<32x128xbf16>,
    } else {
    }
    return
  }
  func.func @transform_0(%arg0: i32, %arg1: i32) -> (i32, i32) {
    %c0_i32 = arith.constant 0 : i32
    %c0_i32_0 = arith.constant 0 : i32
    return %c0_i32, %arg1 : i32, i32
  }
  func.func @transform_1(%arg0: i32, %arg1: i32) -> (i32, i32) {
    %c0_i32 = arith.constant 0 : i32
    return %arg1, %arg0 : i32, i32
  }
  func.func @transform_2(%arg0: i32, %arg1: i32) -> (i32, i32) {
    %c0_i32 = arith.constant 0 : i32
    %c0_i32_0 = arith.constant 0 : i32
    %c0_i32_1 = arith.constant 0 : i32
    return %c0_i32, %c0_i32_0 : i32, i32
  }
  func.func @transform_3(%arg0: i32, %arg1: i32) -> (i32, i32) {
    %c0_i32 = arith.constant 0 : i32
    %c0_i32_0 = arith.constant 0 : i32
    %c0_i32_1 = arith.constant 0 : i32
    return %c0_i32, %c0_i32_0 : i32, i32
  }
  func.func @transform_4(%arg0: i32, %arg1: i32) -> (i32, i32) {
    %c0_i32 = arith.constant 0 : i32
    %c0_i32_0 = arith.constant 0 : i32
    return %c0_i32, %arg0 : i32, i32
  }
  func.func @transform_5(%arg0: i32, %arg1: i32) -> (i32, i32) {
    %c0_i32 = arith.constant 0 : i32
    %c0_i32_0 = arith.constant 0 : i32
    return %c0_i32, %arg0 : i32, i32
  }
}

</mosaic_0001>

<bundles_post_ra>
// kernel: daft_forward.15
= control target key start
LH: loop header
LB: loop body
LE: loop exit
PB: predicated region body
PF: predicated region fallthrough
CT: control target
= control target key end

     0   :  { %s774_s15 = smov 0   ;;  %s776_s16 = smov 0   ;;  %s875_s0 = inlined_call_operand.vmem [shape: bf16[16,32], index: 0, kind: input, shape index: {}]   ;;  %s876_s1 = inlined_call_operand.vmem [shape: bf16[32,8192], index: 1, kind: input, shape index: {}]   ;;  %s877_s2 = inlined_call_operand.vmem [shape: f32[16,1], index: 2, kind: input, shape index: {}]   ;;  %s878_s3 = inlined_call_operand.vmem [shape: f32[16,1], index: 3, kind: input, shape index: {}]   ;;  %s879_s4 = inlined_call_operand.vmem [shape: bf16[16,8192], index: 4, kind: output, shape index: {}]  }
   0x1   :  { %s778_s17 = smov 0   ;;  %s780_s18 = smov 0  }
   0x2   :  { %s782_s19 = smov 0  }
   0x3 LB: > { %s26_s20 = sadd.s32 1, %s742_s18  ;;  %s598_s21 = sadd.s32 4294967295, %s746_s19   ;;  %s746_s19 = sphi %s782_s19, %s14_s19   ;;  %s742_s18 = sphi %s780_s18, %s884_s18   ;;  %s738_s17 = sphi %s778_s17, %s883_s17   ;;  %s734_s16 = sphi %s776_s16, %s882_s16   ;;  %s730_s15 = sphi %s774_s15, %s881_s15  }
   0x4   : > { %p28_p0 = scmp.ge.s32.totalorder %s26_s20, 16  ;;  %p68_p1 = scmp.ne.s32.totalorder %s734_s16, %s730_s15 }
   0x5   : > { %p69_p2 = scmp.eq.s32.totalorder %s746_s19, 0  ;;  %p140_p4 = scmp.eq.s32.totalorder %s598_s21, 15 }
   0x6   : > { %s886_s20 = smov (%p28_p0, %s26_s20), 0  ;;  %s61_s23 = sadd.s32 1, %s734_s16 }
   0x7   : > { %p70_p3 = por %p69_p2, %p68_p1  ;;  %s57_s22 = ssub.s32 %s742_s18, %s886_s20 }
   0x8   : > { %p59_p5 = scmp.eq.s32.totalorder %s57_s22, 0  ;;  %p809_p6 = por %p140_p4, %p68_p1 }
   0x9   : > { %p602_p7 = scmp.ge.s32.totalorder %s746_s19, 16 }
   0xa   : > { %s814_s25 = scalar_select %p59_p5, %s734_s16, %s61_s23  }
   0xb   : > { %175 = sbr.rel (%p602_p7) target bundleno = 28 (0x1c), region = 28 }
  0x10   : > { %178 = sbr.rel (!%p70_p3) target bundleno = 28 (0x1c), region = 32  ;;  %s180_s26 = sand.u32 (%p70_p3), 1, %s734_s16  }
  0x11   : > { %s654_s27 = sshll.u32 (%p70_p3), %s742_s18, 4  ;;  %s603_s28 = sshll.u32 (%p70_p3), %s180_s26, 6 }
  0x12   : > { %s188_s5 = scalar_lea.vmem (%p70_p3), %s876_s1, %s654_s27  ;;  %s182_s6 = scalar_lea.vmem (%p70_p3), [#allocation3], %s603_s28 }
  0x13   : > { %v201_v0 = vld [vmem:[%s188_s5] sm:$0xff] (%p70_p3)  ;;  %v203_v1 = vld [vmem:[%s188_s5 + $0x8] sm:$0xff] (%p70_p3) }
  0x14   : > { %v205_v2 = vld [vmem:[%s188_s5 + $0x100] sm:$0xff] (%p70_p3)  ;;  %202 = vst [vmem:[%s182_s6] sm:$0xff] (%p70_p3), %v201_v0  ;;  %v207_v3 = vld [vmem:[%s188_s5 + $0x108] sm:$0xff] (%p70_p3) }
  0x15   : > { %204 = vst [vmem:[%s182_s6 + $0x8] sm:$0xff] %v203_v1  ;;  %v209_v4 = vld [vmem:[%s188_s5 + $0x200] sm:$0xff]  ;;  %v211_v5 = vld [vmem:[%s188_s5 + $0x208] sm:$0xff] }
  0x16   : > { %206 = vst [vmem:[%s182_s6 + $0x10] sm:$0xff] %v205_v2  ;;  %v213_v6 = vld [vmem:[%s188_s5 + $0x300] sm:$0xff]  ;;  %v215_v7 = vld [vmem:[%s188_s5 + $0x308] sm:$0xff] }
  0x17   : > { %208 = vst [vmem:[%s182_s6 + $0x18] sm:$0xff] %v207_v3 }
  0x18   : > { %210 = vst [vmem:[%s182_s6 + $0x20] sm:$0xff] %v209_v4 }
  0x19   : > { %212 = vst [vmem:[%s182_s6 + $0x28] sm:$0xff] %v211_v5 }
  0x1a   : > { %214 = vst [vmem:[%s182_s6 + $0x30] sm:$0xff] %v213_v6 }
  0x1b   : > { %216 = vst [vmem:[%s182_s6 + $0x38] sm:$0xff] %v215_v7 }
  0x1c PF: > { %p606_p8 = scmp.ge.s32.totalorder %s746_s19, 1  ;;  %p221_p9 = scmp.lt.s32.totalorder %s746_s19, 17 }
  0x1e   : > { %p222_p10 = pnand %p606_p8, %p221_p9 }
  0x1f   : > { %s228_s7 = sand.u32 (!%p222_p10), 1, %s730_s15  }
  0x20   : > { %225 = sbr.rel (%p222_p10) target bundleno = 207 (0xcf), region = 55  ;;  %s607_s12 = sshll.u32 (!%p222_p10), %s228_s7, 6 }
  0x21   : > { %s230_s13 = scalar_lea.vmem (!%p222_p10), [#allocation3], %s607_s12  ;;  %s608_s28 = sshll.u32 (!%p222_p10), %s228_s7, 5 }
  0x22   : > { %s844_s29 = scalar_lea.vmem (!%p222_p10), [#allocation4], %s608_s28 }
  0x25   : > { %v426_v8 = vld [vmem:[%s877_s2] sm:$0xff]  ;;  %v748_v10 = vmov 0   ;;  %v662_v12 = vld [vmem:[%s230_s13 + $0x2c] sm:$0xf0]  ;;  %v633_v15 = vld [vmem:[%s230_s13 + $0x30] sm:$0xf0] }
  0x26   : > { %v446_v9 = vld [vmem:[%s878_s3] sm:$0xff]  ;;  %706 = vset.pattern.permute.xlu0 %v748_v10  ;;  %707 = vset.pattern.permute.xlu1 %v748_v10  ;;  %v639_v16 = vld [vmem:[%s230_s13 + $0x28] sm:$0xf]  ;;  %v663_v17 = vld [vmem:[%s230_s13 + $0x34] sm:$0xf0]  ;;  %vm339_vm0 = vcmask 261120  }
  0x27   : > { %430 = vperm.xlu0 %706, %v426_v8   ;;  %450 = vperm.xlu1 %707, %v446_v9   ;;  %v631_v11 = vld [vmem:[%s230_s13 + $0x20] sm:$0xf]  ;;  %v660_v13 = vld [vmem:[%s230_s13 + $0x24] sm:$0xf]  ;;  %v640_v19 = vor.u32 %v663_v17, %v639_v16  ;;  %v661_v20 = vld [vmem:[%s230_s13 + $0x2c] sm:$0xf] }
  0x28   : > { %v632_v14 = vor.u32 %v662_v12, %v631_v11  ;;  %v636_v18 = vor.u32 %v660_v13, %v633_v15  ;;  %v641_v21 = vld [vmem:[%s230_s13 + $0x38] sm:$0xf0]  ;;  %v615_v22 = vld [vmem:[%s230_s13] sm:$0xf]  ;;  %v427_v23 = vld [vmem:[%s877_s2 + $0x8] sm:$0xff]  ;;  %s664_s15 = sshll.u32 (%p809_p6), %s738_s17, 4 }
  0x29   : > { %v644_v24 = vor.u32 %v661_v20, %v641_v21  ;;  %v658_v25 = vld [vmem:[%s230_s13 + $0xc] sm:$0xf0]  ;;  %v656_v26 = vld [vmem:[%s230_s13 + $0x4] sm:$0xf]  ;;  %v617_v27 = vld [vmem:[%s230_s13 + $0x10] sm:$0xf0]  ;;  %377 = vmatpush.bf16.msra.mxu2 %v640_v19  ;;  %s491_s6 = scalar_lea.vmem (%p809_p6), %s879_s4, %s664_s15 }
  0x2a   : > { %349 = vmatpush.bf16.msra.mxu0 %v632_v14  ;;  %363 = vmatpush.bf16.msra.mxu1 %v636_v18  ;;  %v616_v28 = vor.u32 %v658_v25, %v615_v22  ;;  %v620_v29 = vor.u32 %v656_v26, %v617_v27  ;;  %v623_v30 = vld [vmem:[%s230_s13 + $0x8] sm:$0xf]  ;;  %v659_v31 = vld [vmem:[%s230_s13 + $0x14] sm:$0xf0]  ;;  %v657_v32 = vld [vmem:[%s230_s13 + $0xc] sm:$0xf] }
  0x2b   : > { %391 = vmatpush.bf16.msra.mxu3 %v644_v24  ;;  %v624_v33 = vor.u32 %v659_v31, %v623_v30  ;;  %v625_v34 = vld [vmem:[%s230_s13 + $0x18] sm:$0xf0]  ;;  %v655_v36 = vld [vmem:[%s875_s0] sm:$0xff]  ;;  %v447_v37 = vld [vmem:[%s878_s3 + $0x8] sm:$0xff] }
  0x2c   : > { %v628_v35 = vor.u32 %v657_v32, %v625_v34 }
  0x2d   : > { %378 = vmatpush.bf16.msra.mxu2 %v624_v33 }
  0x2e   : > { %350 = vmatpush.bf16.msra.mxu0 %v616_v28  ;;  %364 = vmatpush.bf16.msra.mxu1 %v620_v29 }
  0x2f   : > { %435 = vperm.xlu0 %706, %v427_v23   ;;  %392 = vmatpush.bf16.msra.mxu3 %v628_v35 }
  0x30   : > { %455 = vperm.xlu1 %707, %v447_v37   ;;  %647 = vmatmul.msk.bf16.vlgmr.msra.gmra.mxu2 %vm339_vm0, %v655_v36 }
  0x31   : > { %645 = vmatmul.msk.bf16.vlgmr.msra.gmra.mxu0 %vm339_vm0, %v655_v36  ;;  %646 = vmatmul.msk.bf16.vlgmr.msra.gmra.mxu1 %vm339_vm0, %v655_v36 }
  0x32   : > { %648 = vmatmul.msk.bf16.vlgmr.msra.gmra.mxu3 %vm339_vm0, %v655_v36 }
  0x99   : > { %v431_v38 = vpop.permute.xlu0 %430  ;;  %v451_v39 = vpop.permute.xlu1 %450 }
  0xa1   : > { %v436_v48 = vpop.permute.xlu0 %435 }
  0xa2   : > { %v456_v58 = vpop.permute.xlu1 %455 }
  0xae   : > { %v352_v40 = vpop.f32.mrf.mxu0  ;;  %v366_v42 = vpop.f32.mrf.mxu1 }
  0xaf   : > { %v438_v41 = vmul.f32 %v431_v38, %v352_v40  ;;  %v439_v43 = vmul.f32 %v431_v38, %v366_v42 }
  0xb1   : > { %v458_v44 = vadd.f32 %v451_v39, %v438_v41  ;;  %v459_v45 = vadd.f32 %v451_v39, %v439_v43 }
  0xb3   : > { %v466_v46 = vmax.f32 %v458_v44, 0.0  ;;  %v467_v47 = vmax.f32 %v459_v45, 0.0  ;;  %v380_v49 = vpop.f32.mrf.mxu2 }
  0xb4   : > { %v440_v51 = vmul.f32 %v431_v38, %v380_v49 }
  0xb5   : > { %v474_v50 = vpack.c.bf16 %v467_v47, %v466_v46  ;;  %v394_v52 = vpop.f32.mrf.mxu3 }
  0xb6   : > { %v354_v53 = vpop.f32.mrf.mxu0  ;;  %v441_v54 = vmul.f32 %v431_v38, %v394_v52  ;;  %v368_v56 = vpop.f32.mrf.mxu1  ;;  %v460_v57 = vadd.f32 %v451_v39, %v440_v51 }
  0xb7   : > { %v442_v55 = vmul.f32 %v436_v48, %v354_v53  ;;  %478 = vst [vmem:[%s844_s29] sm:$0xff] %v474_v50  ;;  %v443_v59 = vmul.f32 %v436_v48, %v368_v56 }
  0xb8   : > { %v461_v60 = vadd.f32 %v451_v39, %v441_v54  ;;  %v468_v62 = vmax.f32 %v460_v57, 0.0 }
  0xb9   : > { %v462_v61 = vadd.f32 %v456_v58, %v442_v55  ;;  %v463_v63 = vadd.f32 %v456_v58, %v443_v59 }
  0xba   : > { %v469_v0 = vmax.f32 %v461_v60, 0.0 }
  0xbb   : > { %v470_v1 = vmax.f32 %v462_v61, 0.0  ;;  %v471_v2 = vmax.f32 %v463_v63, 0.0  ;;  %v382_v4 = vpop.f32.mrf.mxu2 }
  0xbc   : > { %v475_v3 = vpack.c.bf16 %v469_v0, %v468_v62  ;;  %v444_v6 = vmul.f32 %v436_v48, %v382_v4 }
  0xbd   : > { %v476_v5 = vpack.c.bf16 %v471_v2, %v470_v1  ;;  %v396_v7 = vpop.f32.mrf.mxu3 }
  0xbe   : > { %479 = vst [vmem:[%s844_s29 + $0x8] sm:$0xff] %v475_v3  ;;  %v445_v8 = vmul.f32 %v436_v48, %v396_v7  ;;  %v464_v9 = vadd.f32 %v456_v58, %v444_v6  ;;  %v504_v14 = vld [vmem:[%s844_s29] sm:$0xff] (%p809_p6) }
  0xbf   : > { %480 = vst [vmem:[%s844_s29 + $0x10] sm:$0xff] %v476_v5 }
  0xc0   : > { %v465_v10 = vadd.f32 %v456_v58, %v445_v8  ;;  %v472_v11 = vmax.f32 %v464_v9, 0.0  ;;  %505 = vst [vmem:[%s491_s6] sm:$0xff] (%p809_p6), %v504_v14 }
  0xc2   : > { %v473_v12 = vmax.f32 %v465_v10, 0.0  ;;  %488 = sbr.rel (!%p809_p6) target bundleno = 207 (0xcf), region = 71 }
  0xc4   : > { %v477_v13 = vpack.c.bf16 %v473_v12, %v472_v11 }
  0xc5   : > { %v506_v15 = vld [vmem:[%s844_s29 + $0x8] sm:$0xff] (%p809_p6) }
  0xc6   : > { %481 = vst [vmem:[%s844_s29 + $0x18] sm:$0xff] %v477_v13  ;;  %v508_v16 = vld [vmem:[%s844_s29 + $0x10] sm:$0xff] (%p809_p6) }
  0xc7   : > { %507 = vst [vmem:[%s491_s6 + $0x8] sm:$0xff] %v506_v15 }
  0xc8   : > { %509 = vst [vmem:[%s491_s6 + $0x100] sm:$0xff] %v508_v16 }
  0xcd   : > { %v510_v17 = vld [vmem:[%s844_s29 + $0x18] sm:$0xff] }
  0xce   : > { %511 = vst [vmem:[%s491_s6 + $0x108] sm:$0xff] %v510_v17 }
  0xcf PF: > { %s14_s19 = sadd.s32 1, %s746_s19   ;;  %s881_s15 = smov %s734_s16 }
  0xd0   : > { %p11_p11 = scmp.ge.s32.totalorder %s14_s19, 18   ;;  %s882_s16 = smov %s814_s25 }
  0xd1   : > { %s883_s17 = smov %s742_s18  ;;  %s884_s18 = smov %s886_s20 }
  0xd2   :  { %13 = sbr.rel (!%p11_p11) target bundleno = 3 (0x3), region = 128 }

// kernel: daft_forward.16
= control target key start
LH: loop header
LB: loop body
LE: loop exit
PB: predicated region body
PF: predicated region fallthrough
CT: control target
= control target key end

     0   :  { %s470_s0 = inlined_call_operand.vmem [shape: bf16[64,512], index: 0, kind: input, shape index: {}]   ;;  %s471_s1 = inlined_call_operand.vmem [shape: bf16[64,512], index: 1, kind: input, shape index: {}]   ;;  %s472_s2 = inlined_call_operand.vmem [shape: bf16[64,512], index: 2, kind: input, shape index: {}]   ;;  %s473_s3 = inlined_call_operand.vmem [shape: bf16[64,512], index: 3, kind: output, shape index: {}]  }
   0x1   :  { %v14_v0 = vld [vmem:[%s470_s0] sm:$0xff]  ;;  %v15_v7 = vld [vmem:[%s470_s0 + $0x8] sm:$0xff]  ;;  %v16_v14 = vld [vmem:[%s470_s0 + $0x10] sm:$0xff] }
   0x2   :  { %v62_v1 = vld [vmem:[%s471_s1] sm:$0xff]  ;;  %v30_v3 = vunpack.c.l.bf16 %v14_v0  ;;  %v31_v4 = vunpack.c.h.bf16 %v14_v0  ;;  %v63_v8 = vld [vmem:[%s471_s1 + $0x8] sm:$0xff]  ;;  %v32_v12 = vunpack.c.l.bf16 %v15_v7  ;;  %v33_v13 = vunpack.c.h.bf16 %v15_v7  ;;  %v64_v19 = vld [vmem:[%s471_s1 + $0x10] sm:$0xff] }
   0x3   :  { %v110_v2 = vld [vmem:[%s472_s2] sm:$0xff]  ;;  %v78_v5 = vunpack.c.l.bf16 %v62_v1  ;;  %v79_v6 = vunpack.c.h.bf16 %v62_v1  ;;  %v111_v9 = vld [vmem:[%s472_s2 + $0x8] sm:$0xff]  ;;  %v80_v17 = vunpack.c.l.bf16 %v63_v8  ;;  %v81_v18 = vunpack.c.h.bf16 %v63_v8  ;;  %v112_v20 = vld [vmem:[%s472_s2 + $0x10] sm:$0xff] }
   0x4   :  { %v126_v10 = vunpack.c.l.bf16 %v110_v2  ;;  %v127_v11 = vunpack.c.h.bf16 %v110_v2  ;;  %v128_v21 = vunpack.c.l.bf16 %v111_v9  ;;  %v129_v22 = vunpack.c.h.bf16 %v111_v9  ;;  %v17_v25 = vld [vmem:[%s470_s0 + $0x18] sm:$0xff]  ;;  %v18_v40 = vld [vmem:[%s470_s0 + $0x20] sm:$0xff]  ;;  %v19_v55 = vld [vmem:[%s470_s0 + $0x28] sm:$0xff] }
   0x5   :  { %v158_v15 = vmax.f32 %v30_v3, %v78_v5  ;;  %v159_v16 = vmax.f32 %v31_v4, %v79_v6  ;;  %v34_v23 = vunpack.c.l.bf16 %v16_v14  ;;  %v35_v24 = vunpack.c.h.bf16 %v16_v14  ;;  %v65_v30 = vld [vmem:[%s471_s1 + $0x18] sm:$0xff]  ;;  %v66_v45 = vld [vmem:[%s471_s1 + $0x20] sm:$0xff]  ;;  %v67_v60 = vld [vmem:[%s471_s1 + $0x28] sm:$0xff] }
   0x6   :  { %v160_v28 = vmax.f32 %v32_v12, %v80_v17  ;;  %v161_v29 = vmax.f32 %v33_v13, %v81_v18  ;;  %v82_v31 = vunpack.c.l.bf16 %v64_v19  ;;  %v83_v32 = vunpack.c.h.bf16 %v64_v19  ;;  %v113_v35 = vld [vmem:[%s472_s2 + $0x18] sm:$0xff]  ;;  %v114_v50 = vld [vmem:[%s472_s2 + $0x20] sm:$0xff]  ;;  %v115_v61 = vld [vmem:[%s472_s2 + $0x28] sm:$0xff] }
   0x7   :  { %v190_v26 = vmax.f32 %v158_v15, %v126_v10  ;;  %v191_v27 = vmax.f32 %v159_v16, %v127_v11  ;;  %v130_v33 = vunpack.c.l.bf16 %v112_v20  ;;  %v131_v34 = vunpack.c.h.bf16 %v112_v20  ;;  %v20_v6 = vld [vmem:[%s470_s0 + $0x30] sm:$0xff]  ;;  %v21_v17 = vld [vmem:[%s470_s0 + $0x38] sm:$0xff] }
   0x8   :  { %v192_v37 = vmax.f32 %v160_v28, %v128_v21  ;;  %v193_v38 = vmax.f32 %v161_v29, %v129_v22  ;;  %v36_v39 = vunpack.c.l.bf16 %v17_v25  ;;  %v162_v41 = vmax.f32 %v34_v23, %v82_v31  ;;  %v68_v11 = vld [vmem:[%s471_s1 + $0x30] sm:$0xff]  ;;  %v69_v22 = vld [vmem:[%s471_s1 + $0x38] sm:$0xff] }
   0x9   :  { %v222_v36 = vpack.c.bf16 %v191_v27, %v190_v26  ;;  %v163_v42 = vmax.f32 %v35_v24, %v83_v32  ;;  %v37_v43 = vunpack.c.h.bf16 %v17_v25  ;;  %v84_v44 = vunpack.c.l.bf16 %v65_v30  ;;  %v116_v12 = vld [vmem:[%s472_s2 + $0x30] sm:$0xff]  ;;  %v117_v27 = vld [vmem:[%s472_s2 + $0x38] sm:$0xff]  ;;  %v22_v32 = vld [vmem:[%s470_s0 + $0x40] sm:$0xff] }
   0xa   :  { %v223_v46 = vpack.c.bf16 %v193_v38, %v192_v37  ;;  %v85_v47 = vunpack.c.h.bf16 %v65_v30  ;;  %v132_v48 = vunpack.c.l.bf16 %v113_v35  ;;  %v133_v49 = vunpack.c.h.bf16 %v113_v35  ;;  %v70_v37 = vld [vmem:[%s471_s1 + $0x40] sm:$0xff] }
   0xb   :  { %238 = vst [vmem:[%s473_s3] sm:$0xff] %v222_v36  ;;  %v194_v51 = vmax.f32 %v162_v41, %v130_v33  ;;  %v195_v52 = vmax.f32 %v163_v42, %v131_v34  ;;  %v164_v53 = vmax.f32 %v36_v39, %v84_v44  ;;  %v38_v54 = vunpack.c.l.bf16 %v18_v40  ;;  %v118_v42 = vld [vmem:[%s472_s2 + $0x40] sm:$0xff] }
   0xc   :  { %239 = vst [vmem:[%s473_s3 + $0x8] sm:$0xff] %v223_v46  ;;  %v165_v56 = vmax.f32 %v37_v43, %v85_v47  ;;  %v39_v57 = vunpack.c.h.bf16 %v18_v40  ;;  %v86_v58 = vunpack.c.l.bf16 %v66_v45  ;;  %v87_v59 = vunpack.c.h.bf16 %v66_v45  ;;  %v23_v47 = vld [vmem:[%s470_s0 + $0x48] sm:$0xff] }
   0xd   :  { %v224_v62 = vpack.c.bf16 %v195_v52, %v194_v51  ;;  %v196_v63 = vmax.f32 %v164_v53, %v132_v48  ;;  %v134_v0 = vunpack.c.l.bf16 %v114_v50  ;;  %v135_v1 = vunpack.c.h.bf16 %v114_v50  ;;  %v71_v52 = vld [vmem:[%s471_s1 + $0x48] sm:$0xff] }
   0xe   :  { %v197_v2 = vmax.f32 %v165_v56, %v133_v49  ;;  %v166_v3 = vmax.f32 %v38_v54, %v86_v58  ;;  %v167_v4 = vmax.f32 %v39_v57, %v87_v59  ;;  %v40_v5 = vunpack.c.l.bf16 %v19_v55  ;;  %v119_v53 = vld [vmem:[%s472_s2 + $0x48] sm:$0xff] }
   0xf   :  { %240 = vst [vmem:[%s473_s3 + $0x10] sm:$0xff] %v224_v62  ;;  %v41_v7 = vunpack.c.h.bf16 %v19_v55  ;;  %v88_v8 = vunpack.c.l.bf16 %v67_v60  ;;  %v89_v9 = vunpack.c.h.bf16 %v67_v60  ;;  %v136_v10 = vunpack.c.l.bf16 %v115_v61  ;;  %v24_v62 = vld [vmem:[%s470_s0 + $0x50] sm:$0xff] }
  0x10   :  { %v225_v13 = vpack.c.bf16 %v197_v2, %v196_v63  ;;  %v198_v14 = vmax.f32 %v166_v3, %v134_v0  ;;  %v199_v15 = vmax.f32 %v167_v4, %v135_v1  ;;  %v137_v16 = vunpack.c.h.bf16 %v115_v61  ;;  %v72_v3 = vld [vmem:[%s471_s1 + $0x50] sm:$0xff] }
  0x11   :  { %v168_v18 = vmax.f32 %v40_v5, %v88_v8  ;;  %v169_v19 = vmax.f32 %v41_v7, %v89_v9  ;;  %v42_v20 = vunpack.c.l.bf16 %v20_v6  ;;  %v43_v21 = vunpack.c.h.bf16 %v20_v6  ;;  %v120_v4 = vld [vmem:[%s472_s2 + $0x50] sm:$0xff]  ;;  %v25_v9 = vld [vmem:[%s470_s0 + $0x58] sm:$0xff] }
  0x12   :  { %241 = vst [vmem:[%s473_s3 + $0x18] sm:$0xff] %v225_v13  ;;  %v226_v23 = vpack.c.bf16 %v199_v15, %v198_v14  ;;  %v90_v24 = vunpack.c.l.bf16 %v68_v11  ;;  %v91_v25 = vunpack.c.h.bf16 %v68_v11  ;;  %v138_v26 = vunpack.c.l.bf16 %v116_v12  ;;  %v73_v14 = vld [vmem:[%s471_s1 + $0x58] sm:$0xff] }
  0x13   :  { %v200_v28 = vmax.f32 %v168_v18, %v136_v10  ;;  %v201_v29 = vmax.f32 %v169_v19, %v137_v16  ;;  %v139_v30 = vunpack.c.h.bf16 %v116_v12  ;;  %v44_v31 = vunpack.c.l.bf16 %v21_v17  ;;  %v121_v19 = vld [vmem:[%s472_s2 + $0x58] sm:$0xff] }
  0x14   :  { %242 = vst [vmem:[%s473_s3 + $0x20] sm:$0xff] %v226_v23  ;;  %v170_v33 = vmax.f32 %v42_v20, %v90_v24  ;;  %v171_v34 = vmax.f32 %v43_v21, %v91_v25  ;;  %v45_v35 = vunpack.c.h.bf16 %v21_v17  ;;  %v92_v36 = vunpack.c.l.bf16 %v69_v22  ;;  %v26_v24 = vld [vmem:[%s470_s0 + $0x60] sm:$0xff] }
  0x15   :  { %v227_v38 = vpack.c.bf16 %v201_v29, %v200_v28  ;;  %v93_v39 = vunpack.c.h.bf16 %v69_v22  ;;  %v140_v40 = vunpack.c.l.bf16 %v117_v27  ;;  %v141_v41 = vunpack.c.h.bf16 %v117_v27  ;;  %v74_v29 = vld [vmem:[%s471_s1 + $0x60] sm:$0xff] }
  0x16   :  { %v202_v43 = vmax.f32 %v170_v33, %v138_v26  ;;  %v203_v44 = vmax.f32 %v171_v34, %v139_v30  ;;  %v172_v45 = vmax.f32 %v44_v31, %v92_v36  ;;  %v46_v46 = vunpack.c.l.bf16 %v22_v32  ;;  %v122_v34 = vld [vmem:[%s472_s2 + $0x60] sm:$0xff] }
  0x17   :  { %243 = vst [vmem:[%s473_s3 + $0x28] sm:$0xff] %v227_v38  ;;  %v173_v48 = vmax.f32 %v45_v35, %v93_v39  ;;  %v47_v49 = vunpack.c.h.bf16 %v22_v32  ;;  %v94_v50 = vunpack.c.l.bf16 %v70_v37  ;;  %v95_v51 = vunpack.c.h.bf16 %v70_v37  ;;  %v27_v39 = vld [vmem:[%s470_s0 + $0x68] sm:$0xff] }
  0x18   :  { %v228_v54 = vpack.c.bf16 %v203_v44, %v202_v43  ;;  %v204_v55 = vmax.f32 %v172_v45, %v140_v40  ;;  %v142_v56 = vunpack.c.l.bf16 %v118_v42  ;;  %v143_v57 = vunpack.c.h.bf16 %v118_v42  ;;  %v75_v44 = vld [vmem:[%s471_s1 + $0x68] sm:$0xff] }
  0x19   :  { %v205_v58 = vmax.f32 %v173_v48, %v141_v41  ;;  %v174_v59 = vmax.f32 %v46_v46, %v94_v50  ;;  %v175_v60 = vmax.f32 %v47_v49, %v95_v51  ;;  %v48_v61 = vunpack.c.l.bf16 %v23_v47  ;;  %v123_v45 = vld [vmem:[%s472_s2 + $0x68] sm:$0xff] }
  0x1a   :  { %244 = vst [vmem:[%s473_s3 + $0x30] sm:$0xff] %v228_v54  ;;  %v49_v63 = vunpack.c.h.bf16 %v23_v47  ;;  %v96_v0 = vunpack.c.l.bf16 %v71_v52  ;;  %v97_v1 = vunpack.c.h.bf16 %v71_v52  ;;  %v144_v2 = vunpack.c.l.bf16 %v119_v53  ;;  %v28_v54 = vld [vmem:[%s470_s0 + $0x70] sm:$0xff] }
  0x1b   :  { %v229_v5 = vpack.c.bf16 %v205_v58, %v204_v55  ;;  %v206_v6 = vmax.f32 %v174_v59, %v142_v56  ;;  %v207_v7 = vmax.f32 %v175_v60, %v143_v57  ;;  %v145_v8 = vunpack.c.h.bf16 %v119_v53  ;;  %v76_v59 = vld [vmem:[%s471_s1 + $0x70] sm:$0xff] }
  0x1c   :  { %v176_v10 = vmax.f32 %v48_v61, %v96_v0  ;;  %v177_v11 = vmax.f32 %v49_v63, %v97_v1  ;;  %v50_v12 = vunpack.c.l.bf16 %v24_v62  ;;  %v51_v13 = vunpack.c.h.bf16 %v24_v62  ;;  %v124_v60 = vld [vmem:[%s472_s2 + $0x70] sm:$0xff]  ;;  %v29_v1 = vld [vmem:[%s470_s0 + $0x78] sm:$0xff] }
  0x1d   :  { %245 = vst [vmem:[%s473_s3 + $0x38] sm:$0xff] %v229_v5  ;;  %v230_v15 = vpack.c.bf16 %v207_v7, %v206_v6  ;;  %v98_v16 = vunpack.c.l.bf16 %v72_v3  ;;  %v99_v17 = vunpack.c.h.bf16 %v72_v3  ;;  %v146_v18 = vunpack.c.l.bf16 %v120_v4  ;;  %v77_v6 = vld [vmem:[%s471_s1 + $0x78] sm:$0xff] }
  0x1e   :  { %v208_v20 = vmax.f32 %v176_v10, %v144_v2  ;;  %v209_v21 = vmax.f32 %v177_v11, %v145_v8  ;;  %v147_v22 = vunpack.c.h.bf16 %v120_v4  ;;  %v52_v23 = vunpack.c.l.bf16 %v25_v9  ;;  %v125_v11 = vld [vmem:[%s472_s2 + $0x78] sm:$0xff] }
  0x1f   :  { %246 = vst [vmem:[%s473_s3 + $0x40] sm:$0xff] %v230_v15  ;;  %v178_v25 = vmax.f32 %v50_v12, %v98_v16  ;;  %v179_v26 = vmax.f32 %v51_v13, %v99_v17  ;;  %v53_v27 = vunpack.c.h.bf16 %v25_v9  ;;  %v100_v28 = vunpack.c.l.bf16 %v73_v14 }
  0x20   :  { %v231_v30 = vpack.c.bf16 %v209_v21, %v208_v20  ;;  %v101_v31 = vunpack.c.h.bf16 %v73_v14  ;;  %v148_v32 = vunpack.c.l.bf16 %v121_v19  ;;  %v149_v33 = vunpack.c.h.bf16 %v121_v19 }
  0x21   :  { %v210_v35 = vmax.f32 %v178_v25, %v146_v18  ;;  %v211_v36 = vmax.f32 %v179_v26, %v147_v22  ;;  %v180_v37 = vmax.f32 %v52_v23, %v100_v28  ;;  %v54_v38 = vunpack.c.l.bf16 %v26_v24 }
  0x22   :  { %247 = vst [vmem:[%s473_s3 + $0x48] sm:$0xff] %v231_v30  ;;  %v181_v40 = vmax.f32 %v53_v27, %v101_v31  ;;  %v55_v41 = vunpack.c.h.bf16 %v26_v24  ;;  %v102_v42 = vunpack.c.l.bf16 %v74_v29  ;;  %v103_v43 = vunpack.c.h.bf16 %v74_v29 }
  0x23   :  { %v232_v46 = vpack.c.bf16 %v211_v36, %v210_v35  ;;  %v212_v47 = vmax.f32 %v180_v37, %v148_v32  ;;  %v150_v48 = vunpack.c.l.bf16 %v122_v34  ;;  %v151_v49 = vunpack.c.h.bf16 %v122_v34 }
  0x24   :  { %v213_v50 = vmax.f32 %v181_v40, %v149_v33  ;;  %v182_v51 = vmax.f32 %v54_v38, %v102_v42  ;;  %v183_v52 = vmax.f32 %v55_v41, %v103_v43  ;;  %v56_v53 = vunpack.c.l.bf16 %v27_v39 }
  0x25   :  { %248 = vst [vmem:[%s473_s3 + $0x50] sm:$0xff] %v232_v46  ;;  %v57_v55 = vunpack.c.h.bf16 %v27_v39  ;;  %v104_v56 = vunpack.c.l.bf16 %v75_v44  ;;  %v105_v57 = vunpack.c.h.bf16 %v75_v44  ;;  %v152_v58 = vunpack.c.l.bf16 %v123_v45 }
  0x26   :  { %v233_v61 = vpack.c.bf16 %v213_v50, %v212_v47  ;;  %v214_v62 = vmax.f32 %v182_v51, %v150_v48  ;;  %v215_v63 = vmax.f32 %v183_v52, %v151_v49  ;;  %v153_v0 = vunpack.c.h.bf16 %v123_v45 }
  0x27   :  { %v184_v2 = vmax.f32 %v56_v53, %v104_v56  ;;  %v185_v3 = vmax.f32 %v57_v55, %v105_v57  ;;  %v58_v4 = vunpack.c.l.bf16 %v28_v54  ;;  %v59_v5 = vunpack.c.h.bf16 %v28_v54 }
  0x28   :  { %249 = vst [vmem:[%s473_s3 + $0x58] sm:$0xff] %v233_v61  ;;  %v234_v7 = vpack.c.bf16 %v215_v63, %v214_v62  ;;  %v106_v8 = vunpack.c.l.bf16 %v76_v59  ;;  %v107_v9 = vunpack.c.h.bf16 %v76_v59  ;;  %v154_v10 = vunpack.c.l.bf16 %v124_v60 }
  0x29   :  { %v216_v12 = vmax.f32 %v184_v2, %v152_v58  ;;  %v217_v13 = vmax.f32 %v185_v3, %v153_v0  ;;  %v155_v14 = vunpack.c.h.bf16 %v124_v60  ;;  %v60_v15 = vunpack.c.l.bf16 %v29_v1 }
  0x2a   :  { %250 = vst [vmem:[%s473_s3 + $0x60] sm:$0xff] %v234_v7  ;;  %v186_v16 = vmax.f32 %v58_v4, %v106_v8  ;;  %v187_v17 = vmax.f32 %v59_v5, %v107_v9  ;;  %v61_v18 = vunpack.c.h.bf16 %v29_v1  ;;  %v108_v19 = vunpack.c.l.bf16 %v77_v6 }
  0x2b   :  { %v235_v20 = vpack.c.bf16 %v217_v13, %v216_v12  ;;  %v109_v21 = vunpack.c.h.bf16 %v77_v6  ;;  %v156_v22 = vunpack.c.l.bf16 %v125_v11  ;;  %v157_v23 = vunpack.c.h.bf16 %v125_v11 }
  0x2c   :  { %v218_v24 = vmax.f32 %v186_v16, %v154_v10  ;;  %v219_v25 = vmax.f32 %v187_v17, %v155_v14  ;;  %v188_v26 = vmax.f32 %v60_v15, %v108_v19 }
  0x2d   :  { %251 = vst [vmem:[%s473_s3 + $0x68] sm:$0xff] %v235_v20  ;;  %v189_v27 = vmax.f32 %v61_v18, %v109_v21 }
  0x2e   :  { %v236_v28 = vpack.c.bf16 %v219_v25, %v218_v24  ;;  %v220_v29 = vmax.f32 %v188_v26, %v156_v22 }
  0x2f   :  { %v221_v30 = vmax.f32 %v189_v27, %v157_v23 }
  0x30   :  { %252 = vst [vmem:[%s473_s3 + $0x70] sm:$0xff] %v236_v28 }
  0x31   :  { %v237_v31 = vpack.c.bf16 %v221_v30, %v220_v29 }
  0x33   :  { %253 = vst [vmem:[%s473_s3 + $0x78] sm:$0xff] %v237_v31 }

// kernel: daft_forward.19
= control target key start
LH: loop header
LB: loop body
LE: loop exit
PB: predicated region body
PF: predicated region fallthrough
CT: control target
= control target key end

     0   :  { %s1034_s15 = smov 0   ;;  %s1036_s16 = smov 0   ;;  %s1253_s0 = inlined_call_operand.vmem [shape: bf16[16,112], index: 0, kind: input, shape index: {}]   ;;  %s1254_s1 = inlined_call_operand.vmem [shape: bf16[112,1024], index: 1, kind: input, shape index: {}]   ;;  %s1255_s2 = inlined_call_operand.vmem [shape: f32[16,1], index: 2, kind: input, shape index: {}]   ;;  %s1256_s3 = inlined_call_operand.vmem [shape: f32[16,1], index: 3, kind: input, shape index: {}]   ;;  %s1257_s4 = inlined_call_operand.vmem [shape: bf16[16,1024], index: 4, kind: output, shape index: {}]  }
   0x1   :  { %s1038_s17 = smov 0   ;;  %s1040_s18 = smov 0  }
   0x2   :  { %s1042_s19 = smov 0  }
   0x3 LB: > { %s26_s20 = sadd.s32 1, %s1002_s18  ;;  %s758_s21 = sadd.s32 4294967295, %s1006_s19   ;;  %s1006_s19 = sphi %s1042_s19, %s14_s19   ;;  %s1002_s18 = sphi %s1040_s18, %s1262_s18   ;;  %s998_s17 = sphi %s1038_s17, %s1261_s17   ;;  %s994_s16 = sphi %s1036_s16, %s1260_s16   ;;  %s990_s15 = sphi %s1034_s15, %s1259_s15  }
   0x4   : > { %p28_p0 = scmp.ge.s32.totalorder %s26_s20, 2  ;;  %p68_p1 = scmp.ne.s32.totalorder %s994_s16, %s990_s15 }
   0x5   : > { %p69_p2 = scmp.eq.s32.totalorder %s1006_s19, 0  ;;  %p140_p4 = scmp.eq.s32.totalorder %s758_s21, 1 }
   0x6   : > { %s1264_s20 = smov (%p28_p0, %s26_s20), 0  ;;  %s61_s23 = sadd.s32 1, %s994_s16 }
   0x7   : > { %p70_p3 = por %p69_p2, %p68_p1  ;;  %s57_s22 = ssub.s32 %s1002_s18, %s1264_s20 }
   0x8   : > { %p59_p5 = scmp.eq.s32.totalorder %s57_s22, 0  ;;  %p1069_p6 = por %p140_p4, %p68_p1 }
   0x9   : > { %p762_p7 = scmp.ge.s32.totalorder %s1006_s19, 2 }
   0xa   : > { %s1074_s25 = scalar_select %p59_p5, %s994_s16, %s61_s23  }
   0xb   : > { %175 = sbr.rel (%p762_p7) target bundleno = 48 (0x30), region = 28 }
  0x10   : > { %178 = sbr.rel (!%p70_p3) target bundleno = 48 (0x30), region = 32  ;;  %s180_s26 = sand.u32 (%p70_p3), 1, %s994_s16  }
  0x11   : > { %s892_s27 = sshll.u32 (%p70_p3), %s1002_s18, 4  ;;  %s923_s28 = smul.u32 (%p70_p3), 224, %s180_s26 }
  0x12   : > { %s1082_s5 = scalar_lea.vmem (%p70_p3), %s1254_s1, %s892_s27 }
  0x13   : > { %v201_v0 = vld [vmem:[%s1082_s5] sm:$0xff] (%p70_p3)  ;;  %v203_v1 = vld [vmem:[%s1082_s5 + $0x8] sm:$0xff] (%p70_p3)  ;;  %s1087_s6 = scalar_lea.vmem (%p70_p3), [#allocation3], %s923_s28 }
  0x14   : > { %v205_v2 = vld [vmem:[%s1082_s5 + $0x20] sm:$0xff] (%p70_p3)  ;;  %202 = vst [vmem:[%s1087_s6] sm:$0xff] (%p70_p3), %v201_v0  ;;  %v207_v3 = vld [vmem:[%s1082_s5 + $0x28] sm:$0xff] (%p70_p3) }
  0x15   : > { %204 = vst [vmem:[%s1087_s6 + $0x8] sm:$0xff] %v203_v1  ;;  %v209_v4 = vld [vmem:[%s1082_s5 + $0x40] sm:$0xff]  ;;  %v211_v5 = vld [vmem:[%s1082_s5 + $0x48] sm:$0xff] }
  0x16   : > { %206 = vst [vmem:[%s1087_s6 + $0x10] sm:$0xff] %v205_v2  ;;  %v213_v6 = vld [vmem:[%s1082_s5 + $0x60] sm:$0xff]  ;;  %v215_v7 = vld [vmem:[%s1082_s5 + $0x68] sm:$0xff] }
  0x17   : > { %208 = vst [vmem:[%s1087_s6 + $0x18] sm:$0xff] %v207_v3  ;;  %v217_v8 = vld [vmem:[%s1082_s5 + $0x80] sm:$0xff]  ;;  %v219_v9 = vld [vmem:[%s1082_s5 + $0x88] sm:$0xff] }
  0x18   : > { %210 = vst [vmem:[%s1087_s6 + $0x20] sm:$0xff] %v209_v4  ;;  %v221_v10 = vld [vmem:[%s1082_s5 + $0xa0] sm:$0xff]  ;;  %v223_v11 = vld [vmem:[%s1082_s5 + $0xa8] sm:$0xff] }
  0x19   : > { %212 = vst [vmem:[%s1087_s6 + $0x28] sm:$0xff] %v211_v5  ;;  %v225_v12 = vld [vmem:[%s1082_s5 + $0xc0] sm:$0xff]  ;;  %v227_v13 = vld [vmem:[%s1082_s5 + $0xc8] sm:$0xff] }
  0x1a   : > { %214 = vst [vmem:[%s1087_s6 + $0x30] sm:$0xff] %v213_v6  ;;  %v229_v14 = vld [vmem:[%s1082_s5 + $0xe0] sm:$0xff]  ;;  %v231_v15 = vld [vmem:[%s1082_s5 + $0xe8] sm:$0xff] }
  0x1b   : > { %216 = vst [vmem:[%s1087_s6 + $0x38] sm:$0xff] %v215_v7  ;;  %v233_v16 = vld [vmem:[%s1082_s5 + $0x100] sm:$0xff]  ;;  %v235_v17 = vld [vmem:[%s1082_s5 + $0x108] sm:$0xff] }
  0x1c   : > { %218 = vst [vmem:[%s1087_s6 + $0x40] sm:$0xff] %v217_v8  ;;  %v237_v18 = vld [vmem:[%s1082_s5 + $0x120] sm:$0xff]  ;;  %v239_v19 = vld [vmem:[%s1082_s5 + $0x128] sm:$0xff] }
  0x1d   : > { %220 = vst [vmem:[%s1087_s6 + $0x48] sm:$0xff] %v219_v9  ;;  %v241_v20 = vld [vmem:[%s1082_s5 + $0x140] sm:$0xff]  ;;  %v243_v21 = vld [vmem:[%s1082_s5 + $0x148] sm:$0xff] }
  0x1e   : > { %222 = vst [vmem:[%s1087_s6 + $0x50] sm:$0xff] %v221_v10  ;;  %v245_v22 = vld [vmem:[%s1082_s5 + $0x160] sm:$0xff]  ;;  %v247_v23 = vld [vmem:[%s1082_s5 + $0x168] sm:$0xff] }
  0x1f   : > { %224 = vst [vmem:[%s1087_s6 + $0x58] sm:$0xff] %v223_v11  ;;  %v249_v24 = vld [vmem:[%s1082_s5 + $0x180] sm:$0xff]  ;;  %v251_v25 = vld [vmem:[%s1082_s5 + $0x188] sm:$0xff] }
  0x20   : > { %226 = vst [vmem:[%s1087_s6 + $0x60] sm:$0xff] %v225_v12  ;;  %v253_v26 = vld [vmem:[%s1082_s5 + $0x1a0] sm:$0xff]  ;;  %v255_v27 = vld [vmem:[%s1082_s5 + $0x1a8] sm:$0xff] }
  0x21   : > { %228 = vst [vmem:[%s1087_s6 + $0x68] sm:$0xff] %v227_v13 }
  0x22   : > { %230 = vst [vmem:[%s1087_s6 + $0x70] sm:$0xff] %v229_v14 }
  0x23   : > { %232 = vst [vmem:[%s1087_s6 + $0x78] sm:$0xff] %v231_v15 }
  0x24   : > { %234 = vst [vmem:[%s1087_s6 + $0x80] sm:$0xff] %v233_v16 }
  0x25   : > { %236 = vst [vmem:[%s1087_s6 + $0x88] sm:$0xff] %v235_v17 }
  0x26   : > { %238 = vst [vmem:[%s1087_s6 + $0x90] sm:$0xff] %v237_v18 }
  0x27   : > { %240 = vst [vmem:[%s1087_s6 + $0x98] sm:$0xff] %v239_v19 }
  0x28   : > { %242 = vst [vmem:[%s1087_s6 + $0xa0] sm:$0xff] %v241_v20 }
  0x29   : > { %244 = vst [vmem:[%s1087_s6 + $0xa8] sm:$0xff] %v243_v21 }
  0x2a   : > { %246 = vst [vmem:[%s1087_s6 + $0xb0] sm:$0xff] %v245_v22 }
  0x2b   : > { %248 = vst [vmem:[%s1087_s6 + $0xb8] sm:$0xff] %v247_v23 }
  0x2c   : > { %250 = vst [vmem:[%s1087_s6 + $0xc0] sm:$0xff] %v249_v24 }
  0x2d   : > { %252 = vst [vmem:[%s1087_s6 + $0xc8] sm:$0xff] %v251_v25 }
  0x2e   : > { %254 = vst [vmem:[%s1087_s6 + $0xd0] sm:$0xff] %v253_v26 }
  0x2f   : > { %256 = vst [vmem:[%s1087_s6 + $0xd8] sm:$0xff] %v255_v27 }
  0x30 PF: > { %p765_p8 = scmp.ge.s32.totalorder %s1006_s19, 1  ;;  %p261_p9 = scmp.lt.s32.totalorder %s1006_s19, 3 }
  0x32   : > { %p262_p10 = pnand %p765_p8, %p261_p9 }
  0x33   : > { %s268_s7 = sand.u32 (!%p262_p10), 1, %s990_s15  }
  0x34   : > { %265 = sbr.rel (%p262_p10) target bundleno = 246 (0xf6), region = 55  ;;  %s766_s28 = sshll.u32 (!%p262_p10), %s268_s7, 5 }
  0x35   : > { %s924_s8 = smul.u32 (!%p262_p10), 224, %s268_s7  ;;  %s1222_s29 = scalar_lea.vmem (!%p262_p10), [#allocation4], %s766_s28 }
  0x37   : > { %s1147_s9 = scalar_lea.vmem (!%p262_p10), [#allocation3], %s924_s8 }
  0x39   : > { %v869_v28 = vld [vmem:[%s1147_s9 + $0xc0] sm:$0xf]  ;;  %v920_v29 = vld [vmem:[%s1147_s9 + $0xcc] sm:$0xf0]  ;;  %v918_v30 = vld [vmem:[%s1147_s9 + $0xc4] sm:$0xf] }
  0x3a   : > { %v870_v31 = vor.u32 %v920_v29, %v869_v28  ;;  %v871_v32 = vld [vmem:[%s1147_s9 + $0xd0] sm:$0xf0]  ;;  %v877_v33 = vld [vmem:[%s1147_s9 + $0xc8] sm:$0xf]  ;;  %v921_v34 = vld [vmem:[%s1147_s9 + $0xd4] sm:$0xf0] }
  0x3b   : > { %v874_v35 = vor.u32 %v918_v30, %v871_v32  ;;  %v878_v36 = vor.u32 %v921_v34, %v877_v33  ;;  %v919_v37 = vld [vmem:[%s1147_s9 + $0xcc] sm:$0xf]  ;;  %v879_v38 = vld [vmem:[%s1147_s9 + $0xd8] sm:$0xf0]  ;;  %v853_v39 = vld [vmem:[%s1147_s9 + $0xa0] sm:$0xf] }
  0x3c   : > { %504 = vmatpush.bf16.msra.mxu0 %v870_v31  ;;  %v882_v40 = vor.u32 %v919_v37, %v879_v38  ;;  %v916_v41 = vld [vmem:[%s1147_s9 + $0xac] sm:$0xf0]  ;;  %v914_v42 = vld [vmem:[%s1147_s9 + $0xa4] sm:$0xf]  ;;  %v855_v43 = vld [vmem:[%s1147_s9 + $0xb0] sm:$0xf0] }
  0x3d   : > { %518 = vmatpush.bf16.msra.mxu1 %v874_v35  ;;  %532 = vmatpush.bf16.msra.mxu2 %v878_v36  ;;  %v854_v44 = vor.u32 %v916_v41, %v853_v39  ;;  %v858_v45 = vor.u32 %v914_v42, %v855_v43  ;;  %v861_v46 = vld [vmem:[%s1147_s9 + $0xa8] sm:$0xf]  ;;  %v917_v47 = vld [vmem:[%s1147_s9 + $0xb4] sm:$0xf0]  ;;  %v915_v48 = vld [vmem:[%s1147_s9 + $0xac] sm:$0xf] }
  0x3e   : > { %546 = vmatpush.bf16.msra.mxu3 %v882_v40  ;;  %v862_v49 = vor.u32 %v917_v47, %v861_v46  ;;  %v863_v50 = vld [vmem:[%s1147_s9 + $0xb8] sm:$0xf0]  ;;  %v837_v51 = vld [vmem:[%s1147_s9 + $0x80] sm:$0xf]  ;;  %v912_v52 = vld [vmem:[%s1147_s9 + $0x8c] sm:$0xf0] }
  0x3f   : > { %v866_v53 = vor.u32 %v915_v48, %v863_v50  ;;  %v910_v54 = vld [vmem:[%s1147_s9 + $0x84] sm:$0xf]  ;;  %v839_v55 = vld [vmem:[%s1147_s9 + $0x90] sm:$0xf0]  ;;  %v845_v56 = vld [vmem:[%s1147_s9 + $0x88] sm:$0xf]  ;;  %v838_v57 = vor.u32 %v912_v52, %v837_v51 }
  0x40   : > { %505 = vmatpush.bf16.msra.mxu0 %v854_v44  ;;  %v913_v58 = vld [vmem:[%s1147_s9 + $0x94] sm:$0xf0]  ;;  %v911_v59 = vld [vmem:[%s1147_s9 + $0x8c] sm:$0xf]  ;;  %v847_v60 = vld [vmem:[%s1147_s9 + $0x98] sm:$0xf0]  ;;  %v842_v61 = vor.u32 %v910_v54, %v839_v55 }
  0x41   : > { %519 = vmatpush.bf16.msra.mxu1 %v858_v45  ;;  %533 = vmatpush.bf16.msra.mxu2 %v862_v49  ;;  %v846_v62 = vor.u32 %v913_v58, %v845_v56  ;;  %v821_v63 = vld [vmem:[%s1147_s9 + $0x60] sm:$0xf]  ;;  %v908_v0 = vld [vmem:[%s1147_s9 + $0x6c] sm:$0xf0]  ;;  %v906_v1 = vld [vmem:[%s1147_s9 + $0x64] sm:$0xf]  ;;  %v850_v2 = vor.u32 %v911_v59, %v847_v60 }
  0x42   : > { %547 = vmatpush.bf16.msra.mxu3 %v866_v53  ;;  %v823_v3 = vld [vmem:[%s1147_s9 + $0x70] sm:$0xf0]  ;;  %v829_v4 = vld [vmem:[%s1147_s9 + $0x68] sm:$0xf]  ;;  %v909_v5 = vld [vmem:[%s1147_s9 + $0x74] sm:$0xf0]  ;;  %v822_v8 = vor.u32 %v908_v0, %v821_v63 }
  0x43   : > { %v907_v6 = vld [vmem:[%s1147_s9 + $0x6c] sm:$0xf]  ;;  %v831_v7 = vld [vmem:[%s1147_s9 + $0x78] sm:$0xf0]  ;;  %v826_v9 = vor.u32 %v906_v1, %v823_v3  ;;  %v830_v10 = vor.u32 %v909_v5, %v829_v4  ;;  %v805_v11 = vld [vmem:[%s1147_s9 + $0x40] sm:$0xf] }
  0x44   : > { %506 = vmatpush.bf16.msra.mxu0 %v838_v57  ;;  %v904_v12 = vld [vmem:[%s1147_s9 + $0x4c] sm:$0xf0]  ;;  %v902_v13 = vld [vmem:[%s1147_s9 + $0x44] sm:$0xf]  ;;  %v834_v14 = vor.u32 %v907_v6, %v831_v7  ;;  %v807_v15 = vld [vmem:[%s1147_s9 + $0x50] sm:$0xf0] }
  0x45   : > { %520 = vmatpush.bf16.msra.mxu1 %v842_v61  ;;  %534 = vmatpush.bf16.msra.mxu2 %v846_v62  ;;  %v813_v16 = vld [vmem:[%s1147_s9 + $0x48] sm:$0xf]  ;;  %v905_v17 = vld [vmem:[%s1147_s9 + $0x54] sm:$0xf0]  ;;  %v903_v18 = vld [vmem:[%s1147_s9 + $0x4c] sm:$0xf]  ;;  %v806_v20 = vor.u32 %v904_v12, %v805_v11  ;;  %v810_v21 = vor.u32 %v902_v13, %v807_v15 }
  0x46   : > { %548 = vmatpush.bf16.msra.mxu3 %v850_v2  ;;  %v815_v19 = vld [vmem:[%s1147_s9 + $0x58] sm:$0xf0]  ;;  %v814_v22 = vor.u32 %v905_v17, %v813_v16  ;;  %v789_v23 = vld [vmem:[%s1147_s9 + $0x20] sm:$0xf]  ;;  %v900_v24 = vld [vmem:[%s1147_s9 + $0x2c] sm:$0xf0] }
  0x47   : > { %v898_v25 = vld [vmem:[%s1147_s9 + $0x24] sm:$0xf]  ;;  %v818_v26 = vor.u32 %v903_v18, %v815_v19  ;;  %v791_v27 = vld [vmem:[%s1147_s9 + $0x30] sm:$0xf0]  ;;  %v797_v28 = vld [vmem:[%s1147_s9 + $0x28] sm:$0xf]  ;;  %v790_v33 = vor.u32 %v900_v24, %v789_v23 }
  0x48   : > { %507 = vmatpush.bf16.msra.mxu0 %v822_v8  ;;  %v901_v29 = vld [vmem:[%s1147_s9 + $0x34] sm:$0xf0]  ;;  %v899_v30 = vld [vmem:[%s1147_s9 + $0x2c] sm:$0xf]  ;;  %v799_v31 = vld [vmem:[%s1147_s9 + $0x38] sm:$0xf0]  ;;  %v794_v36 = vor.u32 %v898_v25, %v791_v27 }
  0x49   : > { %521 = vmatpush.bf16.msra.mxu1 %v826_v9  ;;  %535 = vmatpush.bf16.msra.mxu2 %v830_v10  ;;  %v586_v32 = vld [vmem:[%s1255_s2] sm:$0xff]  ;;  %v1008_v35 = vmov 0   ;;  %v798_v37 = vor.u32 %v901_v29, %v797_v28  ;;  %v896_v38 = vld [vmem:[%s1147_s9 + $0xc] sm:$0xf0]  ;;  %v802_v41 = vor.u32 %v899_v30, %v799_v31  ;;  %v775_v42 = vld [vmem:[%s1147_s9 + $0x10] sm:$0xf0] }
  0x4a   : > { %549 = vmatpush.bf16.msra.mxu3 %v834_v14  ;;  %v773_v34 = vld [vmem:[%s1147_s9] sm:$0xf]  ;;  %966 = vset.pattern.permute.xlu0 %v1008_v35  ;;  %v894_v39 = vld [vmem:[%s1147_s9 + $0x4] sm:$0xf]  ;;  %v781_v43 = vld [vmem:[%s1147_s9 + $0x8] sm:$0xf] }
  0x4b   : > { %v606_v40 = vld [vmem:[%s1256_s3] sm:$0xff]  ;;  %v897_v44 = vld [vmem:[%s1147_s9 + $0x14] sm:$0xf0]  ;;  %590 = vperm.xlu0 %966, %v586_v32   ;;  %v895_v45 = vld [vmem:[%s1147_s9 + $0xc] sm:$0xf]  ;;  %967 = vset.pattern.permute.xlu1 %v1008_v35  ;;  %v774_v47 = vor.u32 %v896_v38, %v773_v34  ;;  %v778_v48 = vor.u32 %v894_v39, %v775_v42  ;;  %vm499_vm0 = vcmask 916480  }
  0x4c   : > { %508 = vmatpush.bf16.msra.mxu0 %v806_v20  ;;  %v783_v46 = vld [vmem:[%s1147_s9 + $0x18] sm:$0xf0]  ;;  %610 = vperm.xlu1 %967, %v606_v40   ;;  %v782_v49 = vor.u32 %v897_v44, %v781_v43  ;;  %v893_v51 = vld [vmem:[%s1253_s0] sm:$0xff]  ;;  %v587_v52 = vld [vmem:[%s1255_s2 + $0x8] sm:$0xff]  ;;  %s922_s15 = sshll.u32 (%p1069_p6), %s998_s17, 4 }
  0x4d   : > { %522 = vmatpush.bf16.msra.mxu1 %v810_v21  ;;  %536 = vmatpush.bf16.msra.mxu2 %v814_v22  ;;  %v786_v50 = vor.u32 %v895_v45, %v783_v46  ;;  %v607_v53 = vld [vmem:[%s1256_s3 + $0x8] sm:$0xff]  ;;  %s651_s6 = scalar_lea.vmem (%p1069_p6), %s1257_s4, %s922_s15 }
  0x4e   : > { %550 = vmatpush.bf16.msra.mxu3 %v818_v26 }
  0x50   : > { %509 = vmatpush.bf16.msra.mxu0 %v790_v33 }
  0x51   : > { %523 = vmatpush.bf16.msra.mxu1 %v794_v36  ;;  %537 = vmatpush.bf16.msra.mxu2 %v798_v37 }
  0x52   : > { %551 = vmatpush.bf16.msra.mxu3 %v802_v41 }
  0x53   : > { %595 = vperm.xlu0 %966, %v587_v52  }
  0x54   : > { %510 = vmatpush.bf16.msra.mxu0 %v774_v47  ;;  %615 = vperm.xlu1 %967, %v607_v53  }
  0x55   : > { %524 = vmatpush.bf16.msra.mxu1 %v778_v48  ;;  %538 = vmatpush.bf16.msra.mxu2 %v782_v49 }
  0x56   : > { %552 = vmatpush.bf16.msra.mxu3 %v786_v50 }
  0x57   : > { %883 = vmatmul.msk.bf16.vlgmr.msra.gmra.mxu0 %vm499_vm0, %v893_v51 }
  0x58   : > { %884 = vmatmul.msk.bf16.vlgmr.msra.gmra.mxu1 %vm499_vm0, %v893_v51  ;;  %885 = vmatmul.msk.bf16.vlgmr.msra.gmra.mxu2 %vm499_vm0, %v893_v51 }
  0x59   : > { %886 = vmatmul.msk.bf16.vlgmr.msra.gmra.mxu3 %vm499_vm0, %v893_v51 }
  0xbd   : > { %v591_v54 = vpop.permute.xlu0 %590 }
  0xbe   : > { %v611_v55 = vpop.permute.xlu1 %610 }
  0xc5   : > { %v596_v0 = vpop.permute.xlu0 %595 }
  0xc6   : > { %v616_v10 = vpop.permute.xlu1 %615 }
  0xd4   : > { %v512_v56 = vpop.f32.mrf.mxu0 }
  0xd5   : > { %v598_v57 = vmul.f32 %v591_v54, %v512_v56  ;;  %v526_v58 = vpop.f32.mrf.mxu1 }
  0xd6   : > { %v599_v59 = vmul.f32 %v591_v54, %v526_v58 }
  0xd7   : > { %v618_v60 = vadd.f32 %v611_v55, %v598_v57 }
  0xd8   : > { %v619_v61 = vadd.f32 %v611_v55, %v599_v59 }
  0xd9   : > { %v626_v62 = vmax.f32 %v618_v60, 0.0 }
  0xda   : > { %v627_v63 = vmax.f32 %v619_v61, 0.0 }
  0xdb   : > { %v540_v1 = vpop.f32.mrf.mxu2 }
  0xdc   : > { %v634_v2 = vpack.c.bf16 %v627_v63, %v626_v62  ;;  %v600_v3 = vmul.f32 %v591_v54, %v540_v1  ;;  %v554_v4 = vpop.f32.mrf.mxu3  ;;  %v514_v5 = vpop.f32.mrf.mxu0 }
  0xdd   : > { %v601_v6 = vmul.f32 %v591_v54, %v554_v4  ;;  %v602_v7 = vmul.f32 %v596_v0, %v514_v5  ;;  %v528_v8 = vpop.f32.mrf.mxu1 }
  0xde   : > { %638 = vst [vmem:[%s1222_s29] sm:$0xff] %v634_v2  ;;  %v620_v9 = vadd.f32 %v611_v55, %v600_v3  ;;  %v603_v11 = vmul.f32 %v596_v0, %v528_v8 }
  0xdf   : > { %v621_v12 = vadd.f32 %v611_v55, %v601_v6  ;;  %v622_v13 = vadd.f32 %v616_v10, %v602_v7 }
  0xe0   : > { %v628_v14 = vmax.f32 %v620_v9, 0.0  ;;  %v623_v15 = vadd.f32 %v616_v10, %v603_v11 }
  0xe1   : > { %v629_v16 = vmax.f32 %v621_v12, 0.0  ;;  %v630_v17 = vmax.f32 %v622_v13, 0.0 }
  0xe2   : > { %v631_v18 = vmax.f32 %v623_v15, 0.0 }
  0xe3   : > { %v635_v19 = vpack.c.bf16 %v629_v16, %v628_v14  ;;  %v542_v20 = vpop.f32.mrf.mxu2 }
  0xe4   : > { %v636_v21 = vpack.c.bf16 %v631_v18, %v630_v17  ;;  %v604_v22 = vmul.f32 %v596_v0, %v542_v20  ;;  %v556_v23 = vpop.f32.mrf.mxu3 }
  0xe5   : > { %639 = vst [vmem:[%s1222_s29 + $0x8] sm:$0xff] %v635_v19  ;;  %v605_v24 = vmul.f32 %v596_v0, %v556_v23  ;;  %v664_v30 = vld [vmem:[%s1222_s29] sm:$0xff] (%p1069_p6) }
  0xe6   : > { %640 = vst [vmem:[%s1222_s29 + $0x10] sm:$0xff] %v636_v21  ;;  %v624_v25 = vadd.f32 %v616_v10, %v604_v22 }
  0xe7   : > { %v625_v26 = vadd.f32 %v616_v10, %v605_v24  ;;  %665 = vst [vmem:[%s651_s6] sm:$0xff] (%p1069_p6), %v664_v30 }
  0xe8   : > { %v632_v27 = vmax.f32 %v624_v25, 0.0 }
  0xe9   : > { %v633_v28 = vmax.f32 %v625_v26, 0.0  ;;  %648 = sbr.rel (!%p1069_p6) target bundleno = 246 (0xf6), region = 71 }
  0xeb   : > { %v637_v29 = vpack.c.bf16 %v633_v28, %v632_v27 }
  0xec   : > { %v666_v31 = vld [vmem:[%s1222_s29 + $0x8] sm:$0xff] (%p1069_p6) }
  0xed   : > { %641 = vst [vmem:[%s1222_s29 + $0x18] sm:$0xff] %v637_v29  ;;  %v668_v32 = vld [vmem:[%s1222_s29 + $0x10] sm:$0xff] (%p1069_p6) }
  0xee   : > { %667 = vst [vmem:[%s651_s6 + $0x8] sm:$0xff] %v666_v31 }
  0xef   : > { %669 = vst [vmem:[%s651_s6 + $0x20] sm:$0xff] %v668_v32 }
  0xf4   : > { %v670_v33 = vld [vmem:[%s1222_s29 + $0x18] sm:$0xff] }
  0xf5   : > { %671 = vst [vmem:[%s651_s6 + $0x28] sm:$0xff] %v670_v33 }
  0xf6 PF: > { %s14_s19 = sadd.s32 1, %s1006_s19   ;;  %s1259_s15 = smov %s994_s16 }
  0xf7   : > { %p11_p11 = scmp.ge.s32.totalorder %s14_s19, 4   ;;  %s1260_s16 = smov %s1074_s25 }
  0xf8   : > { %s1261_s17 = smov %s1002_s18  ;;  %s1262_s18 = smov %s1264_s20 }
  0xf9   :  { %13 = sbr.rel (!%p11_p11) target bundleno = 3 (0x3), region = 128 }

// kernel: daft_forward.20
= control target key start
LH: loop header
LB: loop body
LE: loop exit
PB: predicated region body
PF: predicated region fallthrough
CT: control target
= control target key end

     0   :  { %s1156_s18 = smov 0   ;;  %s1158_s19 = smov 0   ;;  %s1398_s0 = inlined_call_operand.vmem [shape: bf16[16,112], index: 0, kind: input, shape index: {}]   ;;  %s1399_s1 = inlined_call_operand.vmem [shape: bf16[112,1024], index: 1, kind: input, shape index: {}]   ;;  %s1400_s2 = inlined_call_operand.vmem [shape: f32[16,1], index: 2, kind: input, shape index: {}]   ;;  %s1401_s3 = inlined_call_operand.vmem [shape: f32[16,1], index: 3, kind: input, shape index: {}]   ;;  %s1402_s4 = inlined_call_operand.vmem [shape: bf16[16,1024], index: 4, kind: input, shape index: {}]   ;;  %s1403_s5 = inlined_call_operand.vmem [shape: bf16[16,1024], index: 5, kind: output, shape index: {}]  }
   0x1   :  { %s1160_s20 = smov 0   ;;  %s1162_s21 = smov 0  }
   0x2   :  { %s1164_s22 = smov 0  }
   0x3 LB: > { %s27_s23 = sadd.s32 1, %s1119_s21  ;;  %s870_s24 = sadd.s32 4294967295, %s1123_s22   ;;  %s1123_s22 = sphi %s1164_s22, %s15_s22   ;;  %s1119_s21 = sphi %s1162_s21, %s1409_s21   ;;  %s1115_s20 = sphi %s1160_s20, %s1408_s20   ;;  %s1111_s19 = sphi %s1158_s19, %s1407_s19   ;;  %s1107_s18 = sphi %s1156_s18, %s1406_s18  }
   0x4   : > { %p29_p0 = scmp.ge.s32.totalorder %s27_s23, 2  ;;  %p69_p1 = scmp.ne.s32.totalorder %s1111_s19, %s1107_s18 }
   0x5   : > { %p70_p2 = scmp.eq.s32.totalorder %s1123_s22, 0  ;;  %p167_p4 = scmp.eq.s32.totalorder %s870_s24, 1 }
   0x6   : > { %s1411_s23 = smov (%p29_p0, %s27_s23), 0  ;;  %s62_s27 = sadd.s32 1, %s1111_s19 }
   0x7   : > { %p1188_p3 = por %p70_p2, %p69_p1  ;;  %s58_s26 = ssub.s32 %s1119_s21, %s1411_s23 }
   0x8   : > { %p60_p5 = scmp.eq.s32.totalorder %s58_s26, 0  ;;  %p1195_p6 = por %p167_p4, %p69_p1 }
   0x9   : > { %p874_p7 = scmp.ge.s32.totalorder %s1123_s22, 2 }
   0xa   : > { %s1200_s29 = scalar_select %p60_p5, %s1111_s19, %s62_s27  }
   0xb   : > { %202 = sbr.rel (%p874_p7) target bundleno = 56 (0x38), region = 28 }
  0x10   : > { %205 = sbr.rel (!%p1188_p3) target bundleno = 48 (0x30), region = 32  ;;  %s207_s30 = sand.u32 (%p1188_p3), 1, %s1111_s19  }
  0x11   : > { %s1008_s6 = sshll.u32 (%p1188_p3), %s1119_s21, 4  ;;  %s1040_s7 = smul.u32 (%p1188_p3), 224, %s207_s30 }
  0x12   : > { %s1210_s10 = scalar_lea.vmem (%p1188_p3), %s1399_s1, %s1008_s6 }
  0x13   : > { %v228_v0 = vld [vmem:[%s1210_s10] sm:$0xff] (%p1188_p3)  ;;  %v230_v1 = vld [vmem:[%s1210_s10 + $0x8] sm:$0xff] (%p1188_p3)  ;;  %s1215_s11 = scalar_lea.vmem (%p1188_p3), [#allocation3], %s1040_s7 }
  0x14   : > { %v232_v2 = vld [vmem:[%s1210_s10 + $0x20] sm:$0xff] (%p1188_p3)  ;;  %229 = vst [vmem:[%s1215_s11] sm:$0xff] (%p1188_p3), %v228_v0  ;;  %v234_v3 = vld [vmem:[%s1210_s10 + $0x28] sm:$0xff] (%p1188_p3) }
  0x15   : > { %231 = vst [vmem:[%s1215_s11 + $0x8] sm:$0xff] %v230_v1  ;;  %v236_v4 = vld [vmem:[%s1210_s10 + $0x40] sm:$0xff]  ;;  %v238_v5 = vld [vmem:[%s1210_s10 + $0x48] sm:$0xff] }
  0x16   : > { %233 = vst [vmem:[%s1215_s11 + $0x10] sm:$0xff] %v232_v2  ;;  %v240_v6 = vld [vmem:[%s1210_s10 + $0x60] sm:$0xff]  ;;  %v242_v7 = vld [vmem:[%s1210_s10 + $0x68] sm:$0xff] }
  0x17   : > { %235 = vst [vmem:[%s1215_s11 + $0x18] sm:$0xff] %v234_v3  ;;  %v244_v8 = vld [vmem:[%s1210_s10 + $0x80] sm:$0xff]  ;;  %v246_v9 = vld [vmem:[%s1210_s10 + $0x88] sm:$0xff] }
  0x18   : > { %237 = vst [vmem:[%s1215_s11 + $0x20] sm:$0xff] %v236_v4  ;;  %v248_v10 = vld [vmem:[%s1210_s10 + $0xa0] sm:$0xff]  ;;  %v250_v11 = vld [vmem:[%s1210_s10 + $0xa8] sm:$0xff] }
  0x19   : > { %239 = vst [vmem:[%s1215_s11 + $0x28] sm:$0xff] %v238_v5  ;;  %v252_v12 = vld [vmem:[%s1210_s10 + $0xc0] sm:$0xff]  ;;  %v254_v13 = vld [vmem:[%s1210_s10 + $0xc8] sm:$0xff] }
  0x1a   : > { %241 = vst [vmem:[%s1215_s11 + $0x30] sm:$0xff] %v240_v6  ;;  %v256_v14 = vld [vmem:[%s1210_s10 + $0xe0] sm:$0xff]  ;;  %v258_v15 = vld [vmem:[%s1210_s10 + $0xe8] sm:$0xff] }
  0x1b   : > { %243 = vst [vmem:[%s1215_s11 + $0x38] sm:$0xff] %v242_v7  ;;  %v260_v16 = vld [vmem:[%s1210_s10 + $0x100] sm:$0xff]  ;;  %v262_v17 = vld [vmem:[%s1210_s10 + $0x108] sm:$0xff] }
  0x1c   : > { %245 = vst [vmem:[%s1215_s11 + $0x40] sm:$0xff] %v244_v8  ;;  %v264_v18 = vld [vmem:[%s1210_s10 + $0x120] sm:$0xff]  ;;  %v266_v19 = vld [vmem:[%s1210_s10 + $0x128] sm:$0xff] }
  0x1d   : > { %247 = vst [vmem:[%s1215_s11 + $0x48] sm:$0xff] %v246_v9  ;;  %v268_v20 = vld [vmem:[%s1210_s10 + $0x140] sm:$0xff]  ;;  %v270_v21 = vld [vmem:[%s1210_s10 + $0x148] sm:$0xff] }
  0x1e   : > { %249 = vst [vmem:[%s1215_s11 + $0x50] sm:$0xff] %v248_v10  ;;  %v272_v22 = vld [vmem:[%s1210_s10 + $0x160] sm:$0xff]  ;;  %v274_v23 = vld [vmem:[%s1210_s10 + $0x168] sm:$0xff] }
  0x1f   : > { %251 = vst [vmem:[%s1215_s11 + $0x58] sm:$0xff] %v250_v11  ;;  %v276_v24 = vld [vmem:[%s1210_s10 + $0x180] sm:$0xff]  ;;  %v278_v25 = vld [vmem:[%s1210_s10 + $0x188] sm:$0xff] }
  0x20   : > { %253 = vst [vmem:[%s1215_s11 + $0x60] sm:$0xff] %v252_v12  ;;  %v280_v26 = vld [vmem:[%s1210_s10 + $0x1a0] sm:$0xff]  ;;  %v282_v27 = vld [vmem:[%s1210_s10 + $0x1a8] sm:$0xff] }
  0x21   : > { %255 = vst [vmem:[%s1215_s11 + $0x68] sm:$0xff] %v254_v13 }
  0x22   : > { %257 = vst [vmem:[%s1215_s11 + $0x70] sm:$0xff] %v256_v14 }
  0x23   : > { %259 = vst [vmem:[%s1215_s11 + $0x78] sm:$0xff] %v258_v15 }
  0x24   : > { %261 = vst [vmem:[%s1215_s11 + $0x80] sm:$0xff] %v260_v16 }
  0x25   : > { %263 = vst [vmem:[%s1215_s11 + $0x88] sm:$0xff] %v262_v17 }
  0x26   : > { %265 = vst [vmem:[%s1215_s11 + $0x90] sm:$0xff] %v264_v18 }
  0x27   : > { %267 = vst [vmem:[%s1215_s11 + $0x98] sm:$0xff] %v266_v19 }
  0x28   : > { %269 = vst [vmem:[%s1215_s11 + $0xa0] sm:$0xff] %v268_v20 }
  0x29   : > { %271 = vst [vmem:[%s1215_s11 + $0xa8] sm:$0xff] %v270_v21 }
  0x2a   : > { %273 = vst [vmem:[%s1215_s11 + $0xb0] sm:$0xff] %v272_v22 }
  0x2b   : > { %275 = vst [vmem:[%s1215_s11 + $0xb8] sm:$0xff] %v274_v23 }
  0x2c   : > { %277 = vst [vmem:[%s1215_s11 + $0xc0] sm:$0xff] %v276_v24 }
  0x2d   : > { %279 = vst [vmem:[%s1215_s11 + $0xc8] sm:$0xff] %v278_v25 }
  0x2e   : > { %281 = vst [vmem:[%s1215_s11 + $0xd0] sm:$0xff] %v280_v26 }
  0x2f   : > { %283 = vst [vmem:[%s1215_s11 + $0xd8] sm:$0xff] %v282_v27 }
  0x30 PF: > { %289 = sbr.rel (!%p1188_p3) target bundleno = 56 (0x38), region = 55  ;;  %s291_s12 = sand.u32 (%p1188_p3), 1, %s1111_s19  }
  0x31   : > { %s1009_s13 = sshll.u32 (%p1188_p3), %s1119_s21, 4  ;;  %s877_s14 = sshll.u32 (%p1188_p3), %s291_s12, 5 }
  0x32   : > { %s296_s17 = scalar_lea.vmem (%p1188_p3), %s1402_s4, %s1009_s13  ;;  %s293_s24 = scalar_lea.vmem (%p1188_p3), [#allocation4], %s877_s14 }
  0x33   : > { %v309_v28 = vld [vmem:[%s296_s17] sm:$0xff] (%p1188_p3)  ;;  %v311_v29 = vld [vmem:[%s296_s17 + $0x8] sm:$0xff] (%p1188_p3) }
  0x34   : > { %v313_v30 = vld [vmem:[%s296_s17 + $0x20] sm:$0xff] (%p1188_p3)  ;;  %310 = vst [vmem:[%s293_s24] sm:$0xff] (%p1188_p3), %v309_v28  ;;  %v315_v31 = vld [vmem:[%s296_s17 + $0x28] sm:$0xff] (%p1188_p3) }
  0x35   : > { %312 = vst [vmem:[%s293_s24 + $0x8] sm:$0xff] %v311_v29 }
  0x36   : > { %314 = vst [vmem:[%s293_s24 + $0x10] sm:$0xff] %v313_v30 }
  0x37   : > { %316 = vst [vmem:[%s293_s24 + $0x18] sm:$0xff] %v315_v31 }
  0x38 PF: > { %p880_p8 = scmp.ge.s32.totalorder %s1123_s22, 1  ;;  %p321_p9 = scmp.lt.s32.totalorder %s1123_s22, 3 }
  0x3a   : > { %p322_p10 = pnand %p880_p8, %p321_p9 }
  0x3b   : > { %s328_s25 = sand.u32 (!%p322_p10), 1, %s1107_s18  }
  0x3c   : > { %325 = sbr.rel (%p322_p10) target bundleno = 256 (0x100), region = 78  ;;  %s1357_s15 = sshll.u32 (!%p322_p10), %s328_s25, 5 }
  0x3d   : > { %s1041_s26 = smul.u32 (!%p322_p10), 224, %s328_s25  ;;  %s1360_s16 = scalar_lea.vmem (!%p322_p10), [#allocation4], %s1357_s15 }
  0x3e   : > { %s1366_s18 = scalar_lea.vmem (!%p322_p10), [#allocation5], %s1357_s15 }
  0x3f   : > { %s1282_s27 = scalar_lea.vmem (!%p322_p10), [#allocation3], %s1041_s26 }
  0x41   : > { %v985_v32 = vld [vmem:[%s1282_s27 + $0xc0] sm:$0xf]  ;;  %v1037_v33 = vld [vmem:[%s1282_s27 + $0xcc] sm:$0xf0]  ;;  %v1035_v34 = vld [vmem:[%s1282_s27 + $0xc4] sm:$0xf] }
  0x42   : > { %v986_v35 = vor.u32 %v1037_v33, %v985_v32  ;;  %v987_v36 = vld [vmem:[%s1282_s27 + $0xd0] sm:$0xf0]  ;;  %v993_v37 = vld [vmem:[%s1282_s27 + $0xc8] sm:$0xf]  ;;  %v1038_v38 = vld [vmem:[%s1282_s27 + $0xd4] sm:$0xf0] }
  0x43   : > { %v990_v39 = vor.u32 %v1035_v34, %v987_v36  ;;  %v994_v40 = vor.u32 %v1038_v38, %v993_v37  ;;  %v1036_v41 = vld [vmem:[%s1282_s27 + $0xcc] sm:$0xf]  ;;  %v995_v42 = vld [vmem:[%s1282_s27 + $0xd8] sm:$0xf0]  ;;  %v969_v43 = vld [vmem:[%s1282_s27 + $0xa0] sm:$0xf] }
  0x44   : > { %578 = vmatpush.bf16.msra.mxu0 %v986_v35  ;;  %v998_v44 = vor.u32 %v1036_v41, %v995_v42  ;;  %v1033_v45 = vld [vmem:[%s1282_s27 + $0xac] sm:$0xf0]  ;;  %v1031_v46 = vld [vmem:[%s1282_s27 + $0xa4] sm:$0xf]  ;;  %v971_v47 = vld [vmem:[%s1282_s27 + $0xb0] sm:$0xf0] }
  0x45   : > { %592 = vmatpush.bf16.msra.mxu1 %v990_v39  ;;  %606 = vmatpush.bf16.msra.mxu2 %v994_v40  ;;  %v970_v48 = vor.u32 %v1033_v45, %v969_v43  ;;  %v974_v49 = vor.u32 %v1031_v46, %v971_v47  ;;  %v977_v50 = vld [vmem:[%s1282_s27 + $0xa8] sm:$0xf]  ;;  %v1034_v51 = vld [vmem:[%s1282_s27 + $0xb4] sm:$0xf0]  ;;  %v1032_v52 = vld [vmem:[%s1282_s27 + $0xac] sm:$0xf] }
  0x46   : > { %620 = vmatpush.bf16.msra.mxu3 %v998_v44  ;;  %v978_v53 = vor.u32 %v1034_v51, %v977_v50  ;;  %v979_v54 = vld [vmem:[%s1282_s27 + $0xb8] sm:$0xf0]  ;;  %v953_v55 = vld [vmem:[%s1282_s27 + $0x80] sm:$0xf]  ;;  %v1029_v56 = vld [vmem:[%s1282_s27 + $0x8c] sm:$0xf0] }
  0x47   : > { %v982_v57 = vor.u32 %v1032_v52, %v979_v54  ;;  %v1027_v58 = vld [vmem:[%s1282_s27 + $0x84] sm:$0xf]  ;;  %v955_v59 = vld [vmem:[%s1282_s27 + $0x90] sm:$0xf0]  ;;  %v961_v60 = vld [vmem:[%s1282_s27 + $0x88] sm:$0xf]  ;;  %v954_v61 = vor.u32 %v1029_v56, %v953_v55 }
  0x48   : > { %579 = vmatpush.bf16.msra.mxu0 %v970_v48  ;;  %v1030_v62 = vld [vmem:[%s1282_s27 + $0x94] sm:$0xf0]  ;;  %v1028_v63 = vld [vmem:[%s1282_s27 + $0x8c] sm:$0xf]  ;;  %v963_v0 = vld [vmem:[%s1282_s27 + $0x98] sm:$0xf0]  ;;  %v958_v1 = vor.u32 %v1027_v58, %v955_v59 }
  0x49   : > { %593 = vmatpush.bf16.msra.mxu1 %v974_v49  ;;  %607 = vmatpush.bf16.msra.mxu2 %v978_v53  ;;  %v962_v2 = vor.u32 %v1030_v62, %v961_v60  ;;  %v937_v3 = vld [vmem:[%s1282_s27 + $0x60] sm:$0xf]  ;;  %v1025_v4 = vld [vmem:[%s1282_s27 + $0x6c] sm:$0xf0]  ;;  %v1023_v5 = vld [vmem:[%s1282_s27 + $0x64] sm:$0xf]  ;;  %v966_v6 = vor.u32 %v1028_v63, %v963_v0 }
  0x4a   : > { %621 = vmatpush.bf16.msra.mxu3 %v982_v57  ;;  %v939_v7 = vld [vmem:[%s1282_s27 + $0x70] sm:$0xf0]  ;;  %v945_v8 = vld [vmem:[%s1282_s27 + $0x68] sm:$0xf]  ;;  %v1026_v9 = vld [vmem:[%s1282_s27 + $0x74] sm:$0xf0]  ;;  %v938_v12 = vor.u32 %v1025_v4, %v937_v3 }
  0x4b   : > { %v1024_v10 = vld [vmem:[%s1282_s27 + $0x6c] sm:$0xf]  ;;  %v947_v11 = vld [vmem:[%s1282_s27 + $0x78] sm:$0xf0]  ;;  %v942_v13 = vor.u32 %v1023_v5, %v939_v7  ;;  %v946_v14 = vor.u32 %v1026_v9, %v945_v8  ;;  %v921_v15 = vld [vmem:[%s1282_s27 + $0x40] sm:$0xf] }
  0x4c   : > { %580 = vmatpush.bf16.msra.mxu0 %v954_v61  ;;  %v1021_v16 = vld [vmem:[%s1282_s27 + $0x4c] sm:$0xf0]  ;;  %v1019_v17 = vld [vmem:[%s1282_s27 + $0x44] sm:$0xf]  ;;  %v950_v18 = vor.u32 %v1024_v10, %v947_v11  ;;  %v923_v19 = vld [vmem:[%s1282_s27 + $0x50] sm:$0xf0] }
  0x4d   : > { %594 = vmatpush.bf16.msra.mxu1 %v958_v1  ;;  %608 = vmatpush.bf16.msra.mxu2 %v962_v2  ;;  %v929_v20 = vld [vmem:[%s1282_s27 + $0x48] sm:$0xf]  ;;  %v1022_v21 = vld [vmem:[%s1282_s27 + $0x54] sm:$0xf0]  ;;  %v1020_v22 = vld [vmem:[%s1282_s27 + $0x4c] sm:$0xf]  ;;  %v922_v24 = vor.u32 %v1021_v16, %v921_v15  ;;  %v926_v25 = vor.u32 %v1019_v17, %v923_v19 }
  0x4e   : > { %622 = vmatpush.bf16.msra.mxu3 %v966_v6  ;;  %v931_v23 = vld [vmem:[%s1282_s27 + $0x58] sm:$0xf0]  ;;  %v930_v26 = vor.u32 %v1022_v21, %v929_v20  ;;  %v905_v27 = vld [vmem:[%s1282_s27 + $0x20] sm:$0xf]  ;;  %v1017_v28 = vld [vmem:[%s1282_s27 + $0x2c] sm:$0xf0] }
  0x4f   : > { %v1015_v29 = vld [vmem:[%s1282_s27 + $0x24] sm:$0xf]  ;;  %v934_v30 = vor.u32 %v1020_v22, %v931_v23  ;;  %v907_v31 = vld [vmem:[%s1282_s27 + $0x30] sm:$0xf0]  ;;  %v913_v32 = vld [vmem:[%s1282_s27 + $0x28] sm:$0xf]  ;;  %v906_v37 = vor.u32 %v1017_v28, %v905_v27 }
  0x50   : > { %581 = vmatpush.bf16.msra.mxu0 %v938_v12  ;;  %v1018_v33 = vld [vmem:[%s1282_s27 + $0x34] sm:$0xf0]  ;;  %v1016_v34 = vld [vmem:[%s1282_s27 + $0x2c] sm:$0xf]  ;;  %v915_v35 = vld [vmem:[%s1282_s27 + $0x38] sm:$0xf0]  ;;  %v910_v40 = vor.u32 %v1015_v29, %v907_v31 }
  0x51   : > { %595 = vmatpush.bf16.msra.mxu1 %v942_v13  ;;  %609 = vmatpush.bf16.msra.mxu2 %v946_v14  ;;  %v660_v36 = vld [vmem:[%s1400_s2] sm:$0xff]  ;;  %v1125_v39 = vmov 0   ;;  %v914_v41 = vor.u32 %v1018_v33, %v913_v32  ;;  %v1013_v42 = vld [vmem:[%s1282_s27 + $0xc] sm:$0xf0]  ;;  %v918_v45 = vor.u32 %v1016_v34, %v915_v35  ;;  %v891_v46 = vld [vmem:[%s1282_s27 + $0x10] sm:$0xf0] }
  0x52   : > { %623 = vmatpush.bf16.msra.mxu3 %v950_v18  ;;  %v889_v38 = vld [vmem:[%s1282_s27] sm:$0xf]  ;;  %1083 = vset.pattern.permute.xlu0 %v1125_v39  ;;  %v1011_v43 = vld [vmem:[%s1282_s27 + $0x4] sm:$0xf]  ;;  %v897_v47 = vld [vmem:[%s1282_s27 + $0x8] sm:$0xf] }
  0x53   : > { %v680_v44 = vld [vmem:[%s1401_s3] sm:$0xff]  ;;  %v1014_v48 = vld [vmem:[%s1282_s27 + $0x14] sm:$0xf0]  ;;  %664 = vperm.xlu0 %1083, %v660_v36   ;;  %v1012_v49 = vld [vmem:[%s1282_s27 + $0xc] sm:$0xf]  ;;  %1084 = vset.pattern.permute.xlu1 %v1125_v39  ;;  %v890_v51 = vor.u32 %v1013_v42, %v889_v38  ;;  %v894_v52 = vor.u32 %v1011_v43, %v891_v46  ;;  %vm573_vm0 = vcmask 916480  }
  0x54   : > { %582 = vmatpush.bf16.msra.mxu0 %v922_v24  ;;  %v899_v50 = vld [vmem:[%s1282_s27 + $0x18] sm:$0xf0]  ;;  %684 = vperm.xlu1 %1084, %v680_v44   ;;  %v898_v53 = vor.u32 %v1014_v48, %v897_v47  ;;  %v1010_v55 = vld [vmem:[%s1398_s0] sm:$0xff]  ;;  %v661_v56 = vld [vmem:[%s1400_s2 + $0x8] sm:$0xff]  ;;  %s1039_s17 = sshll.u32 (%p1195_p6), %s1115_s20, 4 }
  0x55   : > { %596 = vmatpush.bf16.msra.mxu1 %v926_v25  ;;  %610 = vmatpush.bf16.msra.mxu2 %v930_v26  ;;  %v902_v54 = vor.u32 %v1012_v49, %v899_v50  ;;  %v681_v57 = vld [vmem:[%s1401_s3 + $0x8] sm:$0xff]  ;;  %v700_v59 = vld [vmem:[%s1360_s16] sm:$0xff]  ;;  %v702_v8 = vld [vmem:[%s1360_s16 + $0x10] sm:$0xff]  ;;  %s745_s26 = scalar_lea.vmem (%p1195_p6), %s1403_s5, %s1039_s17 }
  0x56   : > { %624 = vmatpush.bf16.msra.mxu3 %v934_v30  ;;  %v704_v63 = vunpack.c.l.bf16 %v700_v59  ;;  %v705_v2 = vunpack.c.h.bf16 %v700_v59  ;;  %v701_v6 = vld [vmem:[%s1360_s16 + $0x8] sm:$0xff]  ;;  %v708_v20 = vunpack.c.l.bf16 %v702_v8  ;;  %v709_v26 = vunpack.c.h.bf16 %v702_v8  ;;  %v703_v33 = vld [vmem:[%s1360_s16 + $0x18] sm:$0xff] }
  0x57   : > { %v706_v14 = vunpack.c.l.bf16 %v701_v6  ;;  %v707_v18 = vunpack.c.h.bf16 %v701_v6 }
  0x58   : > { %583 = vmatpush.bf16.msra.mxu0 %v906_v37 }
  0x59   : > { %597 = vmatpush.bf16.msra.mxu1 %v910_v40  ;;  %611 = vmatpush.bf16.msra.mxu2 %v914_v41  ;;  %v710_v41 = vunpack.c.l.bf16 %v703_v33 }
  0x5a   : > { %625 = vmatpush.bf16.msra.mxu3 %v918_v45  ;;  %v711_v45 = vunpack.c.h.bf16 %v703_v33 }
  0x5b   : > { %669 = vperm.xlu0 %1083, %v661_v56  }
  0x5c   : > { %584 = vmatpush.bf16.msra.mxu0 %v890_v51  ;;  %689 = vperm.xlu1 %1084, %v681_v57  }
  0x5d   : > { %598 = vmatpush.bf16.msra.mxu1 %v894_v52  ;;  %612 = vmatpush.bf16.msra.mxu2 %v898_v53 }
  0x5e   : > { %626 = vmatpush.bf16.msra.mxu3 %v902_v54 }
  0x5f   : > { %999 = vmatmul.msk.bf16.vlgmr.msra.gmra.mxu0 %vm573_vm0, %v1010_v55 }
  0x60   : > { %1000 = vmatmul.msk.bf16.vlgmr.msra.gmra.mxu1 %vm573_vm0, %v1010_v55  ;;  %1001 = vmatmul.msk.bf16.vlgmr.msra.gmra.mxu2 %vm573_vm0, %v1010_v55 }
  0x61   : > { %1002 = vmatmul.msk.bf16.vlgmr.msra.gmra.mxu3 %vm573_vm0, %v1010_v55 }
  0xc5   : > { %v665_v58 = vpop.permute.xlu0 %664 }
  0xc6   : > { %v685_v60 = vpop.permute.xlu1 %684 }
  0xcd   : > { %v670_v10 = vpop.permute.xlu0 %669 }
  0xce   : > { %v690_v24 = vpop.permute.xlu1 %689 }
  0xdc   : > { %v586_v61 = vpop.f32.mrf.mxu0 }
  0xdd   : > { %v672_v62 = vmul.f32 %v665_v58, %v586_v61  ;;  %v600_v0 = vpop.f32.mrf.mxu1 }
  0xde   : > { %v673_v1 = vmul.f32 %v665_v58, %v600_v0 }
  0xdf   : > { %v692_v3 = vadd.f32 %v685_v60, %v672_v62 }
  0xe0   : > { %v693_v4 = vadd.f32 %v685_v60, %v673_v1 }
  0xe1   : > { %v712_v5 = vadd.f32 %v704_v63, %v692_v3 }
  0xe2   : > { %v713_v7 = vadd.f32 %v705_v2, %v693_v4 }
  0xe3   : > { %v720_v9 = vmax.f32 %v712_v5, 0.0  ;;  %v614_v11 = vpop.f32.mrf.mxu2 }
  0xe4   : > { %v721_v12 = vmax.f32 %v713_v7, 0.0  ;;  %v674_v13 = vmul.f32 %v665_v58, %v614_v11  ;;  %v628_v15 = vpop.f32.mrf.mxu3  ;;  %v588_v16 = vpop.f32.mrf.mxu0 }
  0xe5   : > { %v675_v17 = vmul.f32 %v665_v58, %v628_v15  ;;  %v676_v19 = vmul.f32 %v670_v10, %v588_v16  ;;  %v602_v21 = vpop.f32.mrf.mxu1 }
  0xe6   : > { %v728_v22 = vpack.c.bf16 %v721_v12, %v720_v9  ;;  %v694_v23 = vadd.f32 %v685_v60, %v674_v13  ;;  %v677_v25 = vmul.f32 %v670_v10, %v602_v21 }
  0xe7   : > { %v695_v27 = vadd.f32 %v685_v60, %v675_v17  ;;  %v696_v28 = vadd.f32 %v690_v24, %v676_v19 }
  0xe8   : > { %732 = vst [vmem:[%s1366_s18] sm:$0xff] %v728_v22  ;;  %v714_v29 = vadd.f32 %v706_v14, %v694_v23  ;;  %v697_v30 = vadd.f32 %v690_v24, %v677_v25 }
  0xe9   : > { %v715_v31 = vadd.f32 %v707_v18, %v695_v27  ;;  %v716_v32 = vadd.f32 %v708_v20, %v696_v28 }
  0xea   : > { %v722_v34 = vmax.f32 %v714_v29, 0.0  ;;  %v717_v35 = vadd.f32 %v709_v26, %v697_v30 }
  0xeb   : > { %v723_v36 = vmax.f32 %v715_v31, 0.0  ;;  %v724_v37 = vmax.f32 %v716_v32, 0.0  ;;  %v616_v38 = vpop.f32.mrf.mxu2 }
  0xec   : > { %v725_v39 = vmax.f32 %v717_v35, 0.0  ;;  %v678_v40 = vmul.f32 %v670_v10, %v616_v38  ;;  %v630_v42 = vpop.f32.mrf.mxu3 }
  0xed   : > { %v729_v43 = vpack.c.bf16 %v723_v36, %v722_v34  ;;  %v679_v44 = vmul.f32 %v670_v10, %v630_v42 }
  0xee   : > { %v730_v46 = vpack.c.bf16 %v725_v39, %v724_v37  ;;  %v698_v47 = vadd.f32 %v690_v24, %v678_v40 }
  0xef   : > { %733 = vst [vmem:[%s1366_s18 + $0x8] sm:$0xff] %v729_v43  ;;  %v699_v48 = vadd.f32 %v690_v24, %v679_v44  ;;  %v758_v54 = vld [vmem:[%s1366_s18] sm:$0xff] (%p1195_p6) }
  0xf0   : > { %734 = vst [vmem:[%s1366_s18 + $0x10] sm:$0xff] %v730_v46  ;;  %v718_v49 = vadd.f32 %v710_v41, %v698_v47 }
  0xf1   : > { %v719_v50 = vadd.f32 %v711_v45, %v699_v48  ;;  %759 = vst [vmem:[%s745_s26] sm:$0xff] (%p1195_p6), %v758_v54 }
  0xf2   : > { %v726_v51 = vmax.f32 %v718_v49, 0.0 }
  0xf3   : > { %v727_v52 = vmax.f32 %v719_v50, 0.0  ;;  %742 = sbr.rel (!%p1195_p6) target bundleno = 256 (0x100), region = 98 }
  0xf5   : > { %v731_v53 = vpack.c.bf16 %v727_v52, %v726_v51 }
  0xf6   : > { %v760_v55 = vld [vmem:[%s1366_s18 + $0x8] sm:$0xff] (%p1195_p6) }
  0xf7   : > { %735 = vst [vmem:[%s1366_s18 + $0x18] sm:$0xff] %v731_v53  ;;  %v762_v56 = vld [vmem:[%s1366_s18 + $0x10] sm:$0xff] (%p1195_p6) }
  0xf8   : > { %761 = vst [vmem:[%s745_s26 + $0x8] sm:$0xff] %v760_v55 }
  0xf9   : > { %763 = vst [vmem:[%s745_s26 + $0x20] sm:$0xff] %v762_v56 }
  0xfe   : > { %v764_v57 = vld [vmem:[%s1366_s18 + $0x18] sm:$0xff] }
  0xff   : > { %765 = vst [vmem:[%s745_s26 + $0x28] sm:$0xff] %v764_v57 }
 0x100 PF: > { %s15_s22 = sadd.s32 1, %s1123_s22   ;;  %s1406_s18 = smov %s1111_s19 }
 0x101   : > { %p12_p11 = scmp.ge.s32.totalorder %s15_s22, 4   ;;  %s1407_s19 = smov %s1200_s29 }
 0x102   : > { %s1408_s20 = smov %s1119_s21  ;;  %s1409_s21 = smov %s1411_s23 }
 0x103   :  { %14 = sbr.rel (!%p12_p11) target bundleno = 3 (0x3), region = 163 }

// kernel: daft_forward.21
= control target key start
LH: loop header
LB: loop body
LE: loop exit
PB: predicated region body
PF: predicated region fallthrough
CT: control target
= control target key end

     0   :  { %v203_v1 = vmov 0   ;;  %vm89_vm0 = vcmask 916480   ;;  %s268_s1 = inlined_call_operand.vmem [shape: bf16[112,128], index: 1, kind: input, shape index: {}]   ;;  %s269_s2 = inlined_call_operand.vmem [shape: f32[16,1], index: 2, kind: input, shape index: {}]   ;;  %s270_s3 = inlined_call_operand.vmem [shape: f32[16,1], index: 3, kind: input, shape index: {}]   ;;  %s271_s0 = inlined_call_operand.vmem [shape: bf16[16,112], index: 0, kind: input, shape index: {}]   ;;  %s272_s4 = inlined_call_operand.vmem [shape: bf16[16,128], index: 4, kind: output, shape index: {}]  }
   0x1   :  { %v194_v0 = vld [vmem:[%s268_s1 + $0x30] sm:$0xff]  ;;  %201 = vset.pattern.permute.xlu0 %v203_v1  ;;  %202 = vset.pattern.permute.xlu1 %v203_v1  ;;  %v193_v2 = vld [vmem:[%s268_s1 + $0x28] sm:$0xff]  ;;  %v116_v3 = vld [vmem:[%s269_s2] sm:$0xff] }
   0x2   :  { %94 = vmatpush.bf16.msra.mxu0 %v194_v0  ;;  %120 = vperm.xlu0 %201, %v116_v3   ;;  %v130_v4 = vld [vmem:[%s270_s3] sm:$0xff]  ;;  %v117_v6 = vld [vmem:[%s269_s2 + $0x8] sm:$0xff]  ;;  %v191_v8 = vld [vmem:[%s268_s1 + $0x18] sm:$0xff] }
   0x3   :  { %134 = vperm.xlu1 %202, %v130_v4   ;;  %v192_v5 = vld [vmem:[%s268_s1 + $0x20] sm:$0xff]  ;;  %v131_v7 = vld [vmem:[%s270_s3 + $0x8] sm:$0xff]  ;;  %v190_v9 = vld [vmem:[%s268_s1 + $0x10] sm:$0xff] }
   0x4   :  { %v189_v10 = vld [vmem:[%s268_s1 + $0x8] sm:$0xff]  ;;  %v188_v11 = vld [vmem:[%s268_s1] sm:$0xff] }
   0x5   :  { %v187_v12 = vld [vmem:[%s271_s0] sm:$0xff] }
   0x6   :  { %95 = vmatpush.bf16.msra.mxu0 %v193_v2 }
   0xa   :  { %96 = vmatpush.bf16.msra.mxu0 %v192_v5  ;;  %125 = vperm.xlu0 %201, %v117_v6  }
   0xb   :  { %139 = vperm.xlu1 %202, %v131_v7  }
   0xe   :  { %97 = vmatpush.bf16.msra.mxu0 %v191_v8 }
  0x12   :  { %98 = vmatpush.bf16.msra.mxu0 %v190_v9 }
  0x16   :  { %99 = vmatpush.bf16.msra.mxu0 %v189_v10 }
  0x1a   :  { %100 = vmatpush.bf16.msra.mxu0 %v188_v11 }
  0x1d   :  { %186 = vmatmul.msk.bf16.vlgmr.msra.gmra.mxu0 %vm89_vm0, %v187_v12 }
  0x74   :  { %v121_v13 = vpop.permute.xlu0 %120 }
  0x75   :  { %v135_v14 = vpop.permute.xlu1 %134 }
  0x7c   :  { %v126_v17 = vpop.permute.xlu0 %125 }
  0x7d   :  { %v140_v21 = vpop.permute.xlu1 %139 }
  0x9a   :  { %v102_v15 = vpop.f32.mrf.mxu0 }
  0x9b   :  { %v128_v16 = vmul.f32 %v121_v13, %v102_v15 }
  0x9d   :  { %v142_v19 = vadd.f32 %v135_v14, %v128_v16 }
  0x9f   :  { %v144_v23 = vmax.f32 %v142_v19, 0.0 }
  0xa2   :  { %v104_v18 = vpop.f32.mrf.mxu0 }
  0xa3   :  { %v129_v20 = vmul.f32 %v126_v17, %v104_v18 }
  0xa5   :  { %v143_v22 = vadd.f32 %v140_v21, %v129_v20 }
  0xa7   :  { %v145_v24 = vmax.f32 %v143_v22, 0.0 }
  0xa9   :  { %v198_v25 = vpack.c.bf16 %v145_v24, %v144_v23 }
  0xab   :  { %199 = vst [vmem:[%s272_s4] sm:$0xff] %v198_v25  }

// kernel: daft_forward.22
= control target key start
LH: loop header
LB: loop body
LE: loop exit
PB: predicated region body
PF: predicated region fallthrough
CT: control target
= control target key end

     0   :  { %v123_v1 = vmov 0   ;;  %vm41_vm0 = vcmask 130048   ;;  %s170_s1 = inlined_call_operand.vmem [shape: bf16[16,128], index: 1, kind: input, shape index: {}]   ;;  %s171_s0 = inlined_call_operand.vmem [shape: bf16[16,16], index: 0, kind: input, shape index: {}]   ;;  %s172_s2 = inlined_call_operand.vmem [shape: f32[16,1], index: 2, kind: input, shape index: {}]   ;;  %s173_s3 = inlined_call_operand.vmem [shape: f32[16,1], index: 3, kind: input, shape index: {}]   ;;  %s174_s4 = inlined_call_operand.vmem [shape: bf16[16,128], index: 4, kind: output, shape index: {}]  }
   0x1   :  { %v114_v0 = vld [vmem:[%s170_s1] sm:$0xff]  ;;  %121 = vset.pattern.permute.xlu0 %v123_v1  ;;  %122 = vset.pattern.permute.xlu1 %v123_v1  ;;  %v69_v5 = vld [vmem:[%s172_s2 + $0x8] sm:$0xff] }
   0x2   :  { %v68_v2 = vld [vmem:[%s172_s2] sm:$0xff]  ;;  %52 = vmatpush.bf16.msra.mxu0 %v114_v0  ;;  %v83_v6 = vld [vmem:[%s173_s3 + $0x8] sm:$0xff] }
   0x3   :  { %v113_v3 = vld [vmem:[%s171_s0] sm:$0xff]  ;;  %72 = vperm.xlu0 %121, %v68_v2  }
   0x4   :  { %v82_v4 = vld [vmem:[%s173_s3] sm:$0xff] }
   0x5   :  { %86 = vperm.xlu1 %122, %v82_v4   ;;  %112 = vmatmul.msk.bf16.vlgmr.msra.gmra.mxu0 %vm41_vm0, %v113_v3 }
   0xb   :  { %77 = vperm.xlu0 %121, %v69_v5  }
   0xd   :  { %91 = vperm.xlu1 %122, %v83_v6  }
  0x75   :  { %v73_v7 = vpop.permute.xlu0 %72 }
  0x77   :  { %v87_v8 = vpop.permute.xlu1 %86 }
  0x7d   :  { %v78_v11 = vpop.permute.xlu0 %77 }
  0x7f   :  { %v92_v14 = vpop.permute.xlu1 %91 }
  0x82   :  { %v54_v9 = vpop.f32.mrf.mxu0 }
  0x83   :  { %v80_v10 = vmul.f32 %v73_v7, %v54_v9 }
  0x85   :  { %v94_v15 = vadd.f32 %v87_v8, %v80_v10 }
  0x8a   :  { %v56_v12 = vpop.f32.mrf.mxu0 }
  0x8b   :  { %v81_v13 = vmul.f32 %v78_v11, %v56_v12 }
  0x8d   :  { %v95_v16 = vadd.f32 %v92_v14, %v81_v13 }
  0x8f   :  { %v118_v17 = vpack.c.bf16 %v95_v16, %v94_v15 }
  0x91   :  { %119 = vst [vmem:[%s174_s4] sm:$0xff] %v118_v17  }

// kernel: daft_forward.23
= control target key start
LH: loop header
LB: loop body
LE: loop exit
PB: predicated region body
PF: predicated region fallthrough
CT: control target
= control target key end

     0   :  { %v330_v4 = vmov 0   ;;  %vm152_vm0 = vcmask 785408   ;;  %s433_s1 = inlined_call_operand.vmem [shape: bf16[224,128], index: 1, kind: input, shape index: {}]   ;;  %s434_s2 = inlined_call_operand.vmem [shape: f32[16,1], index: 2, kind: input, shape index: {}]   ;;  %s435_s3 = inlined_call_operand.vmem [shape: f32[16,1], index: 3, kind: input, shape index: {}]   ;;  %s436_s0 = inlined_call_operand.vmem [shape: bf16[16,224], index: 0, kind: input, shape index: {}]   ;;  %s437_s4 = inlined_call_operand.vmem [shape: bf16[16,128], index: 4, kind: input, shape index: {}]   ;;  %s438_s5 = inlined_call_operand.vmem [shape: bf16[16,128], index: 5, kind: output, shape index: {}]  }
   0x1   :  { %v311_v0 = vld [vmem:[%s433_s1 + $0x38] sm:$0xff]  ;;  %v317_v1 = vld [vmem:[%s433_s1 + $0x68] sm:$0xff]  ;;  %v310_v2 = vld [vmem:[%s433_s1 + $0x30] sm:$0xff]  ;;  %328 = vset.pattern.permute.xlu0 %v330_v4  ;;  %329 = vset.pattern.permute.xlu1 %v330_v4 }
   0x2   :  { %156 = vmatpush.bf16.msra.mxu0 %v311_v0  ;;  %172 = vmatpush.bf16.msra.mxu1 %v317_v1  ;;  %v316_v3 = vld [vmem:[%s433_s1 + $0x60] sm:$0xff]  ;;  %v309_v5 = vld [vmem:[%s433_s1 + $0x28] sm:$0xff]  ;;  %v315_v6 = vld [vmem:[%s433_s1 + $0x58] sm:$0xff] }
   0x3   :  { %v193_v7 = vld [vmem:[%s434_s2] sm:$0xff]  ;;  %v314_v10 = vld [vmem:[%s433_s1 + $0x50] sm:$0xff]  ;;  %v194_v11 = vld [vmem:[%s434_s2 + $0x8] sm:$0xff] }
   0x4   :  { %v207_v8 = vld [vmem:[%s435_s3] sm:$0xff]  ;;  %197 = vperm.xlu0 %328, %v193_v7   ;;  %v208_v12 = vld [vmem:[%s435_s3 + $0x8] sm:$0xff]  ;;  %v307_v13 = vld [vmem:[%s433_s1 + $0x18] sm:$0xff] }
   0x5   :  { %211 = vperm.xlu1 %329, %v207_v8   ;;  %v308_v9 = vld [vmem:[%s433_s1 + $0x20] sm:$0xff]  ;;  %v313_v14 = vld [vmem:[%s433_s1 + $0x48] sm:$0xff]  ;;  %v306_v15 = vld [vmem:[%s433_s1 + $0x10] sm:$0xff] }
   0x6   :  { %157 = vmatpush.bf16.msra.mxu0 %v310_v2  ;;  %173 = vmatpush.bf16.msra.mxu1 %v316_v3  ;;  %v312_v16 = vld [vmem:[%s433_s1 + $0x40] sm:$0xff]  ;;  %v241_v18 = vld [vmem:[%s436_s0 + $0x8] sm:$0xf0]  ;;  %v303_v23 = vld [vmem:[%s436_s0 + $0x4] sm:$0xf0] }
   0x7   :  { %v302_v17 = vld [vmem:[%s436_s0 + $0x4] sm:$0xf]  ;;  %v305_v20 = vld [vmem:[%s433_s1 + $0x8] sm:$0xff]  ;;  %v239_v22 = vld [vmem:[%s436_s0] sm:$0xf] }
   0x8   :  { %v244_v19 = vor.u32 %v302_v17, %v241_v18  ;;  %v304_v21 = vld [vmem:[%s433_s1] sm:$0xff]  ;;  %v240_v24 = vor.u32 %v303_v23, %v239_v22 }
   0x9   :  { %v319_v31 = vld [vmem:[%s437_s4] sm:$0xff]  }
   0xa   :  { %158 = vmatpush.bf16.msra.mxu0 %v309_v5  ;;  %174 = vmatpush.bf16.msra.mxu1 %v315_v6  ;;  %v320_v35 = vunpack.c.l.bf16 %v319_v31  ;;  %v321_v39 = vunpack.c.h.bf16 %v319_v31 }
   0xc   :  { %202 = vperm.xlu0 %328, %v194_v11  }
   0xd   :  { %216 = vperm.xlu1 %329, %v208_v12  }
   0xe   :  { %159 = vmatpush.bf16.msra.mxu0 %v308_v9  ;;  %175 = vmatpush.bf16.msra.mxu1 %v314_v10 }
  0x12   :  { %160 = vmatpush.bf16.msra.mxu0 %v307_v13  ;;  %176 = vmatpush.bf16.msra.mxu1 %v313_v14 }
  0x16   :  { %161 = vmatpush.bf16.msra.mxu0 %v306_v15  ;;  %177 = vmatpush.bf16.msra.mxu1 %v312_v16 }
  0x19   :  { %301 = vmatmul.msk.bf16.vlgmr.msra.gmra.mxu1 %vm152_vm0, %v244_v19 }
  0x1a   :  { %162 = vmatpush.bf16.msra.mxu0 %v305_v20 }
  0x1e   :  { %163 = vmatpush.bf16.msra.mxu0 %v304_v21 }
  0x21   :  { %164 = vmatmul.bf16.vlgmr.msra.gmra.mxu0 %v240_v24 }
  0x76   :  { %v198_v26 = vpop.permute.xlu0 %197 }
  0x77   :  { %v212_v29 = vpop.permute.xlu1 %211 }
  0x7e   :  { %v203_v37 = vpop.permute.xlu0 %202 }
  0x7f   :  { %v217_v40 = vpop.permute.xlu1 %216 }
  0x96   :  { %v179_v25 = vpop.f32.mrf.mxu1 }
  0x9e   :  { %v165_v27 = vpop.f32.mrf.mxu0  ;;  %v181_v32 = vpop.f32.mrf.mxu1 }
  0x9f   :  { %v180_v28 = vadd.f32 %v179_v25, %v165_v27 }
  0xa1   :  { %v205_v30 = vmul.f32 %v198_v26, %v180_v28 }
  0xa3   :  { %v219_v34 = vadd.f32 %v212_v29, %v205_v30 }
  0xa5   :  { %v225_v41 = vadd.f32 %v320_v35, %v219_v34 }
  0xa6   :  { %v167_v33 = vpop.f32.mrf.mxu0 }
  0xa7   :  { %v182_v36 = vadd.f32 %v181_v32, %v167_v33  ;;  %v227_v44 = vmax.f32 %v225_v41, 0.0 }
  0xa9   :  { %v206_v38 = vmul.f32 %v203_v37, %v182_v36 }
  0xab   :  { %v220_v42 = vadd.f32 %v217_v40, %v206_v38 }
  0xad   :  { %v226_v43 = vadd.f32 %v321_v39, %v220_v42 }
  0xaf   :  { %v228_v45 = vmax.f32 %v226_v43, 0.0 }
  0xb1   :  { %v325_v46 = vpack.c.bf16 %v228_v45, %v227_v44 }
  0xb3   :  { %326 = vst [vmem:[%s438_s5] sm:$0xff] %v325_v46  }

// kernel: daft_forward.24
= control target key start
LH: loop header
LB: loop body
LE: loop exit
PB: predicated region body
PF: predicated region fallthrough
CT: control target
= control target key end

     0   :  { %v317_v4 = vmov 0   ;;  %vm149_vm0 = vcmask 785408   ;;  %s412_s1 = inlined_call_operand.vmem [shape: bf16[224,128], index: 1, kind: input, shape index: {}]   ;;  %s413_s2 = inlined_call_operand.vmem [shape: f32[16,1], index: 2, kind: input, shape index: {}]   ;;  %s414_s3 = inlined_call_operand.vmem [shape: f32[16,1], index: 3, kind: input, shape index: {}]   ;;  %s415_s0 = inlined_call_operand.vmem [shape: bf16[16,224], index: 0, kind: input, shape index: {}]   ;;  %s416_s4 = inlined_call_operand.vmem [shape: bf16[16,128], index: 4, kind: output, shape index: {}]  }
   0x1   :  { %v302_v0 = vld [vmem:[%s412_s1 + $0x38] sm:$0xff]  ;;  %v308_v1 = vld [vmem:[%s412_s1 + $0x68] sm:$0xff]  ;;  %v301_v2 = vld [vmem:[%s412_s1 + $0x30] sm:$0xff]  ;;  %315 = vset.pattern.permute.xlu0 %v317_v4  ;;  %316 = vset.pattern.permute.xlu1 %v317_v4 }
   0x2   :  { %153 = vmatpush.bf16.msra.mxu0 %v302_v0  ;;  %169 = vmatpush.bf16.msra.mxu1 %v308_v1  ;;  %v307_v3 = vld [vmem:[%s412_s1 + $0x60] sm:$0xff]  ;;  %v300_v5 = vld [vmem:[%s412_s1 + $0x28] sm:$0xff]  ;;  %v306_v6 = vld [vmem:[%s412_s1 + $0x58] sm:$0xff] }
   0x3   :  { %v190_v7 = vld [vmem:[%s413_s2] sm:$0xff]  ;;  %v305_v10 = vld [vmem:[%s412_s1 + $0x50] sm:$0xff]  ;;  %v191_v11 = vld [vmem:[%s413_s2 + $0x8] sm:$0xff] }
   0x4   :  { %v204_v8 = vld [vmem:[%s414_s3] sm:$0xff]  ;;  %194 = vperm.xlu0 %315, %v190_v7   ;;  %v205_v12 = vld [vmem:[%s414_s3 + $0x8] sm:$0xff]  ;;  %v298_v13 = vld [vmem:[%s412_s1 + $0x18] sm:$0xff] }
   0x5   :  { %208 = vperm.xlu1 %316, %v204_v8   ;;  %v299_v9 = vld [vmem:[%s412_s1 + $0x20] sm:$0xff]  ;;  %v304_v14 = vld [vmem:[%s412_s1 + $0x48] sm:$0xff]  ;;  %v297_v15 = vld [vmem:[%s412_s1 + $0x10] sm:$0xff] }
   0x6   :  { %154 = vmatpush.bf16.msra.mxu0 %v301_v2  ;;  %170 = vmatpush.bf16.msra.mxu1 %v307_v3  ;;  %v303_v16 = vld [vmem:[%s412_s1 + $0x40] sm:$0xff]  ;;  %v232_v18 = vld [vmem:[%s415_s0 + $0x8] sm:$0xf0]  ;;  %v294_v23 = vld [vmem:[%s415_s0 + $0x4] sm:$0xf0] }
   0x7   :  { %v293_v17 = vld [vmem:[%s415_s0 + $0x4] sm:$0xf]  ;;  %v296_v20 = vld [vmem:[%s412_s1 + $0x8] sm:$0xff]  ;;  %v230_v22 = vld [vmem:[%s415_s0] sm:$0xf] }
   0x8   :  { %v235_v19 = vor.u32 %v293_v17, %v232_v18  ;;  %v295_v21 = vld [vmem:[%s412_s1] sm:$0xff]  ;;  %v231_v24 = vor.u32 %v294_v23, %v230_v22 }
   0xa   :  { %155 = vmatpush.bf16.msra.mxu0 %v300_v5  ;;  %171 = vmatpush.bf16.msra.mxu1 %v306_v6 }
   0xc   :  { %199 = vperm.xlu0 %315, %v191_v11  }
   0xd   :  { %213 = vperm.xlu1 %316, %v205_v12  }
   0xe   :  { %156 = vmatpush.bf16.msra.mxu0 %v299_v9  ;;  %172 = vmatpush.bf16.msra.mxu1 %v305_v10 }
  0x12   :  { %157 = vmatpush.bf16.msra.mxu0 %v298_v13  ;;  %173 = vmatpush.bf16.msra.mxu1 %v304_v14 }
  0x16   :  { %158 = vmatpush.bf16.msra.mxu0 %v297_v15  ;;  %174 = vmatpush.bf16.msra.mxu1 %v303_v16 }
  0x19   :  { %292 = vmatmul.msk.bf16.vlgmr.msra.gmra.mxu1 %vm149_vm0, %v235_v19 }
  0x1a   :  { %159 = vmatpush.bf16.msra.mxu0 %v296_v20 }
  0x1e   :  { %160 = vmatpush.bf16.msra.mxu0 %v295_v21 }
  0x21   :  { %161 = vmatmul.bf16.vlgmr.msra.gmra.mxu0 %v231_v24 }
  0x76   :  { %v195_v26 = vpop.permute.xlu0 %194 }
  0x77   :  { %v209_v28 = vpop.permute.xlu1 %208 }
  0x7e   :  { %v200_v34 = vpop.permute.xlu0 %199 }
  0x7f   :  { %v214_v37 = vpop.permute.xlu1 %213 }
  0x96   :  { %v176_v25 = vpop.f32.mrf.mxu1 }
  0x9e   :  { %v162_v27 = vpop.f32.mrf.mxu0  ;;  %v178_v31 = vpop.f32.mrf.mxu1 }
  0x9f   :  { %v177_v29 = vadd.f32 %v176_v25, %v162_v27 }
  0xa1   :  { %v202_v30 = vmul.f32 %v195_v26, %v177_v29 }
  0xa3   :  { %v216_v35 = vadd.f32 %v209_v28, %v202_v30 }
  0xa5   :  { %v218_v39 = vmax.f32 %v216_v35, 0.0 }
  0xa6   :  { %v164_v32 = vpop.f32.mrf.mxu0 }
  0xa7   :  { %v179_v33 = vadd.f32 %v178_v31, %v164_v32 }
  0xa9   :  { %v203_v36 = vmul.f32 %v200_v34, %v179_v33 }
  0xab   :  { %v217_v38 = vadd.f32 %v214_v37, %v203_v36 }
  0xad   :  { %v219_v40 = vmax.f32 %v217_v38, 0.0 }
  0xaf   :  { %v312_v41 = vpack.c.bf16 %v219_v40, %v218_v39 }
  0xb1   :  { %313 = vst [vmem:[%s416_s4] sm:$0xff] %v312_v41  }

// kernel: daft_forward.26
= control target key start
LH: loop header
LB: loop body
LE: loop exit
PB: predicated region body
PF: predicated region fallthrough
CT: control target
= control target key end

     0   :  { %v549_v6 = vmov 0   ;;  %vm268_vm0 = vcmask 392192   ;;  %s703_s1 = inlined_call_operand.vmem [shape: bf16[432,128], index: 1, kind: input, shape index: {}]   ;;  %s704_s2 = inlined_call_operand.vmem [shape: f32[16,1], index: 2, kind: input, shape index: {}]   ;;  %s705_s0 = inlined_call_operand.vmem [shape: bf16[16,432], index: 0, kind: input, shape index: {}]   ;;  %s706_s3 = inlined_call_operand.vmem [shape: f32[16,1], index: 3, kind: input, shape index: {}]   ;;  %s707_s4 = inlined_call_operand.vmem [shape: bf16[16,128], index: 4, kind: input, shape index: {}]   ;;  %s708_s5 = inlined_call_operand.vmem [shape: bf16[16,128], index: 5, kind: output, shape index: {}]  }
   0x1   :  { %v517_v0 = vld [vmem:[%s703_s1 + $0x38] sm:$0xff]  ;;  %v516_v3 = vld [vmem:[%s703_s1 + $0x30] sm:$0xff]  ;;  %547 = vset.pattern.permute.xlu0 %v549_v6  ;;  %548 = vset.pattern.permute.xlu1 %v549_v6  ;;  %v515_v8 = vld [vmem:[%s703_s1 + $0x28] sm:$0xff] }
   0x2   :  { %v525_v1 = vld [vmem:[%s703_s1 + $0x78] sm:$0xff]  ;;  %272 = vmatpush.bf16.msra.mxu0 %v517_v0  ;;  %v524_v4 = vld [vmem:[%s703_s1 + $0x70] sm:$0xff]  ;;  %v523_v9 = vld [vmem:[%s703_s1 + $0x68] sm:$0xff] }
   0x3   :  { %v533_v2 = vld [vmem:[%s703_s1 + $0xb8] sm:$0xff]  ;;  %286 = vmatpush.bf16.msra.mxu1 %v525_v1  ;;  %v532_v5 = vld [vmem:[%s703_s1 + $0xb0] sm:$0xff]  ;;  %v531_v10 = vld [vmem:[%s703_s1 + $0xa8] sm:$0xff] }
   0x4   :  { %300 = vmatpush.bf16.msra.mxu2 %v533_v2  ;;  %v536_v7 = vld [vmem:[%s703_s1 + $0xd0] sm:$0xff]  ;;  %v535_v11 = vld [vmem:[%s703_s1 + $0xc8] sm:$0xff]  ;;  %v514_v12 = vld [vmem:[%s703_s1 + $0x20] sm:$0xff] }
   0x5   :  { %319 = vmatpush.bf16.msra.mxu3 %v536_v7  ;;  %v522_v13 = vld [vmem:[%s703_s1 + $0x60] sm:$0xff]  ;;  %v507_v17 = vld [vmem:[%s705_s0 + $0xc] sm:$0xf]  ;;  %v393_v18 = vld [vmem:[%s705_s0 + $0x18] sm:$0xf0] }
   0x6   :  { %273 = vmatpush.bf16.msra.mxu0 %v516_v3  ;;  %v530_v14 = vld [vmem:[%s703_s1 + $0xa0] sm:$0xff]  ;;  %v513_v20 = vld [vmem:[%s703_s1 + $0x18] sm:$0xff]  ;;  %v396_v23 = vor.u32 %v507_v17, %v393_v18  ;;  %v338_v24 = vld [vmem:[%s704_s2 + $0x8] sm:$0xff] }
   0x7   :  { %287 = vmatpush.bf16.msra.mxu1 %v524_v4  ;;  %v534_v15 = vld [vmem:[%s703_s1 + $0xc0] sm:$0xff]  ;;  %v521_v21 = vld [vmem:[%s703_s1 + $0x58] sm:$0xff]  ;;  %v512_v25 = vld [vmem:[%s703_s1 + $0x10] sm:$0xff] }
   0x8   :  { %301 = vmatpush.bf16.msra.mxu2 %v532_v5  ;;  %v337_v16 = vld [vmem:[%s704_s2] sm:$0xff]  ;;  %v529_v22 = vld [vmem:[%s703_s1 + $0x98] sm:$0xff]  ;;  %v520_v26 = vld [vmem:[%s703_s1 + $0x50] sm:$0xff] }
   0x9   :  { %320 = vmatpush.bf16.msra.mxu3 %v535_v11  ;;  %341 = vperm.xlu0 %547, %v337_v16   ;;  %v351_v19 = vld [vmem:[%s706_s3] sm:$0xff]  ;;  %v352_v27 = vld [vmem:[%s706_s3 + $0x8] sm:$0xff]  ;;  %v528_v28 = vld [vmem:[%s703_s1 + $0x90] sm:$0xff] }
   0xa   :  { %274 = vmatpush.bf16.msra.mxu0 %v515_v8  ;;  %355 = vperm.xlu1 %548, %v351_v19   ;;  %v511_v29 = vld [vmem:[%s703_s1 + $0x8] sm:$0xff]  ;;  %v510_v32 = vld [vmem:[%s703_s1] sm:$0xff]  ;;  %v508_v35 = vld [vmem:[%s705_s0 + $0xc] sm:$0xf0] }
   0xb   :  { %288 = vmatpush.bf16.msra.mxu1 %v523_v9  ;;  %v519_v30 = vld [vmem:[%s703_s1 + $0x48] sm:$0xff]  ;;  %v518_v33 = vld [vmem:[%s703_s1 + $0x40] sm:$0xff]  ;;  %v385_v37 = vld [vmem:[%s705_s0 + $0x10] sm:$0xf0] }
   0xc   :  { %302 = vmatpush.bf16.msra.mxu2 %v531_v10  ;;  %v527_v31 = vld [vmem:[%s703_s1 + $0x88] sm:$0xff]  ;;  %v383_v34 = vld [vmem:[%s705_s0] sm:$0xf]  ;;  %v506_v36 = vld [vmem:[%s705_s0 + $0x4] sm:$0xf] }
   0xd   :  { %321 = vmatpush.bf16.msra.mxu3 %v534_v15  ;;  %v526_v38 = vld [vmem:[%s703_s1 + $0x80] sm:$0xff]  ;;  %v391_v39 = vld [vmem:[%s705_s0 + $0x8] sm:$0xf]  ;;  %v509_v40 = vld [vmem:[%s705_s0 + $0x14] sm:$0xf0]  ;;  %v384_v41 = vor.u32 %v508_v35, %v383_v34  ;;  %v388_v42 = vor.u32 %v506_v36, %v385_v37 }
   0xe   :  { %275 = vmatpush.bf16.msra.mxu0 %v514_v12  ;;  %v392_v43 = vor.u32 %v509_v40, %v391_v39  ;;  %v538_v57 = vld [vmem:[%s707_s4] sm:$0xff]  }
   0xf   :  { %289 = vmatpush.bf16.msra.mxu1 %v522_v13  ;;  %v539_v62 = vunpack.c.l.bf16 %v538_v57  ;;  %v540_v2 = vunpack.c.h.bf16 %v538_v57 }
  0x10   :  { %303 = vmatpush.bf16.msra.mxu2 %v530_v14  ;;  %505 = vmatmul.msk.bf16.vlgmr.msra.gmra.mxu3 %vm268_vm0, %v396_v23 }
  0x11   :  { %346 = vperm.xlu0 %547, %v338_v24  }
  0x12   :  { %276 = vmatpush.bf16.msra.mxu0 %v513_v20  ;;  %360 = vperm.xlu1 %548, %v352_v27  }
  0x13   :  { %290 = vmatpush.bf16.msra.mxu1 %v521_v21 }
  0x14   :  { %304 = vmatpush.bf16.msra.mxu2 %v529_v22 }
  0x16   :  { %277 = vmatpush.bf16.msra.mxu0 %v512_v25 }
  0x17   :  { %291 = vmatpush.bf16.msra.mxu1 %v520_v26 }
  0x18   :  { %305 = vmatpush.bf16.msra.mxu2 %v528_v28 }
  0x1a   :  { %278 = vmatpush.bf16.msra.mxu0 %v511_v29 }
  0x1b   :  { %292 = vmatpush.bf16.msra.mxu1 %v519_v30 }
  0x1c   :  { %306 = vmatpush.bf16.msra.mxu2 %v527_v31 }
  0x1e   :  { %279 = vmatpush.bf16.msra.mxu0 %v510_v32 }
  0x1f   :  { %293 = vmatpush.bf16.msra.mxu1 %v518_v33 }
  0x20   :  { %307 = vmatpush.bf16.msra.mxu2 %v526_v38 }
  0x21   :  { %280 = vmatmul.bf16.vlgmr.msra.gmra.mxu0 %v384_v41 }
  0x22   :  { %294 = vmatmul.bf16.vlgmr.msra.gmra.mxu1 %v388_v42 }
  0x23   :  { %308 = vmatmul.bf16.vlgmr.msra.gmra.mxu2 %v392_v43 }
  0x7b   :  { %v342_v50 = vpop.permute.xlu0 %341 }
  0x7c   :  { %v356_v51 = vpop.permute.xlu1 %355 }
  0x83   :  { %v347_v0 = vpop.permute.xlu0 %346 }
  0x84   :  { %v361_v3 = vpop.permute.xlu1 %360 }
  0x93   :  { %v323_v47 = vpop.f32.mrf.mxu3 }
  0x9b   :  { %v325_v60 = vpop.f32.mrf.mxu3 }
  0x9e   :  { %v281_v44 = vpop.f32.mrf.mxu0 }
  0x9f   :  { %v295_v45 = vpop.f32.mrf.mxu1 }
  0xa0   :  { %v296_v46 = vadd.f32 %v295_v45, %v281_v44 }
  0xa6   :  { %v309_v48 = vpop.f32.mrf.mxu2  ;;  %v283_v53 = vpop.f32.mrf.mxu0 }
  0xa7   :  { %v310_v49 = vadd.f32 %v309_v48, %v296_v46  ;;  %v297_v54 = vpop.f32.mrf.mxu1 }
  0xa8   :  { %v298_v56 = vadd.f32 %v297_v54, %v283_v53 }
  0xa9   :  { %v324_v52 = vadd.f32 %v323_v47, %v310_v49 }
  0xab   :  { %v349_v55 = vmul.f32 %v342_v50, %v324_v52 }
  0xad   :  { %v363_v61 = vadd.f32 %v356_v51, %v349_v55 }
  0xae   :  { %v311_v58 = vpop.f32.mrf.mxu2 }
  0xaf   :  { %v312_v59 = vadd.f32 %v311_v58, %v298_v56  ;;  %v369_v4 = vadd.f32 %v539_v62, %v363_v61 }
  0xb1   :  { %v326_v63 = vadd.f32 %v325_v60, %v312_v59  ;;  %v371_v7 = vmax.f32 %v369_v4, 0.0 }
  0xb3   :  { %v350_v1 = vmul.f32 %v347_v0, %v326_v63 }
  0xb5   :  { %v364_v5 = vadd.f32 %v361_v3, %v350_v1 }
  0xb7   :  { %v370_v6 = vadd.f32 %v540_v2, %v364_v5 }
  0xb9   :  { %v372_v8 = vmax.f32 %v370_v6, 0.0 }
  0xbb   :  { %v544_v9 = vpack.c.bf16 %v372_v8, %v371_v7 }
  0xbd   :  { %545 = vst [vmem:[%s708_s5] sm:$0xff] %v544_v9  }

// kernel: daft_forward.27
= control target key start
LH: loop header
LB: loop body
LE: loop exit
PB: predicated region body
PF: predicated region fallthrough
CT: control target
= control target key end

     0   :  { %v654_v7 = vmov 0   ;;  %vm292_vm0 = vcmask 392192   ;;  %s841_s1 = inlined_call_operand.vmem [shape: bf16[432,128], index: 1, kind: input, shape index: {}]   ;;  %s842_s0 = inlined_call_operand.vmem [shape: bf16[32,432], index: 0, kind: input, shape index: {}]   ;;  %s843_s2 = inlined_call_operand.vmem [shape: f32[32,1], index: 2, kind: input, shape index: {}]   ;;  %s844_s3 = inlined_call_operand.vmem [shape: f32[32,1], index: 3, kind: input, shape index: {}]   ;;  %s845_s4 = inlined_call_operand.vmem [shape: bf16[32,128], index: 4, kind: output, shape index: {}]  }
   0x1   :  { %v619_v0 = vld [vmem:[%s841_s1 + $0x38] sm:$0xff]  ;;  %v618_v3 = vld [vmem:[%s841_s1 + $0x30] sm:$0xff]  ;;  %652 = vset.pattern.permute.xlu1 %v654_v7  ;;  %651 = vset.pattern.permute.xlu0 %v654_v7  ;;  %v617_v8 = vld [vmem:[%s841_s1 + $0x28] sm:$0xff] }
   0x2   :  { %v627_v1 = vld [vmem:[%s841_s1 + $0x78] sm:$0xff]  ;;  %299 = vmatpush.bf16.msra.mxu0 %v619_v0  ;;  %v626_v4 = vld [vmem:[%s841_s1 + $0x70] sm:$0xff]  ;;  %653 = vset.pattern.permute.xlu2 %v654_v7  ;;  %v625_v9 = vld [vmem:[%s841_s1 + $0x68] sm:$0xff] }
   0x3   :  { %v635_v2 = vld [vmem:[%s841_s1 + $0xb8] sm:$0xff]  ;;  %318 = vmatpush.bf16.msra.mxu1 %v627_v1  ;;  %v634_v5 = vld [vmem:[%s841_s1 + $0xb0] sm:$0xff]  ;;  %v633_v10 = vld [vmem:[%s841_s1 + $0xa8] sm:$0xff] }
   0x4   :  { %337 = vmatpush.bf16.msra.mxu2 %v635_v2  ;;  %v638_v6 = vld [vmem:[%s841_s1 + $0xd0] sm:$0xff]  ;;  %v637_v11 = vld [vmem:[%s841_s1 + $0xc8] sm:$0xff]  ;;  %v616_v12 = vld [vmem:[%s841_s1 + $0x20] sm:$0xff] }
   0x5   :  { %361 = vmatpush.bf16.msra.mxu3 %v638_v6  ;;  %v624_v13 = vld [vmem:[%s841_s1 + $0x60] sm:$0xff]  ;;  %v605_v16 = vld [vmem:[%s842_s0 + $0xc] sm:$0xf]  ;;  %v474_v17 = vld [vmem:[%s842_s0 + $0x18] sm:$0xf0] }
   0x6   :  { %300 = vmatpush.bf16.msra.mxu0 %v618_v3  ;;  %v632_v14 = vld [vmem:[%s841_s1 + $0xa0] sm:$0xff]  ;;  %v392_v18 = vld [vmem:[%s843_s2 + $0x10] sm:$0xff]  ;;  %v615_v20 = vld [vmem:[%s841_s1 + $0x18] sm:$0xff]  ;;  %v477_v23 = vor.u32 %v605_v16, %v474_v17 }
   0x7   :  { %319 = vmatpush.bf16.msra.mxu1 %v626_v4  ;;  %v636_v15 = vld [vmem:[%s841_s1 + $0xc0] sm:$0xff]  ;;  %406 = vperm.xlu1 %652, %v392_v18   ;;  %v623_v21 = vld [vmem:[%s841_s1 + $0x58] sm:$0xff]  ;;  %v614_v24 = vld [vmem:[%s841_s1 + $0x10] sm:$0xff] }
   0x8   :  { %338 = vmatpush.bf16.msra.mxu2 %v634_v5  ;;  %v390_v19 = vld [vmem:[%s843_s2] sm:$0xff]  ;;  %v631_v22 = vld [vmem:[%s841_s1 + $0x98] sm:$0xff]  ;;  %v622_v25 = vld [vmem:[%s841_s1 + $0x50] sm:$0xff] }
   0x9   :  { %362 = vmatpush.bf16.msra.mxu3 %v637_v11  ;;  %396 = vperm.xlu0 %651, %v390_v19   ;;  %v393_v26 = vld [vmem:[%s843_s2 + $0x18] sm:$0xff]  ;;  %v391_v27 = vld [vmem:[%s843_s2 + $0x8] sm:$0xff]  ;;  %v630_v28 = vld [vmem:[%s841_s1 + $0x90] sm:$0xff] }
   0xa   :  { %301 = vmatpush.bf16.msra.mxu0 %v617_v8  ;;  %v418_v29 = vld [vmem:[%s844_s3] sm:$0xff]  ;;  %v613_v30 = vld [vmem:[%s841_s1 + $0x8] sm:$0xff]  ;;  %v606_v36 = vld [vmem:[%s842_s0 + $0xc] sm:$0xf0] }
   0xb   :  { %320 = vmatpush.bf16.msra.mxu1 %v625_v9  ;;  %424 = vperm.xlu2 %653, %v418_v29   ;;  %v621_v31 = vld [vmem:[%s841_s1 + $0x48] sm:$0xff]  ;;  %v612_v33 = vld [vmem:[%s841_s1] sm:$0xff]  ;;  %v466_v39 = vld [vmem:[%s842_s0 + $0x10] sm:$0xf0] }
   0xc   :  { %339 = vmatpush.bf16.msra.mxu2 %v633_v10  ;;  %v629_v32 = vld [vmem:[%s841_s1 + $0x88] sm:$0xff]  ;;  %v620_v34 = vld [vmem:[%s841_s1 + $0x40] sm:$0xff]  ;;  %v421_v40 = vld [vmem:[%s844_s3 + $0x18] sm:$0xff] }
   0xd   :  { %363 = vmatpush.bf16.msra.mxu3 %v636_v15  ;;  %v464_v35 = vld [vmem:[%s842_s0] sm:$0xf]  ;;  %v604_v37 = vld [vmem:[%s842_s0 + $0x4] sm:$0xf]  ;;  %v419_v38 = vld [vmem:[%s844_s3 + $0x8] sm:$0xff] }
   0xe   :  { %302 = vmatpush.bf16.msra.mxu0 %v616_v12  ;;  %v420_v41 = vld [vmem:[%s844_s3 + $0x10] sm:$0xff]  ;;  %v628_v42 = vld [vmem:[%s841_s1 + $0x80] sm:$0xff]  ;;  %v472_v43 = vld [vmem:[%s842_s0 + $0x8] sm:$0xf]  ;;  %v465_v47 = vor.u32 %v606_v36, %v464_v35  ;;  %v469_v48 = vor.u32 %v604_v37, %v466_v39 }
   0xf   :  { %321 = vmatpush.bf16.msra.mxu1 %v624_v13  ;;  %411 = vperm.xlu1 %652, %v393_v26   ;;  %v607_v44 = vld [vmem:[%s842_s0 + $0x14] sm:$0xf0]  ;;  %v609_v45 = vld [vmem:[%s842_s0 + $0x2c] sm:$0xf]  ;;  %v490_v46 = vld [vmem:[%s842_s0 + $0x38] sm:$0xf0] }
  0x10   :  { %340 = vmatpush.bf16.msra.mxu2 %v632_v14  ;;  %602 = vmatmul.msk.bf16.vlgmr.msra.gmra.mxu3 %vm292_vm0, %v477_v23  ;;  %v473_v49 = vor.u32 %v607_v44, %v472_v43  ;;  %v493_v50 = vor.u32 %v609_v45, %v490_v46  ;;  %v480_v51 = vld [vmem:[%s842_s0 + $0x20] sm:$0xf]  ;;  %v610_v52 = vld [vmem:[%s842_s0 + $0x2c] sm:$0xf0]  ;;  %v608_v53 = vld [vmem:[%s842_s0 + $0x24] sm:$0xf] }
  0x11   :  { %401 = vperm.xlu0 %651, %v391_v27   ;;  %v482_v54 = vld [vmem:[%s842_s0 + $0x30] sm:$0xf0]  ;;  %v488_v55 = vld [vmem:[%s842_s0 + $0x28] sm:$0xf]  ;;  %v611_v56 = vld [vmem:[%s842_s0 + $0x34] sm:$0xf0]  ;;  %v481_v57 = vor.u32 %v610_v52, %v480_v51 }
  0x12   :  { %303 = vmatpush.bf16.msra.mxu0 %v615_v20  ;;  %v485_v58 = vor.u32 %v608_v53, %v482_v54  ;;  %v489_v59 = vor.u32 %v611_v56, %v488_v55 }
  0x13   :  { %322 = vmatpush.bf16.msra.mxu1 %v623_v21  ;;  %429 = vperm.xlu2 %653, %v419_v38  }
  0x14   :  { %341 = vmatpush.bf16.msra.mxu2 %v631_v22 }
  0x16   :  { %304 = vmatpush.bf16.msra.mxu0 %v614_v24 }
  0x17   :  { %323 = vmatpush.bf16.msra.mxu1 %v622_v25  ;;  %439 = vperm.xlu1 %652, %v421_v40  }
  0x18   :  { %342 = vmatpush.bf16.msra.mxu2 %v630_v28 }
  0x19   :  { %434 = vperm.xlu0 %651, %v420_v41  }
  0x1a   :  { %305 = vmatpush.bf16.msra.mxu0 %v613_v30 }
  0x1b   :  { %324 = vmatpush.bf16.msra.mxu1 %v621_v31 }
  0x1c   :  { %343 = vmatpush.bf16.msra.mxu2 %v629_v32 }
  0x1e   :  { %306 = vmatpush.bf16.msra.mxu0 %v612_v33 }
  0x1f   :  { %325 = vmatpush.bf16.msra.mxu1 %v620_v34 }
  0x20   :  { %344 = vmatpush.bf16.msra.mxu2 %v628_v42  ;;  %603 = vmatmul.msk.bf16.gmra.mxu3 %vm292_vm0, %v493_v50 }
  0x21   :  { %307 = vmatmul.bf16.vlgmr.msra.gmra.mxu0 %v465_v47 }
  0x22   :  { %326 = vmatmul.bf16.vlgmr.msra.gmra.mxu1 %v469_v48 }
  0x23   :  { %345 = vmatmul.bf16.vlgmr.msra.gmra.mxu2 %v473_v49 }
  0x31   :  { %312 = vmatmul.bf16.gmra.mxu0 %v481_v57 }
  0x32   :  { %331 = vmatmul.bf16.gmra.mxu1 %v485_v58 }
  0x33   :  { %350 = vmatmul.bf16.gmra.mxu2 %v489_v59 }
  0x65   :  { %v425_v5 = vpop.permute.xlu2 %424 }
  0x6d   :  { %v430_v17 = vpop.permute.xlu2 %429 }
  0x79   :  { %v407_v10 = vpop.permute.xlu1 %406 }
  0x7b   :  { %v397_v4 = vpop.permute.xlu0 %396 }
  0x81   :  { %v412_v27 = vpop.permute.xlu1 %411 }
  0x83   :  { %v402_v16 = vpop.permute.xlu0 %401 }
  0x89   :  { %v440_v41 = vpop.permute.xlu1 %439 }
  0x8b   :  { %v435_v38 = vpop.permute.xlu0 %434 }
  0x93   :  { %v365_v62 = vpop.f32.mrf.mxu3 }
  0x9b   :  { %v367_v7 = vpop.f32.mrf.mxu3 }
  0x9e   :  { %v308_v60 = vpop.f32.mrf.mxu0 }
  0x9f   :  { %v327_v61 = vpop.f32.mrf.mxu1 }
  0xa0   :  { %v328_v63 = vadd.f32 %v327_v61, %v308_v60 }
  0xa3   :  { %v370_v22 = vpop.f32.mrf.mxu3 }
  0xa6   :  { %v346_v0 = vpop.f32.mrf.mxu2  ;;  %v310_v2 = vpop.f32.mrf.mxu0 }
  0xa7   :  { %v347_v1 = vadd.f32 %v346_v0, %v328_v63  ;;  %v329_v3 = vpop.f32.mrf.mxu1 }
  0xa8   :  { %v330_v8 = vadd.f32 %v329_v3, %v310_v2 }
  0xa9   :  { %v366_v6 = vadd.f32 %v365_v62, %v347_v1 }
  0xab   :  { %v414_v11 = vmul.f32 %v397_v4, %v366_v6  ;;  %v372_v36 = vpop.f32.mrf.mxu3 }
  0xad   :  { %v442_v18 = vadd.f32 %v425_v5, %v414_v11 }
  0xae   :  { %v348_v9 = vpop.f32.mrf.mxu2  ;;  %v313_v13 = vpop.f32.mrf.mxu0 }
  0xaf   :  { %v349_v12 = vadd.f32 %v348_v9, %v330_v8  ;;  %v332_v14 = vpop.f32.mrf.mxu1  ;;  %v446_v24 = vmax.f32 %v442_v18, 0.0 }
  0xb0   :  { %v333_v19 = vadd.f32 %v332_v14, %v313_v13 }
  0xb1   :  { %v368_v15 = vadd.f32 %v367_v7, %v349_v12 }
  0xb3   :  { %v415_v20 = vmul.f32 %v402_v16, %v368_v15 }
  0xb5   :  { %v443_v21 = vadd.f32 %v430_v17, %v415_v20 }
  0xb6   :  { %v351_v23 = vpop.f32.mrf.mxu2  ;;  %v315_v29 = vpop.f32.mrf.mxu0 }
  0xb7   :  { %v447_v25 = vmax.f32 %v443_v21, 0.0  ;;  %v352_v26 = vadd.f32 %v351_v23, %v333_v19  ;;  %v334_v30 = vpop.f32.mrf.mxu1 }
  0xb8   :  { %v335_v32 = vadd.f32 %v334_v30, %v315_v29 }
  0xb9   :  { %v642_v28 = vpack.c.bf16 %v447_v25, %v446_v24  ;;  %v371_v31 = vadd.f32 %v370_v22, %v352_v26 }
  0xbb   :  { %643 = vst [vmem:[%s845_s4] sm:$0xff] %v642_v28   ;;  %v416_v34 = vmul.f32 %v407_v10, %v371_v31 }
  0xbd   :  { %v444_v39 = vadd.f32 %v435_v38, %v416_v34 }
  0xbe   :  { %v353_v33 = vpop.f32.mrf.mxu2 }
  0xbf   :  { %v354_v35 = vadd.f32 %v353_v33, %v335_v32  ;;  %v448_v43 = vmax.f32 %v444_v39, 0.0 }
  0xc1   :  { %v373_v37 = vadd.f32 %v372_v36, %v354_v35 }
  0xc3   :  { %v417_v40 = vmul.f32 %v412_v27, %v373_v37 }
  0xc5   :  { %v445_v42 = vadd.f32 %v440_v41, %v417_v40 }
  0xc7   :  { %v449_v44 = vmax.f32 %v445_v42, 0.0 }
  0xc9   :  { %v647_v45 = vpack.c.bf16 %v449_v44, %v448_v43 }
  0xcb   :  { %649 = vst [vmem:[%s845_s4 + $0x8] sm:$0xff] %v647_v45  }

// kernel: daft_forward.28
= control target key start
LH: loop header
LB: loop body
LE: loop exit
PB: predicated region body
PF: predicated region fallthrough
CT: control target
= control target key end

     0   :  { %v194_v0 = vmov 0   ;;  %vm52_vm0 = vcmask 130048   ;;  %s259_s2 = inlined_call_operand.vmem [shape: f32[32,1], index: 2, kind: input, shape index: {}]   ;;  %s260_s1 = inlined_call_operand.vmem [shape: bf16[16,128], index: 1, kind: input, shape index: {}]   ;;  %s261_s0 = inlined_call_operand.vmem [shape: bf16[32,16], index: 0, kind: input, shape index: {}]   ;;  %s262_s3 = inlined_call_operand.vmem [shape: f32[32,1], index: 3, kind: input, shape index: {}]   ;;  %s263_s4 = inlined_call_operand.vmem [shape: bf16[32,128], index: 4, kind: output, shape index: {}]  }
   0x1   :  { %192 = vset.pattern.permute.xlu1 %v194_v0  ;;  %191 = vset.pattern.permute.xlu0 %v194_v0  ;;  %v95_v1 = vld [vmem:[%s259_s2 + $0x10] sm:$0xff]  ;;  %v93_v2 = vld [vmem:[%s259_s2] sm:$0xff]  ;;  %v176_v5 = vld [vmem:[%s261_s0 + $0x8] sm:$0xff] }
   0x2   :  { %v177_v3 = vld [vmem:[%s260_s1] sm:$0xff]  ;;  %109 = vperm.xlu1 %192, %v95_v1   ;;  %99 = vperm.xlu0 %191, %v93_v2   ;;  %v96_v7 = vld [vmem:[%s259_s2 + $0x18] sm:$0xff]  ;;  %v94_v8 = vld [vmem:[%s259_s2 + $0x8] sm:$0xff] }
   0x3   :  { %v175_v4 = vld [vmem:[%s261_s0] sm:$0xff]  ;;  %66 = vmatpush.bf16.msra.mxu0 %v177_v3  ;;  %189 = vmatpush.bf16.msra.mxu1 %v177_v3  ;;  %v122_v9 = vld [vmem:[%s262_s3 + $0x8] sm:$0xff]  ;;  %v124_v10 = vld [vmem:[%s262_s3 + $0x18] sm:$0xff] }
   0x4   :  { %193 = vset.pattern.permute.xlu2 %v194_v0  ;;  %v121_v6 = vld [vmem:[%s262_s3] sm:$0xff]  ;;  %v123_v11 = vld [vmem:[%s262_s3 + $0x10] sm:$0xff] }
   0x5   :  { %127 = vperm.xlu2 %193, %v121_v6  }
   0x6   :  { %173 = vmatmul.msk.bf16.vlgmr.msra.gmra.mxu0 %vm52_vm0, %v175_v4  ;;  %174 = vmatmul.msk.bf16.vlgmr.msra.gmra.mxu1 %vm52_vm0, %v176_v5 }
   0xa   :  { %114 = vperm.xlu1 %192, %v96_v7   ;;  %104 = vperm.xlu0 %191, %v94_v8  }
   0xd   :  { %132 = vperm.xlu2 %193, %v122_v9  }
  0x12   :  { %142 = vperm.xlu1 %192, %v124_v10   ;;  %137 = vperm.xlu0 %191, %v123_v11  }
  0x5f   :  { %v128_v16 = vpop.permute.xlu2 %127 }
  0x67   :  { %v133_v27 = vpop.permute.xlu2 %132 }
  0x74   :  { %v100_v12 = vpop.permute.xlu0 %99  ;;  %v110_v13 = vpop.permute.xlu1 %109 }
  0x7c   :  { %v105_v14 = vpop.permute.xlu0 %104  ;;  %v115_v15 = vpop.permute.xlu1 %114 }
  0x83   :  { %v68_v17 = vpop.f32.mrf.mxu0  ;;  %v73_v18 = vpop.f32.mrf.mxu1 }
  0x84   :  { %v138_v19 = vpop.permute.xlu0 %137  ;;  %v117_v20 = vmul.f32 %v100_v12, %v68_v17  ;;  %v119_v21 = vmul.f32 %v110_v13, %v73_v18  ;;  %v143_v26 = vpop.permute.xlu1 %142 }
  0x86   :  { %v145_v28 = vadd.f32 %v128_v16, %v117_v20  ;;  %v147_v29 = vadd.f32 %v138_v19, %v119_v21 }
  0x8b   :  { %v70_v22 = vpop.f32.mrf.mxu0  ;;  %v75_v23 = vpop.f32.mrf.mxu1 }
  0x8c   :  { %v118_v24 = vmul.f32 %v105_v14, %v70_v22  ;;  %v120_v25 = vmul.f32 %v115_v15, %v75_v23 }
  0x8e   :  { %v146_v30 = vadd.f32 %v133_v27, %v118_v24  ;;  %v148_v31 = vadd.f32 %v143_v26, %v120_v25 }
  0x90   :  { %v181_v32 = vpack.c.bf16 %v146_v30, %v145_v28  ;;  %v186_v33 = vpack.c.bf16 %v148_v31, %v147_v29 }
  0x92   :  { %182 = vst [vmem:[%s263_s4] sm:$0xff] %v181_v32  }
  0x93   :  { %188 = vst [vmem:[%s263_s4 + $0x8] sm:$0xff] %v186_v33  }

// kernel: daft_forward.29
= control target key start
LH: loop header
LB: loop body
LE: loop exit
PB: predicated region body
PF: predicated region fallthrough
CT: control target
= control target key end

     0   :  { %s1257_s18 = smov 0   ;;  %s1259_s19 = smov 0   ;;  %s1412_s0 = inlined_call_operand.vmem [shape: bf16[32,1024], index: 0, kind: input, shape index: {}]   ;;  %s1413_s1 = inlined_call_operand.vmem [shape: bf16[1024,128], index: 1, kind: input, shape index: {}]   ;;  %s1414_s2 = inlined_call_operand.vmem [shape: f32[32,1], index: 2, kind: input, shape index: {}]   ;;  %s1415_s3 = inlined_call_operand.vmem [shape: f32[32,1], index: 3, kind: input, shape index: {}]   ;;  %s1416_s4 = inlined_call_operand.vmem [shape: bf16[32,128], index: 4, kind: input, shape index: {}]   ;;  %s1417_s5 = inlined_call_operand.vmem [shape: bf16[32,128], index: 5, kind: output, shape index: {}]  }
   0x1   :  { %s1261_s20 = smov 0   ;;  %s1263_s21 = smov 0  }
   0x2   :  { %s1265_s22 = smov 0  }
   0x3 LB: > { %s24_s23 = sadd.s32 1, %s1219_s21  ;;  %p41_p1 = scmp.ne.s32.totalorder %s1211_s19, %s1207_s18  ;;  %s1223_s22 = sphi %s1265_s22, %s15_s22   ;;  %s1219_s21 = sphi %s1263_s21, %s1421_s21   ;;  %s1215_s20 = sphi %s1261_s20, %s1420_s20   ;;  %s1211_s19 = sphi %s1259_s19, %s1419_s19   ;;  %s1207_s18 = sphi %s1257_s18, %s1418_s18  }
   0x4   : > { %p25_p0 = scmp.ge.s32.totalorder %s24_s23, 2  ;;  %p42_p2 = scmp.eq.s32.totalorder %s1223_s22, 0 }
   0x5   : > { %s34_s25 = sadd.s32 1, %s1211_s19  ;;  %p906_p5 = scmp.ge.s32.totalorder %s1223_s22, 2 }
   0x6   : > { %s1423_s23 = smov (%p25_p0, %s24_s23), 0  ;;  %p43_p3 = por %p42_p2, %p41_p1 }
   0x7   : > { %s31_s24 = ssub.s32 %s1219_s21, %s1423_s23  ;;  %202 = sbr.rel (%p906_p5) target bundleno = 24 (0x18), region = 28 }
   0x8   : > { %p32_p4 = scmp.eq.s32.totalorder %s31_s24, 0 }
   0xa   : > { %s1292_s26 = scalar_select %p32_p4, %s1211_s19, %s34_s25  }
   0xc   : > { %205 = sbr.rel (!%p43_p3) target bundleno = 24 (0x18), region = 32  ;;  %s207_s27 = sand.u32 (%p43_p3), 1, %s1211_s19  }
   0xd   : > { %s1079_s28 = sshll.u32 (%p43_p3), %s1219_s21, 4  ;;  %s907_s29 = sshll.u32 (%p43_p3), %s207_s27, 6 }
   0xe   : > { %s212_s7 = scalar_lea.vmem (%p43_p3), %s1412_s0, %s1079_s28  ;;  %s209_s8 = scalar_lea.vmem (%p43_p3), [#allocation3], %s907_s29 }
   0xf   : > { %v225_v0 = vld [vmem:[%s212_s7] sm:$0xff] (%p43_p3)  ;;  %v227_v1 = vld [vmem:[%s212_s7 + $0x8] sm:$0xff] (%p43_p3) }
  0x10   : > { %v229_v2 = vld [vmem:[%s212_s7 + $0x20] sm:$0xff] (%p43_p3)  ;;  %226 = vst [vmem:[%s209_s8] sm:$0xff] (%p43_p3), %v225_v0  ;;  %v231_v3 = vld [vmem:[%s212_s7 + $0x28] sm:$0xff] (%p43_p3) }
  0x11   : > { %228 = vst [vmem:[%s209_s8 + $0x8] sm:$0xff] %v227_v1  ;;  %v233_v4 = vld [vmem:[%s212_s7 + $0x40] sm:$0xff]  ;;  %v235_v5 = vld [vmem:[%s212_s7 + $0x48] sm:$0xff] }
  0x12   : > { %230 = vst [vmem:[%s209_s8 + $0x10] sm:$0xff] %v229_v2  ;;  %v237_v6 = vld [vmem:[%s212_s7 + $0x60] sm:$0xff]  ;;  %v239_v7 = vld [vmem:[%s212_s7 + $0x68] sm:$0xff] }
  0x13   : > { %232 = vst [vmem:[%s209_s8 + $0x18] sm:$0xff] %v231_v3 }
  0x14   : > { %234 = vst [vmem:[%s209_s8 + $0x20] sm:$0xff] %v233_v4 }
  0x15   : > { %236 = vst [vmem:[%s209_s8 + $0x28] sm:$0xff] %v235_v5 }
  0x16   : > { %238 = vst [vmem:[%s209_s8 + $0x30] sm:$0xff] %v237_v6 }
  0x17   : > { %240 = vst [vmem:[%s209_s8 + $0x38] sm:$0xff] %v239_v7 }
  0x18 PF: > { %p910_p6 = scmp.ge.s32.totalorder %s1223_s22, 1  ;;  %p257_p7 = scmp.lt.s32.totalorder %s1223_s22, 3 }
  0x1a   : > { %p258_p8 = pnand %p910_p6, %p257_p7 }
  0x1b   : > { %s264_s9 = sand.u32 (!%p258_p8), 1, %s1207_s18   ;;  %s912_s10 = sshll.u32 (!%p258_p8), %s1215_s20, 6 }
  0x1c   : > { %261 = sbr.rel (%p258_p8) target bundleno = 382 (0x17e), region = 59  ;;  %s911_s11 = sshll.u32 (!%p258_p8), %s264_s9, 6 }
  0x1d   : > { %p304_p9 = scmp.lt.s32.totalorder (!%p258_p8), %s912_s10, 127  ;;  %s1309_s16 = scalar_lea.vmem (!%p258_p8), [#allocation3], %s911_s11 }
  0x1e   : > { %p914_p10 = scmp.ne.s32.totalorder (!%p258_p8), %s1215_s20, 0 }
  0x21   : > { %s1425_s10 = smov (!%p304_p9, %s912_s10), 127  ;;  %323 = sbr.rel (%p914_p10) target bundleno = 43 (0x2b), region = 67 }
  0x22   : > { %s913_s12 = sshll.u32 %s1425_s10, 2 }
  0x23   : > { %s1307_s15 = scalar_lea.vmem %s1413_s1, %s913_s12 }
  0x26   : > { %v1225_v8 = vmov 0.0  }
  0x27   : > { %324 = vst [vmem:[#allocation2 + $0x10] sm:$0xff] %v1225_v8 }
  0x28   : > { %325 = vst [vmem:[#allocation2] sm:$0xff] %v1225_v8 }
  0x29   : > { %326 = vst [vmem:[#allocation2 + $0x18] sm:$0xff] %v1225_v8 }
  0x2a   : > { %327 = vst [vmem:[#allocation2 + $0x8] sm:$0xff] %v1225_v8 }
  0x2b PF: > { %v1095_v9 = vld [vmem:[%s1307_s15 + $0x38] sm:$0xff]  ;;  %v1094_v13 = vld [vmem:[%s1307_s15 + $0x30] sm:$0xff]  ;;  %v1093_v17 = vld [vmem:[%s1307_s15 + $0x28] sm:$0xff]  ;;  %p1075_p11 = scmp.ne.s32.totalorder %s1215_s20, 1 }
  0x2c   : > { %v1103_v10 = vld [vmem:[%s1307_s15 + $0x78] sm:$0xff]  ;;  %636 = vmatpush.bf16.msra.mxu0 %v1095_v9  ;;  %v1102_v14 = vld [vmem:[%s1307_s15 + $0x70] sm:$0xff]  ;;  %v1101_v18 = vld [vmem:[%s1307_s15 + $0x68] sm:$0xff] }
  0x2d   : > { %v1111_v11 = vld [vmem:[%s1307_s15 + $0xb8] sm:$0xff]  ;;  %655 = vmatpush.bf16.msra.mxu1 %v1103_v10  ;;  %v1110_v15 = vld [vmem:[%s1307_s15 + $0xb0] sm:$0xff]  ;;  %v1109_v19 = vld [vmem:[%s1307_s15 + $0xa8] sm:$0xff] }
  0x2e   : > { %v1119_v12 = vld [vmem:[%s1307_s15 + $0xf8] sm:$0xff]  ;;  %674 = vmatpush.bf16.msra.mxu2 %v1111_v11  ;;  %v1118_v16 = vld [vmem:[%s1307_s15 + $0xf0] sm:$0xff]  ;;  %v1117_v20 = vld [vmem:[%s1307_s15 + $0xe8] sm:$0xff] }
  0x2f   : > { %693 = vmatpush.bf16.msra.mxu3 %v1119_v12  ;;  %v1092_v21 = vld [vmem:[%s1307_s15 + $0x20] sm:$0xff]  ;;  %v1091_v25 = vld [vmem:[%s1307_s15 + $0x18] sm:$0xff]  ;;  %v1090_v29 = vld [vmem:[%s1307_s15 + $0x10] sm:$0xff] }
  0x30   : > { %637 = vmatpush.bf16.msra.mxu0 %v1094_v13  ;;  %v1100_v22 = vld [vmem:[%s1307_s15 + $0x60] sm:$0xff]  ;;  %v1099_v26 = vld [vmem:[%s1307_s15 + $0x58] sm:$0xff]  ;;  %v1098_v30 = vld [vmem:[%s1307_s15 + $0x50] sm:$0xff] }
  0x31   : > { %656 = vmatpush.bf16.msra.mxu1 %v1102_v14  ;;  %v1108_v23 = vld [vmem:[%s1307_s15 + $0xa0] sm:$0xff]  ;;  %v1107_v27 = vld [vmem:[%s1307_s15 + $0x98] sm:$0xff]  ;;  %v1106_v31 = vld [vmem:[%s1307_s15 + $0x90] sm:$0xff] }
  0x32   : > { %675 = vmatpush.bf16.msra.mxu2 %v1110_v15  ;;  %v1116_v24 = vld [vmem:[%s1307_s15 + $0xe0] sm:$0xff]  ;;  %v1115_v28 = vld [vmem:[%s1307_s15 + $0xd8] sm:$0xff]  ;;  %v1114_v32 = vld [vmem:[%s1307_s15 + $0xd0] sm:$0xff] }
  0x33   : > { %694 = vmatpush.bf16.msra.mxu3 %v1118_v16  ;;  %v1089_v33 = vld [vmem:[%s1307_s15 + $0x8] sm:$0xff]  ;;  %v1088_v37 = vld [vmem:[%s1307_s15] sm:$0xff]  ;;  %v1082_v42 = vld [vmem:[%s1309_s16 + $0xc] sm:$0xf0] }
  0x34   : > { %638 = vmatpush.bf16.msra.mxu0 %v1093_v17  ;;  %v1097_v34 = vld [vmem:[%s1307_s15 + $0x48] sm:$0xff]  ;;  %v1096_v38 = vld [vmem:[%s1307_s15 + $0x40] sm:$0xff]  ;;  %v919_v44 = vld [vmem:[%s1309_s16 + $0x10] sm:$0xf0] }
  0x35   : > { %657 = vmatpush.bf16.msra.mxu1 %v1101_v18  ;;  %v1105_v35 = vld [vmem:[%s1307_s15 + $0x88] sm:$0xff]  ;;  %v1104_v39 = vld [vmem:[%s1307_s15 + $0x80] sm:$0xff]  ;;  %v1083_v46 = vld [vmem:[%s1309_s16 + $0x14] sm:$0xf0] }
  0x36   : > { %676 = vmatpush.bf16.msra.mxu2 %v1109_v19  ;;  %v1113_v36 = vld [vmem:[%s1307_s15 + $0xc8] sm:$0xff]  ;;  %v1112_v40 = vld [vmem:[%s1307_s15 + $0xc0] sm:$0xff]  ;;  %v927_v48 = vld [vmem:[%s1309_s16 + $0x18] sm:$0xf0] }
  0x37   : > { %695 = vmatpush.bf16.msra.mxu3 %v1117_v20  ;;  %v917_v41 = vld [vmem:[%s1309_s16] sm:$0xf]  ;;  %v1080_v43 = vld [vmem:[%s1309_s16 + $0x4] sm:$0xf]  ;;  %v925_v45 = vld [vmem:[%s1309_s16 + $0x8] sm:$0xf] }
  0x38   : > { %639 = vmatpush.bf16.msra.mxu0 %v1092_v21  ;;  %v1081_v47 = vld [vmem:[%s1309_s16 + $0xc] sm:$0xf]  ;;  %v918_v49 = vor.u32 %v1082_v42, %v917_v41  ;;  %v922_v50 = vor.u32 %v1080_v43, %v919_v44  ;;  %v926_v51 = vor.u32 %v1083_v46, %v925_v45  ;;  %v933_v53 = vld [vmem:[%s1309_s16 + $0x20] sm:$0xf]  ;;  %v1086_v54 = vld [vmem:[%s1309_s16 + $0x2c] sm:$0xf0] }
  0x39   : > { %658 = vmatpush.bf16.msra.mxu1 %v1100_v22  ;;  %v930_v52 = vor.u32 %v1081_v47, %v927_v48  ;;  %v1084_v55 = vld [vmem:[%s1309_s16 + $0x24] sm:$0xf]  ;;  %v935_v56 = vld [vmem:[%s1309_s16 + $0x30] sm:$0xf0]  ;;  %v941_v57 = vld [vmem:[%s1309_s16 + $0x28] sm:$0xf]  ;;  %v934_v61 = vor.u32 %v1086_v54, %v933_v53 }
  0x3a   : > { %677 = vmatpush.bf16.msra.mxu2 %v1108_v23  ;;  %v1087_v58 = vld [vmem:[%s1309_s16 + $0x34] sm:$0xf0]  ;;  %v1085_v59 = vld [vmem:[%s1309_s16 + $0x2c] sm:$0xf]  ;;  %v943_v60 = vld [vmem:[%s1309_s16 + $0x38] sm:$0xf0]  ;;  %v938_v62 = vor.u32 %v1084_v55, %v935_v56 }
  0x3b   : > { %696 = vmatpush.bf16.msra.mxu3 %v1116_v24  ;;  %v942_v63 = vor.u32 %v1087_v58, %v941_v57  ;;  %v946_v0 = vor.u32 %v1085_v59, %v943_v60  ;;  %v328_v9 = vld [vmem:[#allocation2 + $0x10] sm:$0xff]  ;;  %v329_v16 = vld [vmem:[#allocation2] sm:$0xff] }
  0x3c   : > { %640 = vmatpush.bf16.msra.mxu0 %v1091_v25  ;;  %v330_v25 = vld [vmem:[#allocation2 + $0x18] sm:$0xff] }
  0x3d   : > { %659 = vmatpush.bf16.msra.mxu1 %v1099_v26 }
  0x3e   : > { %678 = vmatpush.bf16.msra.mxu2 %v1107_v27 }
  0x3f   : > { %697 = vmatpush.bf16.msra.mxu3 %v1115_v28 }
  0x40   : > { %641 = vmatpush.bf16.msra.mxu0 %v1090_v29 }
  0x41   : > { %660 = vmatpush.bf16.msra.mxu1 %v1098_v30 }
  0x42   : > { %679 = vmatpush.bf16.msra.mxu2 %v1106_v31 }
  0x43   : > { %698 = vmatpush.bf16.msra.mxu3 %v1114_v32 }
  0x44   : > { %642 = vmatpush.bf16.msra.mxu0 %v1089_v33  ;;  %v331_v33 = vld [vmem:[#allocation2 + $0x8] sm:$0xff] }
  0x45   : > { %661 = vmatpush.bf16.msra.mxu1 %v1097_v34 }
  0x46   : > { %680 = vmatpush.bf16.msra.mxu2 %v1105_v35 }
  0x47   : > { %699 = vmatpush.bf16.msra.mxu3 %v1113_v36 }
  0x48   : > { %643 = vmatpush.bf16.msra.mxu0 %v1088_v37 }
  0x49   : > { %662 = vmatpush.bf16.msra.mxu1 %v1096_v38 }
  0x4a   : > { %681 = vmatpush.bf16.msra.mxu2 %v1104_v39 }
  0x4b   : > { %700 = vmatpush.bf16.msra.mxu3 %v1112_v40  ;;  %644 = vmatmul.bf16.vlgmr.msra.gmra.mxu0 %v918_v49 }
  0x4c   : > { %663 = vmatmul.bf16.vlgmr.msra.gmra.mxu1 %v922_v50 }
  0x4d   : > { %682 = vmatmul.bf16.vlgmr.msra.gmra.mxu2 %v926_v51 }
  0x4e   : > { %701 = vmatmul.bf16.vlgmr.msra.gmra.mxu3 %v930_v52 }
  0x5b   : > { %649 = vmatmul.bf16.gmra.mxu0 %v934_v61 }
  0x5c   : > { %668 = vmatmul.bf16.gmra.mxu1 %v938_v62 }
  0x5d   : > { %687 = vmatmul.bf16.gmra.mxu2 %v942_v63 }
  0x5e   : > { %706 = vmatmul.bf16.gmra.mxu3 %v946_v0 }
  0xc8   : > { %v645_v1 = vpop.f32.mrf.mxu0 }
  0xc9   : > { %v664_v2 = vpop.f32.mrf.mxu1 }
  0xca   : > { %v665_v3 = vadd.f32 %v664_v2, %v645_v1 }
  0xd0   : > { %v683_v4 = vpop.f32.mrf.mxu2  ;;  %v647_v7 = vpop.f32.mrf.mxu0 }
  0xd1   : > { %v702_v5 = vpop.f32.mrf.mxu3  ;;  %v684_v6 = vadd.f32 %v683_v4, %v665_v3  ;;  %v666_v8 = vpop.f32.mrf.mxu1 }
  0xd2   : > { %v667_v12 = vadd.f32 %v666_v8, %v647_v7 }
  0xd3   : > { %v703_v10 = vadd.f32 %v702_v5, %v684_v6 }
  0xd5   : > { %v712_v11 = vadd.f32 %v703_v10, %v328_v9 }
  0xd7   : > { %716 = vst [vmem:[#allocation2 + $0x10] sm:$0xff] %v712_v11 }
  0xd8   : > { %v685_v13 = vpop.f32.mrf.mxu2  ;;  %v650_v17 = vpop.f32.mrf.mxu0 }
  0xd9   : > { %v704_v14 = vpop.f32.mrf.mxu3  ;;  %v686_v15 = vadd.f32 %v685_v13, %v667_v12  ;;  %v669_v18 = vpop.f32.mrf.mxu1 }
  0xda   : > { %v670_v21 = vadd.f32 %v669_v18, %v650_v17 }
  0xdb   : > { %v705_v19 = vadd.f32 %v704_v14, %v686_v15 }
  0xdd   : > { %v713_v20 = vadd.f32 %v705_v19, %v329_v16 }
  0xdf   : > { %717 = vst [vmem:[#allocation2] sm:$0xff] %v713_v20 }
  0xe0   : > { %v688_v22 = vpop.f32.mrf.mxu2  ;;  %v652_v27 = vpop.f32.mrf.mxu0 }
  0xe1   : > { %v707_v23 = vpop.f32.mrf.mxu3  ;;  %v689_v24 = vadd.f32 %v688_v22, %v670_v21  ;;  %v671_v28 = vpop.f32.mrf.mxu1 }
  0xe2   : > { %v672_v30 = vadd.f32 %v671_v28, %v652_v27 }
  0xe3   : > { %v708_v26 = vadd.f32 %v707_v23, %v689_v24 }
  0xe5   : > { %v714_v29 = vadd.f32 %v708_v26, %v330_v25 }
  0xe7   : > { %718 = vst [vmem:[#allocation2 + $0x18] sm:$0xff] %v714_v29 }
  0xe8   : > { %v690_v31 = vpop.f32.mrf.mxu2 }
  0xe9   : > { %v691_v32 = vadd.f32 %v690_v31, %v672_v30  ;;  %v709_v34 = vpop.f32.mrf.mxu3 }
  0xeb   : > { %v710_v35 = vadd.f32 %v709_v34, %v691_v32  ;;  %723 = sbr.rel (%p1075_p11) target bundleno = 382 (0x17e), region = 71 }
  0xed   : > { %v715_v36 = vadd.f32 %v710_v35, %v331_v33 }
  0xef   : > { %719 = vst [vmem:[#allocation2 + $0x8] sm:$0xff] %v715_v36 }
  0xf0   : > { %v730_v37 = vld [vmem:[%s1414_s2 + $0x10] sm:$0xff]  ;;  %v728_v38 = vld [vmem:[%s1414_s2] sm:$0xff]  ;;  %v1226_v39 = vmov 0   ;;  %v731_v41 = vld [vmem:[%s1414_s2 + $0x18] sm:$0xff] }
  0xf1   : > { %1183 = vset.pattern.permute.xlu1 %v1226_v39  ;;  %1182 = vset.pattern.permute.xlu0 %v1226_v39  ;;  %v756_v40 = vld [vmem:[%s1415_s3] sm:$0xff]  ;;  %v729_v42 = vld [vmem:[%s1414_s2 + $0x8] sm:$0xff]  ;;  %v759_v44 = vld [vmem:[%s1415_s3 + $0x18] sm:$0xff] }
  0xf2   : > { %744 = vperm.xlu1 %1183, %v730_v37   ;;  %734 = vperm.xlu0 %1182, %v728_v38   ;;  %v757_v43 = vld [vmem:[%s1415_s3 + $0x8] sm:$0xff]  ;;  %v758_v45 = vld [vmem:[%s1415_s3 + $0x10] sm:$0xff]  ;;  %v1121_v51 = vld [vmem:[%s1416_s4] sm:$0xff]  }
  0xf3   : > { %1184 = vset.pattern.permute.xlu2 %v1226_v39  ;;  %v724_v49 = vld [vmem:[#allocation2 + $0x10] sm:$0xff]  ;;  %v725_v52 = vld [vmem:[#allocation2] sm:$0xff]  ;;  %v1122_v53 = vunpack.c.l.bf16 %v1121_v51  ;;  %v1123_v57 = vunpack.c.h.bf16 %v1121_v51  ;;  %v1138_v62 = vld [vmem:[%s1416_s4 + $0x8] sm:$0xff]  }
  0xf4   : > { %762 = vperm.xlu2 %1184, %v756_v40   ;;  %v726_v63 = vld [vmem:[#allocation2 + $0x18] sm:$0xff]  ;;  %v1127_v2 = vunpack.c.h.bf16 %v1138_v62  ;;  %v1126_v3 = vunpack.c.l.bf16 %v1138_v62 }
  0xf6   : > { %v727_v0 = vld [vmem:[#allocation2 + $0x8] sm:$0xff] }
  0xfa   : > { %749 = vperm.xlu1 %1183, %v731_v41   ;;  %739 = vperm.xlu0 %1182, %v729_v42  }
  0xfc   : > { %767 = vperm.xlu2 %1184, %v757_v43  }
 0x102   : > { %777 = vperm.xlu1 %1183, %v759_v44   ;;  %772 = vperm.xlu0 %1182, %v758_v45  }
 0x14e   : > { %v763_v46 = vpop.permute.xlu2 %762 }
 0x156   : > { %v768_v59 = vpop.permute.xlu2 %767 }
 0x164   : > { %v745_v47 = vpop.permute.xlu1 %744  ;;  %v735_v48 = vpop.permute.xlu0 %734 }
 0x165   : > { %v752_v50 = vmul.f32 %v735_v48, %v724_v49  ;;  %v754_v4 = vmul.f32 %v745_v47, %v726_v63 }
 0x167   : > { %v780_v54 = vadd.f32 %v763_v46, %v752_v50 }
 0x169   : > { %v792_v60 = vadd.f32 %v1122_v53, %v780_v54 }
 0x16b   : > { %v796_v5 = vmax.f32 %v792_v60, 0.0 }
 0x16c   : > { %v750_v55 = vpop.permute.xlu1 %749  ;;  %v740_v56 = vpop.permute.xlu0 %739 }
 0x16d   : > { %v753_v58 = vmul.f32 %v740_v56, %v725_v52  ;;  %v755_v6 = vmul.f32 %v750_v55, %v727_v0 }
 0x16f   : > { %v781_v61 = vadd.f32 %v768_v59, %v753_v58 }
 0x171   : > { %v793_v1 = vadd.f32 %v1123_v57, %v781_v61 }
 0x173   : > { %v797_v7 = vmax.f32 %v793_v1, 0.0 }
 0x174   : > { %v778_v8 = vpop.permute.xlu1 %777  ;;  %v773_v9 = vpop.permute.xlu0 %772 }
 0x175   : > { %v1131_v10 = vpack.c.bf16 %v797_v7, %v796_v5  ;;  %v783_v11 = vadd.f32 %v778_v8, %v755_v6  ;;  %v782_v12 = vadd.f32 %v773_v9, %v754_v4 }
 0x177   : > { %1132 = vst [vmem:[%s1417_s5] sm:$0xff] %v1131_v10   ;;  %v795_v13 = vadd.f32 %v1127_v2, %v783_v11  ;;  %v794_v14 = vadd.f32 %v1126_v3, %v782_v12 }
 0x179   : > { %v799_v15 = vmax.f32 %v795_v13, 0.0  ;;  %v798_v16 = vmax.f32 %v794_v14, 0.0 }
 0x17b   : > { %v1136_v17 = vpack.c.bf16 %v799_v15, %v798_v16 }
 0x17d   : > { %1139 = vst [vmem:[%s1417_s5 + $0x8] sm:$0xff] %v1136_v17  }
 0x17e PF: > { %s15_s22 = sadd.s32 1, %s1223_s22   ;;  %s1418_s18 = smov %s1211_s19 }
 0x17f   : > { %p12_p12 = scmp.ge.s32.totalorder %s15_s22, 4   ;;  %s1419_s19 = smov %s1292_s26 }
 0x180   : > { %s1420_s20 = smov %s1219_s21  ;;  %s1421_s21 = smov %s1423_s23 }
 0x181   :  { %14 = sbr.rel (!%p12_p12) target bundleno = 3 (0x3), region = 112 }

</bundles_post_ra>
